<compile_context>
chip_gen: v5e
topology: v5e:2x2
jax: 0.10.0
libtpu: 0.0.40
codegen_flags: <defaults>
</compile_context>

<pallas_src>
import jax
import jax.numpy as jnp
from jax.experimental import pallas as pl
from jax.experimental.pallas import tpu as pltpu

BN_EPS = 1e-5
MAX_TILE = 8192                       # pixel (lane) tile target, multiple of 128
VMEM_LIMIT = 32 * 1024 * 1024         # explicit scoped-VMEM budget (safe on v5e/v6e/v7x)


# ------------------------------ Pallas kernel ------------------------------- #

def _make_fused_kernel(n_true, with_density):
    """Fused conv(3x3) + BatchNorm(train) + ReLU [+ 1x1 density head] layer kernel."""
    inv_n = 1.0 / float(n_true)

    def kernel(slab_ref, wt_ref, gamma_ref, beta_ref, *rest):
        if with_density:
            wd_ref, o_ref, ssum, ssq, sc, sh = rest
        else:
            o_ref, ssum, ssq, sc, sh = rest

        p = pl.program_id(0)                 # pass: 0 = conv+stats, 1 = normalize+store
        i = pl.program_id(1)                 # pixel tile index
        last = pl.num_programs(1) - 1

        # Conv tile (recomputed on both passes; MXU has huge headroom at Cout<=8, K<=144).
        acc = jnp.dot(wt_ref[...], slab_ref[...],
                      preferred_element_type=jnp.float32)          # (Cout, NT) f32

        @pl.when(jnp.logical_and(p == 0, i == 0))
        def _init():
            ssum[...] = jnp.zeros_like(ssum)
            ssq[...] = jnp.zeros_like(ssq)

        @pl.when(p == 0)
        def _accumulate():
            ssum[...] += jnp.sum(acc, axis=1, keepdims=True)        # (Cout, 1)
            ssq[...] += jnp.sum(acc * acc, axis=1, keepdims=True)   # (Cout, 1)

        @pl.when(jnp.logical_and(p == 0, i == last))
        def _finalize():
            mean = ssum[...] * inv_n
            var = jnp.maximum(ssq[...] * inv_n - mean * mean, 0.0)  # biased var, clamped
            inv = jax.lax.rsqrt(var + BN_EPS)
            s = gamma_ref[...] * inv
            sc[...] = s
            sh[...] = beta_ref[...] - mean * s

        @pl.when(p == 1)
        def _normalize():
            a = jnp.maximum(acc * sc[...] + sh[...], 0.0)           # (Cout, NT) f32
            if with_density:
                # 1x1 density head as an MXU dot: (1, Cout) @ (Cout, NT) -> (1, NT)
                o_ref[...] = jnp.dot(wd_ref[...], a,
                                     preferred_element_type=jnp.float32)
            else:
                o_ref[...] = a.astype(o_ref.dtype)

    return kernel


# ------------------------------- helpers ------------------------------------ #

def _pick_tile(n_pad, max_tile=MAX_TILE):
    """Largest 128-aligned pixel tile that exactly divides n_pad (n_pad % 128 == 0)."""
    t = min(n_pad, max_tile)
    t -= t % 128
    t = max(t, 128)
    while n_pad % t:
        t -= 128
    return t


def _im2col_t(x_cbhw):
    """(C, B, H, W) -> transposed im2col slab (9*C, B*H*W), 'same' zero padding of 1."""
    c, b, h, w = x_cbhw.shape
    xp = jnp.pad(x_cbhw, ((0, 0), (0, 0), (1, 1), (1, 1)))
    taps = [xp[:, :, dh:dh + h, dw:dw + w] for dh in range(3) for dw in range(3)]
    return jnp.stack(taps, axis=0).reshape(9 * c, b * h * w)   # row order: (dh, dw, cin)


# --------------------------- conv layer wrapper ----------------------------- #

def conv_layer(x_cbhw, w, gamma, beta, density_w=None):
    """SamePadder(3x3) + Conv2d(3x3, no bias) + BatchNorm2d(train) + ReLU.

    If density_w is given, also applies the bias-free 1x1 density head (fused into the
    pass-1 epilogue) and returns a (1, B, H, W) f32 map instead of the activation.
    """
    c, b, h, w_sp = x_cbhw.shape
    n = b * h * w_sp
    cout = w.shape[0]
    k = 9 * c
    kp = ((k + 15) // 16) * 16                    # bf16 sublane packing: pad K to 16

    # Transposed im2col slab (Kp, Npad) bf16; weight slab (Cout, Kp) bf16.
    slab = _im2col_t(x_cbhw)
    wt = w.reshape(cout, k)                       # (Cout, 3, 3, Cin) -> (Cout, 9*Cin)
    if kp != k:
        slab = jnp.pad(slab, ((0, kp - k), (0, 0)))
        wt = jnp.pad(wt, ((0, 0), (0, kp - k)))
    n_pad = ((n + 127) // 128) * 128              # lane-dense 128-aligned pixel axis
    if n_pad != n:
        slab = jnp.pad(slab, ((0, 0), (0, n_pad - n)))   # zero cols: no effect on stats
    slab = slab.astype(jnp.bfloat16)
    wt = wt.astype(jnp.bfloat16)
    g = gamma.reshape(cout, 1).astype(jnp.float32)
    bt = beta.reshape(cout, 1).astype(jnp.float32)

    nt = _pick_tile(n_pad)
    grid = (2, n_pad // nt)                       # (pass, pixel tile)

    with_density = density_w is not None
    kernel = _make_fused_kernel(n, with_density)

    in_specs = [
        pl.BlockSpec((kp, nt), lambda p, i: (0, i)),      # slab tile (pipelined)
        pl.BlockSpec((cout, kp), lambda p, i: (0, 0)),    # weights stay resident
        pl.BlockSpec((cout, 1), lambda p, i: (0, 0)),     # gamma
        pl.BlockSpec((cout, 1), lambda p, i: (0, 0)),     # beta
    ]
    inputs = [slab, wt, g, bt]
    if with_density:
        wd = density_w.reshape(1, cout).astype(jnp.float32)
        in_specs.append(pl.BlockSpec((1, cout), lambda p, i: (0, 0)))
        inputs.append(wd)
        out_shape = jax.ShapeDtypeStruct((1, n_pad), jnp.float32)
        out_spec = pl.BlockSpec((1, nt), lambda p, i: (0, i))
    else:
        out_shape = jax.ShapeDtypeStruct((cout, n_pad), jnp.bfloat16)
        out_spec = pl.BlockSpec((cout, nt), lambda p, i: (0, i))

    out = pl.pallas_call(
        kernel,
        out_shape=out_shape,
        grid=grid,
        in_specs=in_specs,
        out_specs=out_spec,
        scratch_shapes=[pltpu.VMEM((cout, 1), jnp.float32),   # sum
                        pltpu.VMEM((cout, 1), jnp.float32),   # sum of squares
                        pltpu.VMEM((cout, 1), jnp.float32),   # scale
                        pltpu.VMEM((cout, 1), jnp.float32)],  # shift
        compiler_params=pltpu.CompilerParams(
            dimension_semantics=("arbitrary", "arbitrary"),
            vmem_limit_bytes=VMEM_LIMIT),
    )(*inputs)

    if n_pad != n:
        out = out[:, :n]
    if with_density:
        return out.reshape(1, b, h, w_sp)
    return out.reshape(cout, b, h, w_sp)


# ------------------------------ JAX glue ops -------------------------------- #

def _maxpool2(x):                                   # (C, B, H, W) -> (C, B, H/2, W/2)
    c, b, h, w = x.shape
    return x.reshape(c, b, h // 2, 2, w // 2, 2).max(axis=(3, 5))


def _upsample2(x):                                  # nearest-neighbour x2
    return jnp.repeat(jnp.repeat(x, 2, axis=2), 2, axis=3)


def conv_block(x, layer_params):
    for (w, g, bta) in layer_params:
        x = conv_layer(x, w, g, bta)
    return x


def conv_cat(to_conv, to_cat, layer_params):
    y = conv_block(to_conv, layer_params)
    y = _upsample2(y)
    return jnp.concatenate([y, to_cat.astype(y.dtype)], axis=0)   # channel concat


# --------------------------------- forward ---------------------------------- #

def unet_old_forward(x_nchw, params):
    x = jnp.transpose(x_nchw, (1, 0, 2, 3))          # NCHW -> (C, B, H, W)
    b1 = conv_block(x, params['block1'])
    p1 = _maxpool2(b1)
    b2 = conv_block(p1, params['block2'])
    p2 = _maxpool2(b2)
    b3 = conv_block(p2, params['block3'])
    p3 = _maxpool2(b3)
    b4 = conv_cat(p3, b3, params['block4'])
    b5 = conv_cat(b4, b2, params['block5'])
    b6 = conv_cat(b5, b1, params['block6'])
    # block7: first conv normally; second conv's pass 1 fuses the 1x1 density head.
    w0, g0, bt0 = params['block7'][0]
    b7a = conv_layer(b6, w0, g0, bt0)
    w1, g1, bt1 = params['block7'][1]
    dens = conv_layer(b7a, w1, g1, bt1, density_w=params['density'])   # (1, B, H, W)
    return jnp.transpose(dens, (1, 0, 2, 3))          # -> (B, 1, H, W)


# ------------------------------ parameter init ------------------------------ #

def _conv_bn_params(key, cin, cout):
    # Weight layout (Cout, kh, kw, Cin); PyTorch (Cout, Cin, kh, kw) maps via (0,2,3,1).
    w = jax.random.normal(key, (cout, 3, 3, cin), jnp.float32) * (2.0 / (9 * cin)) ** 0.5
    gamma = jnp.ones((cout,), jnp.float32)            # BatchNorm2d default init
    beta = jnp.zeros((cout,), jnp.float32)
    return (w, gamma, beta)


def init_params(key, input_filters, filters):
    f = filters
    plan = {
        'block1': [(input_filters, f), (f, f)],
        'block2': [(f, f), (f, f)],
        'block3': [(f, f), (f, f)],
        'block4': [(f, f), (f, f)],          # ConvCat conv block
        'block5': [(2 * f, f), (f, f)],      # ConvCat conv block
        'block6': [(2 * f, f), (f, f)],      # ConvCat conv block
        'block7': [(2 * f, f), (f, f)],
    }
    params = {}
    for name, convs in plan.items():
        layer_params = []
        for cin, cout in convs:
            key, sub = jax.random.split(key)
            layer_params.append(_conv_bn_params(sub, cin, cout))
        params[name] = layer_params
    key, sub = jax.random.split(key)
    params['density'] = jax.random.normal(sub, (1, f), jnp.float32) * (1.0 / f) ** 0.5
    return params


# ----------------------------------- main ----------------------------------- #

if __name__ == "__main__":
    INPUT_FILTERS = 3
    FILTERS = 8
    B, H, W = 2, 16, 16                               # spatial divisible by 8 (3 pools)

    key = jax.random.PRNGKey(0)
    key, pkey, xkey = jax.random.split(key, 3)
    params = init_params(pkey, INPUT_FILTERS, FILTERS)
    x = jax.random.normal(xkey, (B, INPUT_FILTERS, H, W), jnp.float32)

    fwd = jax.jit(unet_old_forward)
    out = jax.block_until_ready(fwd(x, params))

    assert out.shape == (B, 1, H, W), out.shape
    assert bool(jnp.all(jnp.isfinite(out)))
    print("KERNEL_OK")
</pallas_src>

<mosaic_0001>
module attributes {stable_mosaic.version = 11 : i64} {
  func.func @kernel(%arg0: i32, %arg1: i32, %arg2: memref<32x512xbf16, #tpu.memory_space<vmem>>, %arg3: memref<8x32xbf16, #tpu.memory_space<vmem>>, %arg4: memref<8x1xf32, #tpu.memory_space<vmem>>, %arg5: memref<8x1xf32, #tpu.memory_space<vmem>>, %arg6: memref<8x512xbf16, #tpu.memory_space<vmem>>, %arg7: memref<8x1xf32, #tpu.memory_space<vmem>>, %arg8: memref<8x1xf32, #tpu.memory_space<vmem>>, %arg9: memref<8x1xf32, #tpu.memory_space<vmem>>, %arg10: memref<8x1xf32, #tpu.memory_space<vmem>>) attributes {dimension_semantics = [#tpu.dimension_semantics<arbitrary>, #tpu.dimension_semantics<arbitrary>], iteration_bounds = array<i64: 2, 1>, scalar_prefetch = 0 : i64, scratch_operands = 4 : i64, tpu.core_type = #tpu.core_type<tc>, window_params = [{transform_indices = @transform_0, window_bounds = array<i64: 32, 512>}, {pipeline_mode = #tpu.pipeline_mode<synchronous>, transform_indices = @transform_1, window_bounds = array<i64: 8, 32>}, {pipeline_mode = #tpu.pipeline_mode<synchronous>, transform_indices = @transform_2, window_bounds = array<i64: 8, 1>}, {pipeline_mode = #tpu.pipeline_mode<synchronous>, transform_indices = @transform_3, window_bounds = array<i64: 8, 1>}, {transform_indices = @transform_4, window_bounds = array<i64: 8, 512>}]} {
    %c0 = arith.constant 0 : index
    %c0_0 = arith.constant 0 : index
    %0 = vector.load %arg3[%c0, %c0_0] : memref<8x32xbf16, #tpu.memory_space<vmem>>, vector<8x32xbf16>
    %c0_1 = arith.constant 0 : index
    %c0_2 = arith.constant 0 : index
    %1 = vector.load %arg2[%c0_1, %c0_2] : memref<32x512xbf16, #tpu.memory_space<vmem>>, vector<32x512xbf16>
    %cst = arith.constant dense<0.000000e+00> : vector<8x512xf32>
    %2 = tpu.matmul %0, %1, %cst {dimension_numbers = #tpu.dot_dimension_numbers<[1], [0], [0], [1], [0, 0, 1, 1], [], []>} : vector<8x32xbf16>, vector<32x512xbf16>, vector<8x512xf32> -> vector<8x512xf32>
    %c0_i32 = arith.constant 0 : i32
    %3 = arith.cmpi eq, %arg0, %c0_i32 : i32
    %c0_i32_3 = arith.constant 0 : i32
    %4 = arith.cmpi eq, %arg1, %c0_i32_3 : i32
    %5 = arith.andi %3, %4 : i1
    %6 = arith.extui %5 : i1 to i32
    %c0_i32_4 = arith.constant 0 : i32
    %7 = arith.cmpi ne, %6, %c0_i32_4 : i32
    scf.if %7 {
      %cst_11 = arith.constant 0.000000e+00 : f32
      %19 = vector.broadcast %cst_11 : f32 to vector<8x1xf32>
      %c0_12 = arith.constant 0 : index
      %c0_13 = arith.constant 0 : index
      %20 = vector.load %arg7[%c0_12, %c0_13] : memref<8x1xf32, #tpu.memory_space<vmem>>, vector<8x1xf32>
      tpu.vector_store %arg7[%c0_12, %c0_13], %19 {strides = array<i32>} : memref<8x1xf32, #tpu.memory_space<vmem>>, vector<8x1xf32>,
      %cst_14 = arith.constant 0.000000e+00 : f32
      %21 = vector.broadcast %cst_14 : f32 to vector<8x1xf32>
      %c0_15 = arith.constant 0 : index
      %c0_16 = arith.constant 0 : index
      %22 = vector.load %arg8[%c0_15, %c0_16] : memref<8x1xf32, #tpu.memory_space<vmem>>, vector<8x1xf32>
      tpu.vector_store %arg8[%c0_15, %c0_16], %21 {strides = array<i32>} : memref<8x1xf32, #tpu.memory_space<vmem>>, vector<8x1xf32>,
    } else {
    }
    %c0_i32_5 = arith.constant 0 : i32
    %8 = arith.cmpi eq, %arg0, %c0_i32_5 : i32
    %9 = arith.extui %8 : i1 to i32
    %c0_i32_6 = arith.constant 0 : i32
    %10 = arith.cmpi ne, %9, %c0_i32_6 : i32
    scf.if %10 {
      %c0_11 = arith.constant 0 : index
      %c0_12 = arith.constant 0 : index
      %19 = vector.load %arg7[%c0_11, %c0_12] : memref<8x1xf32, #tpu.memory_space<vmem>>, vector<8x1xf32>
      %cst_13 = arith.constant dense<0.000000e+00> : vector<8xf32>
      %20 = vector.multi_reduction <add>, %2, %cst_13 [1] : vector<8x512xf32> to vector<8xf32>
      %21 = vector.shape_cast %20 : vector<8xf32> to vector<8x1xf32>
      %22 = arith.addf %19, %21 : vector<8x1xf32>
      %c0_14 = arith.constant 0 : index
      %c0_15 = arith.constant 0 : index
      %23 = vector.load %arg7[%c0_14, %c0_15] : memref<8x1xf32, #tpu.memory_space<vmem>>, vector<8x1xf32>
      tpu.vector_store %arg7[%c0_14, %c0_15], %22 {strides = array<i32>} : memref<8x1xf32, #tpu.memory_space<vmem>>, vector<8x1xf32>,
      %c0_16 = arith.constant 0 : index
      %c0_17 = arith.constant 0 : index
      %24 = vector.load %arg8[%c0_16, %c0_17] : memref<8x1xf32, #tpu.memory_space<vmem>>, vector<8x1xf32>
      %25 = arith.mulf %2, %2 : vector<8x512xf32>
      %cst_18 = arith.constant dense<0.000000e+00> : vector<8xf32>
      %26 = vector.multi_reduction <add>, %25, %cst_18 [1] : vector<8x512xf32> to vector<8xf32>
      %27 = vector.shape_cast %26 : vector<8xf32> to vector<8x1xf32>
      %28 = arith.addf %24, %27 : vector<8x1xf32>
      %c0_19 = arith.constant 0 : index
      %c0_20 = arith.constant 0 : index
      %29 = vector.load %arg8[%c0_19, %c0_20] : memref<8x1xf32, #tpu.memory_space<vmem>>, vector<8x1xf32>
      tpu.vector_store %arg8[%c0_19, %c0_20], %28 {strides = array<i32>} : memref<8x1xf32, #tpu.memory_space<vmem>>, vector<8x1xf32>,
    } else {
    }
    %c0_i32_7 = arith.constant 0 : i32
    %11 = arith.cmpi eq, %arg0, %c0_i32_7 : i32
    %c0_i32_8 = arith.constant 0 : i32
    %12 = arith.cmpi eq, %arg1, %c0_i32_8 : i32
    %13 = arith.andi %11, %12 : i1
    %14 = arith.extui %13 : i1 to i32
    %c0_i32_9 = arith.constant 0 : i32
    %15 = arith.cmpi ne, %14, %c0_i32_9 : i32
    scf.if %15 {
      %c0_11 = arith.constant 0 : index
      %c0_12 = arith.constant 0 : index
      %19 = vector.load %arg7[%c0_11, %c0_12] : memref<8x1xf32, #tpu.memory_space<vmem>>, vector<8x1xf32>
      %cst_13 = arith.constant 0.001953125 : f32
      %20 = vector.broadcast %cst_13 : f32 to vector<8x1xf32>
      %21 = arith.mulf %19, %20 : vector<8x1xf32>
      %c0_14 = arith.constant 0 : index
      %c0_15 = arith.constant 0 : index
      %22 = vector.load %arg8[%c0_14, %c0_15] : memref<8x1xf32, #tpu.memory_space<vmem>>, vector<8x1xf32>
      %cst_16 = arith.constant 0.001953125 : f32
      %23 = vector.broadcast %cst_16 : f32 to vector<8x1xf32>
      %24 = arith.mulf %22, %23 : vector<8x1xf32>
      %25 = arith.mulf %21, %21 : vector<8x1xf32>
      %26 = arith.subf %24, %25 : vector<8x1xf32>
      %cst_17 = arith.constant 0.000000e+00 : f32
      %27 = vector.broadcast %cst_17 : f32 to vector<8x1xf32>
      %28 = arith.maximumf %26, %27 : vector<8x1xf32>
      %cst_18 = arith.constant 9.99999974E-6 : f32
      %29 = vector.broadcast %cst_18 : f32 to vector<8x1xf32>
      %30 = arith.addf %28, %29 : vector<8x1xf32>
      %31 = math.rsqrt %30 : vector<8x1xf32>
      %c0_19 = arith.constant 0 : index
      %c0_20 = arith.constant 0 : index
      %32 = vector.load %arg4[%c0_19, %c0_20] : memref<8x1xf32, #tpu.memory_space<vmem>>, vector<8x1xf32>
      %33 = arith.mulf %32, %31 : vector<8x1xf32>
      %c0_21 = arith.constant 0 : index
      %c0_22 = arith.constant 0 : index
      %34 = vector.load %arg9[%c0_21, %c0_22] : memref<8x1xf32, #tpu.memory_space<vmem>>, vector<8x1xf32>
      tpu.vector_store %arg9[%c0_21, %c0_22], %33 {strides = array<i32>} : memref<8x1xf32, #tpu.memory_space<vmem>>, vector<8x1xf32>,
      %c0_23 = arith.constant 0 : index
      %c0_24 = arith.constant 0 : index
      %35 = vector.load %arg5[%c0_23, %c0_24] : memref<8x1xf32, #tpu.memory_space<vmem>>, vector<8x1xf32>
      %36 = arith.mulf %21, %33 : vector<8x1xf32>
      %37 = arith.subf %35, %36 : vector<8x1xf32>
      %c0_25 = arith.constant 0 : index
      %c0_26 = arith.constant 0 : index
      %38 = vector.load %arg10[%c0_25, %c0_26] : memref<8x1xf32, #tpu.memory_space<vmem>>, vector<8x1xf32>
      tpu.vector_store %arg10[%c0_25, %c0_26], %37 {strides = array<i32>} : memref<8x1xf32, #tpu.memory_space<vmem>>, vector<8x1xf32>,
    } else {
    }
    %c1_i32 = arith.constant 1 : i32
    %16 = arith.cmpi eq, %arg0, %c1_i32 : i32
    %17 = arith.extui %16 : i1 to i32
    %c0_i32_10 = arith.constant 0 : i32
    %18 = arith.cmpi ne, %17, %c0_i32_10 : i32
    scf.if %18 {
      %c0_11 = arith.constant 0 : index
      %c0_12 = arith.constant 0 : index
      %19 = vector.load %arg9[%c0_11, %c0_12] : memref<8x1xf32, #tpu.memory_space<vmem>>, vector<8x1xf32>
      %20 = vector.broadcast %19 : vector<8x1xf32> to vector<8x512xf32>
      %21 = arith.mulf %2, %20 : vector<8x512xf32>
      %c0_13 = arith.constant 0 : index
      %c0_14 = arith.constant 0 : index
      %22 = vector.load %arg10[%c0_13, %c0_14] : memref<8x1xf32, #tpu.memory_space<vmem>>, vector<8x1xf32>
      %23 = vector.broadcast %22 : vector<8x1xf32> to vector<8x512xf32>
      %24 = arith.addf %21, %23 : vector<8x512xf32>
      %cst_15 = arith.constant 0.000000e+00 : f32
      %25 = vector.broadcast %cst_15 : f32 to vector<8x512xf32>
      %26 = arith.maximumf %24, %25 : vector<8x512xf32>
      %27 = arith.truncf %26 : vector<8x512xf32> to vector<8x512xbf16>
      %c0_16 = arith.constant 0 : index
      %c0_17 = arith.constant 0 : index
      %28 = vector.load %arg6[%c0_16, %c0_17] : memref<8x512xbf16, #tpu.memory_space<vmem>>, vector<8x512xbf16>
      tpu.vector_store %arg6[%c0_16, %c0_17], %27 {strides = array<i32>} : memref<8x512xbf16, #tpu.memory_space<vmem>>, vector<8x512xbf16>,
    } else {
    }
    return
  }
  func.func @transform_0(%arg0: i32, %arg1: i32) -> (i32, i32) {
    %c0_i32 = arith.constant 0 : i32
    %c0_i32_0 = arith.constant 0 : i32
    return %c0_i32, %arg1 : i32, i32
  }
  func.func @transform_1(%arg0: i32, %arg1: i32) -> (i32, i32) {
    %c0_i32 = arith.constant 0 : i32
    %c0_i32_0 = arith.constant 0 : i32
    %c0_i32_1 = arith.constant 0 : i32
    return %c0_i32, %c0_i32_0 : i32, i32
  }
  func.func @transform_2(%arg0: i32, %arg1: i32) -> (i32, i32) {
    %c0_i32 = arith.constant 0 : i32
    %c0_i32_0 = arith.constant 0 : i32
    %c0_i32_1 = arith.constant 0 : i32
    return %c0_i32, %c0_i32_0 : i32, i32
  }
  func.func @transform_3(%arg0: i32, %arg1: i32) -> (i32, i32) {
    %c0_i32 = arith.constant 0 : i32
    %c0_i32_0 = arith.constant 0 : i32
    %c0_i32_1 = arith.constant 0 : i32
    return %c0_i32, %c0_i32_0 : i32, i32
  }
  func.func @transform_4(%arg0: i32, %arg1: i32) -> (i32, i32) {
    %c0_i32 = arith.constant 0 : i32
    %c0_i32_0 = arith.constant 0 : i32
    return %c0_i32, %arg1 : i32, i32
  }
}

module attributes {stable_mosaic.version = 11 : i64} {
  func.func @kernel(%arg0: i32, %arg1: i32, %arg2: memref<80x512xbf16, #tpu.memory_space<vmem>>, %arg3: memref<8x80xbf16, #tpu.memory_space<vmem>>, %arg4: memref<8x1xf32, #tpu.memory_space<vmem>>, %arg5: memref<8x1xf32, #tpu.memory_space<vmem>>, %arg6: memref<8x512xbf16, #tpu.memory_space<vmem>>, %arg7: memref<8x1xf32, #tpu.memory_space<vmem>>, %arg8: memref<8x1xf32, #tpu.memory_space<vmem>>, %arg9: memref<8x1xf32, #tpu.memory_space<vmem>>, %arg10: memref<8x1xf32, #tpu.memory_space<vmem>>) attributes {dimension_semantics = [#tpu.dimension_semantics<arbitrary>, #tpu.dimension_semantics<arbitrary>], iteration_bounds = array<i64: 2, 1>, scalar_prefetch = 0 : i64, scratch_operands = 4 : i64, tpu.core_type = #tpu.core_type<tc>, window_params = [{transform_indices = @transform_0, window_bounds = array<i64: 80, 512>}, {pipeline_mode = #tpu.pipeline_mode<synchronous>, transform_indices = @transform_1, window_bounds = array<i64: 8, 80>}, {pipeline_mode = #tpu.pipeline_mode<synchronous>, transform_indices = @transform_2, window_bounds = array<i64: 8, 1>}, {pipeline_mode = #tpu.pipeline_mode<synchronous>, transform_indices = @transform_3, window_bounds = array<i64: 8, 1>}, {transform_indices = @transform_4, window_bounds = array<i64: 8, 512>}]} {
    %c0 = arith.constant 0 : index
    %c0_0 = arith.constant 0 : index
    %0 = vector.load %arg3[%c0, %c0_0] : memref<8x80xbf16, #tpu.memory_space<vmem>>, vector<8x80xbf16>
    %c0_1 = arith.constant 0 : index
    %c0_2 = arith.constant 0 : index
    %1 = vector.load %arg2[%c0_1, %c0_2] : memref<80x512xbf16, #tpu.memory_space<vmem>>, vector<80x512xbf16>
    %cst = arith.constant dense<0.000000e+00> : vector<8x512xf32>
    %2 = tpu.matmul %0, %1, %cst {dimension_numbers = #tpu.dot_dimension_numbers<[1], [0], [0], [1], [0, 0, 1, 1], [], []>} : vector<8x80xbf16>, vector<80x512xbf16>, vector<8x512xf32> -> vector<8x512xf32>
    %c0_i32 = arith.constant 0 : i32
    %3 = arith.cmpi eq, %arg0, %c0_i32 : i32
    %c0_i32_3 = arith.constant 0 : i32
    %4 = arith.cmpi eq, %arg1, %c0_i32_3 : i32
    %5 = arith.andi %3, %4 : i1
    %6 = arith.extui %5 : i1 to i32
    %c0_i32_4 = arith.constant 0 : i32
    %7 = arith.cmpi ne, %6, %c0_i32_4 : i32
    scf.if %7 {
      %cst_11 = arith.constant 0.000000e+00 : f32
      %19 = vector.broadcast %cst_11 : f32 to vector<8x1xf32>
      %c0_12 = arith.constant 0 : index
      %c0_13 = arith.constant 0 : index
      %20 = vector.load %arg7[%c0_12, %c0_13] : memref<8x1xf32, #tpu.memory_space<vmem>>, vector<8x1xf32>
      tpu.vector_store %arg7[%c0_12, %c0_13], %19 {strides = array<i32>} : memref<8x1xf32, #tpu.memory_space<vmem>>, vector<8x1xf32>,
      %cst_14 = arith.constant 0.000000e+00 : f32
      %21 = vector.broadcast %cst_14 : f32 to vector<8x1xf32>
      %c0_15 = arith.constant 0 : index
      %c0_16 = arith.constant 0 : index
      %22 = vector.load %arg8[%c0_15, %c0_16] : memref<8x1xf32, #tpu.memory_space<vmem>>, vector<8x1xf32>
      tpu.vector_store %arg8[%c0_15, %c0_16], %21 {strides = array<i32>} : memref<8x1xf32, #tpu.memory_space<vmem>>, vector<8x1xf32>,
    } else {
    }
    %c0_i32_5 = arith.constant 0 : i32
    %8 = arith.cmpi eq, %arg0, %c0_i32_5 : i32
    %9 = arith.extui %8 : i1 to i32
    %c0_i32_6 = arith.constant 0 : i32
    %10 = arith.cmpi ne, %9, %c0_i32_6 : i32
    scf.if %10 {
      %c0_11 = arith.constant 0 : index
      %c0_12 = arith.constant 0 : index
      %19 = vector.load %arg7[%c0_11, %c0_12] : memref<8x1xf32, #tpu.memory_space<vmem>>, vector<8x1xf32>
      %cst_13 = arith.constant dense<0.000000e+00> : vector<8xf32>
      %20 = vector.multi_reduction <add>, %2, %cst_13 [1] : vector<8x512xf32> to vector<8xf32>
      %21 = vector.shape_cast %20 : vector<8xf32> to vector<8x1xf32>
      %22 = arith.addf %19, %21 : vector<8x1xf32>
      %c0_14 = arith.constant 0 : index
      %c0_15 = arith.constant 0 : index
      %23 = vector.load %arg7[%c0_14, %c0_15] : memref<8x1xf32, #tpu.memory_space<vmem>>, vector<8x1xf32>
      tpu.vector_store %arg7[%c0_14, %c0_15], %22 {strides = array<i32>} : memref<8x1xf32, #tpu.memory_space<vmem>>, vector<8x1xf32>,
      %c0_16 = arith.constant 0 : index
      %c0_17 = arith.constant 0 : index
      %24 = vector.load %arg8[%c0_16, %c0_17] : memref<8x1xf32, #tpu.memory_space<vmem>>, vector<8x1xf32>
      %25 = arith.mulf %2, %2 : vector<8x512xf32>
      %cst_18 = arith.constant dense<0.000000e+00> : vector<8xf32>
      %26 = vector.multi_reduction <add>, %25, %cst_18 [1] : vector<8x512xf32> to vector<8xf32>
      %27 = vector.shape_cast %26 : vector<8xf32> to vector<8x1xf32>
      %28 = arith.addf %24, %27 : vector<8x1xf32>
      %c0_19 = arith.constant 0 : index
      %c0_20 = arith.constant 0 : index
      %29 = vector.load %arg8[%c0_19, %c0_20] : memref<8x1xf32, #tpu.memory_space<vmem>>, vector<8x1xf32>
      tpu.vector_store %arg8[%c0_19, %c0_20], %28 {strides = array<i32>} : memref<8x1xf32, #tpu.memory_space<vmem>>, vector<8x1xf32>,
    } else {
    }
    %c0_i32_7 = arith.constant 0 : i32
    %11 = arith.cmpi eq, %arg0, %c0_i32_7 : i32
    %c0_i32_8 = arith.constant 0 : i32
    %12 = arith.cmpi eq, %arg1, %c0_i32_8 : i32
    %13 = arith.andi %11, %12 : i1
    %14 = arith.extui %13 : i1 to i32
    %c0_i32_9 = arith.constant 0 : i32
    %15 = arith.cmpi ne, %14, %c0_i32_9 : i32
    scf.if %15 {
      %c0_11 = arith.constant 0 : index
      %c0_12 = arith.constant 0 : index
      %19 = vector.load %arg7[%c0_11, %c0_12] : memref<8x1xf32, #tpu.memory_space<vmem>>, vector<8x1xf32>
      %cst_13 = arith.constant 0.001953125 : f32
      %20 = vector.broadcast %cst_13 : f32 to vector<8x1xf32>
      %21 = arith.mulf %19, %20 : vector<8x1xf32>
      %c0_14 = arith.constant 0 : index
      %c0_15 = arith.constant 0 : index
      %22 = vector.load %arg8[%c0_14, %c0_15] : memref<8x1xf32, #tpu.memory_space<vmem>>, vector<8x1xf32>
      %cst_16 = arith.constant 0.001953125 : f32
      %23 = vector.broadcast %cst_16 : f32 to vector<8x1xf32>
      %24 = arith.mulf %22, %23 : vector<8x1xf32>
      %25 = arith.mulf %21, %21 : vector<8x1xf32>
      %26 = arith.subf %24, %25 : vector<8x1xf32>
      %cst_17 = arith.constant 0.000000e+00 : f32
      %27 = vector.broadcast %cst_17 : f32 to vector<8x1xf32>
      %28 = arith.maximumf %26, %27 : vector<8x1xf32>
      %cst_18 = arith.constant 9.99999974E-6 : f32
      %29 = vector.broadcast %cst_18 : f32 to vector<8x1xf32>
      %30 = arith.addf %28, %29 : vector<8x1xf32>
      %31 = math.rsqrt %30 : vector<8x1xf32>
      %c0_19 = arith.constant 0 : index
      %c0_20 = arith.constant 0 : index
      %32 = vector.load %arg4[%c0_19, %c0_20] : memref<8x1xf32, #tpu.memory_space<vmem>>, vector<8x1xf32>
      %33 = arith.mulf %32, %31 : vector<8x1xf32>
      %c0_21 = arith.constant 0 : index
      %c0_22 = arith.constant 0 : index
      %34 = vector.load %arg9[%c0_21, %c0_22] : memref<8x1xf32, #tpu.memory_space<vmem>>, vector<8x1xf32>
      tpu.vector_store %arg9[%c0_21, %c0_22], %33 {strides = array<i32>} : memref<8x1xf32, #tpu.memory_space<vmem>>, vector<8x1xf32>,
      %c0_23 = arith.constant 0 : index
      %c0_24 = arith.constant 0 : index
      %35 = vector.load %arg5[%c0_23, %c0_24] : memref<8x1xf32, #tpu.memory_space<vmem>>, vector<8x1xf32>
      %36 = arith.mulf %21, %33 : vector<8x1xf32>
      %37 = arith.subf %35, %36 : vector<8x1xf32>
      %c0_25 = arith.constant 0 : index
      %c0_26 = arith.constant 0 : index
      %38 = vector.load %arg10[%c0_25, %c0_26] : memref<8x1xf32, #tpu.memory_space<vmem>>, vector<8x1xf32>
      tpu.vector_store %arg10[%c0_25, %c0_26], %37 {strides = array<i32>} : memref<8x1xf32, #tpu.memory_space<vmem>>, vector<8x1xf32>,
    } else {
    }
    %c1_i32 = arith.constant 1 : i32
    %16 = arith.cmpi eq, %arg0, %c1_i32 : i32
    %17 = arith.extui %16 : i1 to i32
    %c0_i32_10 = arith.constant 0 : i32
    %18 = arith.cmpi ne, %17, %c0_i32_10 : i32
    scf.if %18 {
      %c0_11 = arith.constant 0 : index
      %c0_12 = arith.constant 0 : index
      %19 = vector.load %arg9[%c0_11, %c0_12] : memref<8x1xf32, #tpu.memory_space<vmem>>, vector<8x1xf32>
      %20 = vector.broadcast %19 : vector<8x1xf32> to vector<8x512xf32>
      %21 = arith.mulf %2, %20 : vector<8x512xf32>
      %c0_13 = arith.constant 0 : index
      %c0_14 = arith.constant 0 : index
      %22 = vector.load %arg10[%c0_13, %c0_14] : memref<8x1xf32, #tpu.memory_space<vmem>>, vector<8x1xf32>
      %23 = vector.broadcast %22 : vector<8x1xf32> to vector<8x512xf32>
      %24 = arith.addf %21, %23 : vector<8x512xf32>
      %cst_15 = arith.constant 0.000000e+00 : f32
      %25 = vector.broadcast %cst_15 : f32 to vector<8x512xf32>
      %26 = arith.maximumf %24, %25 : vector<8x512xf32>
      %27 = arith.truncf %26 : vector<8x512xf32> to vector<8x512xbf16>
      %c0_16 = arith.constant 0 : index
      %c0_17 = arith.constant 0 : index
      %28 = vector.load %arg6[%c0_16, %c0_17] : memref<8x512xbf16, #tpu.memory_space<vmem>>, vector<8x512xbf16>
      tpu.vector_store %arg6[%c0_16, %c0_17], %27 {strides = array<i32>} : memref<8x512xbf16, #tpu.memory_space<vmem>>, vector<8x512xbf16>,
    } else {
    }
    return
  }
  func.func @transform_0(%arg0: i32, %arg1: i32) -> (i32, i32) {
    %c0_i32 = arith.constant 0 : i32
    %c0_i32_0 = arith.constant 0 : i32
    return %c0_i32, %arg1 : i32, i32
  }
  func.func @transform_1(%arg0: i32, %arg1: i32) -> (i32, i32) {
    %c0_i32 = arith.constant 0 : i32
    %c0_i32_0 = arith.constant 0 : i32
    %c0_i32_1 = arith.constant 0 : i32
    return %c0_i32, %c0_i32_0 : i32, i32
  }
  func.func @transform_2(%arg0: i32, %arg1: i32) -> (i32, i32) {
    %c0_i32 = arith.constant 0 : i32
    %c0_i32_0 = arith.constant 0 : i32
    %c0_i32_1 = arith.constant 0 : i32
    return %c0_i32, %c0_i32_0 : i32, i32
  }
  func.func @transform_3(%arg0: i32, %arg1: i32) -> (i32, i32) {
    %c0_i32 = arith.constant 0 : i32
    %c0_i32_0 = arith.constant 0 : i32
    %c0_i32_1 = arith.constant 0 : i32
    return %c0_i32, %c0_i32_0 : i32, i32
  }
  func.func @transform_4(%arg0: i32, %arg1: i32) -> (i32, i32) {
    %c0_i32 = arith.constant 0 : i32
    %c0_i32_0 = arith.constant 0 : i32
    return %c0_i32, %arg1 : i32, i32
  }
}

module attributes {stable_mosaic.version = 11 : i64} {
  func.func @kernel(%arg0: i32, %arg1: i32, %arg2: memref<80x128xbf16, #tpu.memory_space<vmem>>, %arg3: memref<8x80xbf16, #tpu.memory_space<vmem>>, %arg4: memref<8x1xf32, #tpu.memory_space<vmem>>, %arg5: memref<8x1xf32, #tpu.memory_space<vmem>>, %arg6: memref<8x128xbf16, #tpu.memory_space<vmem>>, %arg7: memref<8x1xf32, #tpu.memory_space<vmem>>, %arg8: memref<8x1xf32, #tpu.memory_space<vmem>>, %arg9: memref<8x1xf32, #tpu.memory_space<vmem>>, %arg10: memref<8x1xf32, #tpu.memory_space<vmem>>) attributes {dimension_semantics = [#tpu.dimension_semantics<arbitrary>, #tpu.dimension_semantics<arbitrary>], iteration_bounds = array<i64: 2, 1>, scalar_prefetch = 0 : i64, scratch_operands = 4 : i64, tpu.core_type = #tpu.core_type<tc>, window_params = [{transform_indices = @transform_0, window_bounds = array<i64: 80, 128>}, {pipeline_mode = #tpu.pipeline_mode<synchronous>, transform_indices = @transform_1, window_bounds = array<i64: 8, 80>}, {pipeline_mode = #tpu.pipeline_mode<synchronous>, transform_indices = @transform_2, window_bounds = array<i64: 8, 1>}, {pipeline_mode = #tpu.pipeline_mode<synchronous>, transform_indices = @transform_3, window_bounds = array<i64: 8, 1>}, {transform_indices = @transform_4, window_bounds = array<i64: 8, 128>}]} {
    %c0 = arith.constant 0 : index
    %c0_0 = arith.constant 0 : index
    %0 = vector.load %arg3[%c0, %c0_0] : memref<8x80xbf16, #tpu.memory_space<vmem>>, vector<8x80xbf16>
    %c0_1 = arith.constant 0 : index
    %c0_2 = arith.constant 0 : index
    %1 = vector.load %arg2[%c0_1, %c0_2] : memref<80x128xbf16, #tpu.memory_space<vmem>>, vector<80x128xbf16>
    %cst = arith.constant dense<0.000000e+00> : vector<8x128xf32>
    %2 = tpu.matmul %0, %1, %cst {dimension_numbers = #tpu.dot_dimension_numbers<[1], [0], [0], [1], [0, 0, 1, 1], [], []>} : vector<8x80xbf16>, vector<80x128xbf16>, vector<8x128xf32> -> vector<8x128xf32>
    %c0_i32 = arith.constant 0 : i32
    %3 = arith.cmpi eq, %arg0, %c0_i32 : i32
    %c0_i32_3 = arith.constant 0 : i32
    %4 = arith.cmpi eq, %arg1, %c0_i32_3 : i32
    %5 = arith.andi %3, %4 : i1
    %6 = arith.extui %5 : i1 to i32
    %c0_i32_4 = arith.constant 0 : i32
    %7 = arith.cmpi ne, %6, %c0_i32_4 : i32
    scf.if %7 {
      %cst_11 = arith.constant 0.000000e+00 : f32
      %19 = vector.broadcast %cst_11 : f32 to vector<8x1xf32>
      %c0_12 = arith.constant 0 : index
      %c0_13 = arith.constant 0 : index
      %20 = vector.load %arg7[%c0_12, %c0_13] : memref<8x1xf32, #tpu.memory_space<vmem>>, vector<8x1xf32>
      tpu.vector_store %arg7[%c0_12, %c0_13], %19 {strides = array<i32>} : memref<8x1xf32, #tpu.memory_space<vmem>>, vector<8x1xf32>,
      %cst_14 = arith.constant 0.000000e+00 : f32
      %21 = vector.broadcast %cst_14 : f32 to vector<8x1xf32>
      %c0_15 = arith.constant 0 : index
      %c0_16 = arith.constant 0 : index
      %22 = vector.load %arg8[%c0_15, %c0_16] : memref<8x1xf32, #tpu.memory_space<vmem>>, vector<8x1xf32>
      tpu.vector_store %arg8[%c0_15, %c0_16], %21 {strides = array<i32>} : memref<8x1xf32, #tpu.memory_space<vmem>>, vector<8x1xf32>,
    } else {
    }
    %c0_i32_5 = arith.constant 0 : i32
    %8 = arith.cmpi eq, %arg0, %c0_i32_5 : i32
    %9 = arith.extui %8 : i1 to i32
    %c0_i32_6 = arith.constant 0 : i32
    %10 = arith.cmpi ne, %9, %c0_i32_6 : i32
    scf.if %10 {
      %c0_11 = arith.constant 0 : index
      %c0_12 = arith.constant 0 : index
      %19 = vector.load %arg7[%c0_11, %c0_12] : memref<8x1xf32, #tpu.memory_space<vmem>>, vector<8x1xf32>
      %cst_13 = arith.constant dense<0.000000e+00> : vector<8xf32>
      %20 = vector.multi_reduction <add>, %2, %cst_13 [1] : vector<8x128xf32> to vector<8xf32>
      %21 = vector.shape_cast %20 : vector<8xf32> to vector<8x1xf32>
      %22 = arith.addf %19, %21 : vector<8x1xf32>
      %c0_14 = arith.constant 0 : index
      %c0_15 = arith.constant 0 : index
      %23 = vector.load %arg7[%c0_14, %c0_15] : memref<8x1xf32, #tpu.memory_space<vmem>>, vector<8x1xf32>
      tpu.vector_store %arg7[%c0_14, %c0_15], %22 {strides = array<i32>} : memref<8x1xf32, #tpu.memory_space<vmem>>, vector<8x1xf32>,
      %c0_16 = arith.constant 0 : index
      %c0_17 = arith.constant 0 : index
      %24 = vector.load %arg8[%c0_16, %c0_17] : memref<8x1xf32, #tpu.memory_space<vmem>>, vector<8x1xf32>
      %25 = arith.mulf %2, %2 : vector<8x128xf32>
      %cst_18 = arith.constant dense<0.000000e+00> : vector<8xf32>
      %26 = vector.multi_reduction <add>, %25, %cst_18 [1] : vector<8x128xf32> to vector<8xf32>
      %27 = vector.shape_cast %26 : vector<8xf32> to vector<8x1xf32>
      %28 = arith.addf %24, %27 : vector<8x1xf32>
      %c0_19 = arith.constant 0 : index
      %c0_20 = arith.constant 0 : index
      %29 = vector.load %arg8[%c0_19, %c0_20] : memref<8x1xf32, #tpu.memory_space<vmem>>, vector<8x1xf32>
      tpu.vector_store %arg8[%c0_19, %c0_20], %28 {strides = array<i32>} : memref<8x1xf32, #tpu.memory_space<vmem>>, vector<8x1xf32>,
    } else {
    }
    %c0_i32_7 = arith.constant 0 : i32
    %11 = arith.cmpi eq, %arg0, %c0_i32_7 : i32
    %c0_i32_8 = arith.constant 0 : i32
    %12 = arith.cmpi eq, %arg1, %c0_i32_8 : i32
    %13 = arith.andi %11, %12 : i1
    %14 = arith.extui %13 : i1 to i32
    %c0_i32_9 = arith.constant 0 : i32
    %15 = arith.cmpi ne, %14, %c0_i32_9 : i32
    scf.if %15 {
      %c0_11 = arith.constant 0 : index
      %c0_12 = arith.constant 0 : index
      %19 = vector.load %arg7[%c0_11, %c0_12] : memref<8x1xf32, #tpu.memory_space<vmem>>, vector<8x1xf32>
      %cst_13 = arith.constant 7.812500e-03 : f32
      %20 = vector.broadcast %cst_13 : f32 to vector<8x1xf32>
      %21 = arith.mulf %19, %20 : vector<8x1xf32>
      %c0_14 = arith.constant 0 : index
      %c0_15 = arith.constant 0 : index
      %22 = vector.load %arg8[%c0_14, %c0_15] : memref<8x1xf32, #tpu.memory_space<vmem>>, vector<8x1xf32>
      %cst_16 = arith.constant 7.812500e-03 : f32
      %23 = vector.broadcast %cst_16 : f32 to vector<8x1xf32>
      %24 = arith.mulf %22, %23 : vector<8x1xf32>
      %25 = arith.mulf %21, %21 : vector<8x1xf32>
      %26 = arith.subf %24, %25 : vector<8x1xf32>
      %cst_17 = arith.constant 0.000000e+00 : f32
      %27 = vector.broadcast %cst_17 : f32 to vector<8x1xf32>
      %28 = arith.maximumf %26, %27 : vector<8x1xf32>
      %cst_18 = arith.constant 9.99999974E-6 : f32
      %29 = vector.broadcast %cst_18 : f32 to vector<8x1xf32>
      %30 = arith.addf %28, %29 : vector<8x1xf32>
      %31 = math.rsqrt %30 : vector<8x1xf32>
      %c0_19 = arith.constant 0 : index
      %c0_20 = arith.constant 0 : index
      %32 = vector.load %arg4[%c0_19, %c0_20] : memref<8x1xf32, #tpu.memory_space<vmem>>, vector<8x1xf32>
      %33 = arith.mulf %32, %31 : vector<8x1xf32>
      %c0_21 = arith.constant 0 : index
      %c0_22 = arith.constant 0 : index
      %34 = vector.load %arg9[%c0_21, %c0_22] : memref<8x1xf32, #tpu.memory_space<vmem>>, vector<8x1xf32>
      tpu.vector_store %arg9[%c0_21, %c0_22], %33 {strides = array<i32>} : memref<8x1xf32, #tpu.memory_space<vmem>>, vector<8x1xf32>,
      %c0_23 = arith.constant 0 : index
      %c0_24 = arith.constant 0 : index
      %35 = vector.load %arg5[%c0_23, %c0_24] : memref<8x1xf32, #tpu.memory_space<vmem>>, vector<8x1xf32>
      %36 = arith.mulf %21, %33 : vector<8x1xf32>
      %37 = arith.subf %35, %36 : vector<8x1xf32>
      %c0_25 = arith.constant 0 : index
      %c0_26 = arith.constant 0 : index
      %38 = vector.load %arg10[%c0_25, %c0_26] : memref<8x1xf32, #tpu.memory_space<vmem>>, vector<8x1xf32>
      tpu.vector_store %arg10[%c0_25, %c0_26], %37 {strides = array<i32>} : memref<8x1xf32, #tpu.memory_space<vmem>>, vector<8x1xf32>,
    } else {
    }
    %c1_i32 = arith.constant 1 : i32
    %16 = arith.cmpi eq, %arg0, %c1_i32 : i32
    %17 = arith.extui %16 : i1 to i32
    %c0_i32_10 = arith.constant 0 : i32
    %18 = arith.cmpi ne, %17, %c0_i32_10 : i32
    scf.if %18 {
      %c0_11 = arith.constant 0 : index
      %c0_12 = arith.constant 0 : index
      %19 = vector.load %arg9[%c0_11, %c0_12] : memref<8x1xf32, #tpu.memory_space<vmem>>, vector<8x1xf32>
      %20 = vector.broadcast %19 : vector<8x1xf32> to vector<8x128xf32>
      %21 = arith.mulf %2, %20 : vector<8x128xf32>
      %c0_13 = arith.constant 0 : index
      %c0_14 = arith.constant 0 : index
      %22 = vector.load %arg10[%c0_13, %c0_14] : memref<8x1xf32, #tpu.memory_space<vmem>>, vector<8x1xf32>
      %23 = vector.broadcast %22 : vector<8x1xf32> to vector<8x128xf32>
      %24 = arith.addf %21, %23 : vector<8x128xf32>
      %cst_15 = arith.constant 0.000000e+00 : f32
      %25 = vector.broadcast %cst_15 : f32 to vector<8x128xf32>
      %26 = arith.maximumf %24, %25 : vector<8x128xf32>
      %27 = arith.truncf %26 : vector<8x128xf32> to vector<8x128xbf16>
      %c0_16 = arith.constant 0 : index
      %c0_17 = arith.constant 0 : index
      %28 = vector.load %arg6[%c0_16, %c0_17] : memref<8x128xbf16, #tpu.memory_space<vmem>>, vector<8x128xbf16>
      tpu.vector_store %arg6[%c0_16, %c0_17], %27 {strides = array<i32>} : memref<8x128xbf16, #tpu.memory_space<vmem>>, vector<8x128xbf16>,
    } else {
    }
    return
  }
  func.func @transform_0(%arg0: i32, %arg1: i32) -> (i32, i32) {
    %c0_i32 = arith.constant 0 : i32
    %c0_i32_0 = arith.constant 0 : i32
    return %c0_i32, %arg1 : i32, i32
  }
  func.func @transform_1(%arg0: i32, %arg1: i32) -> (i32, i32) {
    %c0_i32 = arith.constant 0 : i32
    %c0_i32_0 = arith.constant 0 : i32
    %c0_i32_1 = arith.constant 0 : i32
    return %c0_i32, %c0_i32_0 : i32, i32
  }
  func.func @transform_2(%arg0: i32, %arg1: i32) -> (i32, i32) {
    %c0_i32 = arith.constant 0 : i32
    %c0_i32_0 = arith.constant 0 : i32
    %c0_i32_1 = arith.constant 0 : i32
    return %c0_i32, %c0_i32_0 : i32, i32
  }
  func.func @transform_3(%arg0: i32, %arg1: i32) -> (i32, i32) {
    %c0_i32 = arith.constant 0 : i32
    %c0_i32_0 = arith.constant 0 : i32
    %c0_i32_1 = arith.constant 0 : i32
    return %c0_i32, %c0_i32_0 : i32, i32
  }
  func.func @transform_4(%arg0: i32, %arg1: i32) -> (i32, i32) {
    %c0_i32 = arith.constant 0 : i32
    %c0_i32_0 = arith.constant 0 : i32
    return %c0_i32, %arg1 : i32, i32
  }
}

module attributes {stable_mosaic.version = 11 : i64} {
  func.func @kernel(%arg0: i32, %arg1: i32, %arg2: memref<80x128xbf16, #tpu.memory_space<vmem>>, %arg3: memref<8x80xbf16, #tpu.memory_space<vmem>>, %arg4: memref<8x1xf32, #tpu.memory_space<vmem>>, %arg5: memref<8x1xf32, #tpu.memory_space<vmem>>, %arg6: memref<8x128xbf16, #tpu.memory_space<vmem>>, %arg7: memref<8x1xf32, #tpu.memory_space<vmem>>, %arg8: memref<8x1xf32, #tpu.memory_space<vmem>>, %arg9: memref<8x1xf32, #tpu.memory_space<vmem>>, %arg10: memref<8x1xf32, #tpu.memory_space<vmem>>) attributes {dimension_semantics = [#tpu.dimension_semantics<arbitrary>, #tpu.dimension_semantics<arbitrary>], iteration_bounds = array<i64: 2, 1>, scalar_prefetch = 0 : i64, scratch_operands = 4 : i64, tpu.core_type = #tpu.core_type<tc>, window_params = [{transform_indices = @transform_0, window_bounds = array<i64: 80, 128>}, {pipeline_mode = #tpu.pipeline_mode<synchronous>, transform_indices = @transform_1, window_bounds = array<i64: 8, 80>}, {pipeline_mode = #tpu.pipeline_mode<synchronous>, transform_indices = @transform_2, window_bounds = array<i64: 8, 1>}, {pipeline_mode = #tpu.pipeline_mode<synchronous>, transform_indices = @transform_3, window_bounds = array<i64: 8, 1>}, {transform_indices = @transform_4, window_bounds = array<i64: 8, 128>}]} {
    %c0 = arith.constant 0 : index
    %c0_0 = arith.constant 0 : index
    %0 = vector.load %arg3[%c0, %c0_0] : memref<8x80xbf16, #tpu.memory_space<vmem>>, vector<8x80xbf16>
    %c0_1 = arith.constant 0 : index
    %c0_2 = arith.constant 0 : index
    %1 = vector.load %arg2[%c0_1, %c0_2] : memref<80x128xbf16, #tpu.memory_space<vmem>>, vector<80x128xbf16>
    %cst = arith.constant dense<0.000000e+00> : vector<8x128xf32>
    %2 = tpu.matmul %0, %1, %cst {dimension_numbers = #tpu.dot_dimension_numbers<[1], [0], [0], [1], [0, 0, 1, 1], [], []>} : vector<8x80xbf16>, vector<80x128xbf16>, vector<8x128xf32> -> vector<8x128xf32>
    %c0_i32 = arith.constant 0 : i32
    %3 = arith.cmpi eq, %arg0, %c0_i32 : i32
    %c0_i32_3 = arith.constant 0 : i32
    %4 = arith.cmpi eq, %arg1, %c0_i32_3 : i32
    %5 = arith.andi %3, %4 : i1
    %6 = arith.extui %5 : i1 to i32
    %c0_i32_4 = arith.constant 0 : i32
    %7 = arith.cmpi ne, %6, %c0_i32_4 : i32
    scf.if %7 {
      %cst_11 = arith.constant 0.000000e+00 : f32
      %19 = vector.broadcast %cst_11 : f32 to vector<8x1xf32>
      %c0_12 = arith.constant 0 : index
      %c0_13 = arith.constant 0 : index
      %20 = vector.load %arg7[%c0_12, %c0_13] : memref<8x1xf32, #tpu.memory_space<vmem>>, vector<8x1xf32>
      tpu.vector_store %arg7[%c0_12, %c0_13], %19 {strides = array<i32>} : memref<8x1xf32, #tpu.memory_space<vmem>>, vector<8x1xf32>,
      %cst_14 = arith.constant 0.000000e+00 : f32
      %21 = vector.broadcast %cst_14 : f32 to vector<8x1xf32>
      %c0_15 = arith.constant 0 : index
      %c0_16 = arith.constant 0 : index
      %22 = vector.load %arg8[%c0_15, %c0_16] : memref<8x1xf32, #tpu.memory_space<vmem>>, vector<8x1xf32>
      tpu.vector_store %arg8[%c0_15, %c0_16], %21 {strides = array<i32>} : memref<8x1xf32, #tpu.memory_space<vmem>>, vector<8x1xf32>,
    } else {
    }
    %c0_i32_5 = arith.constant 0 : i32
    %8 = arith.cmpi eq, %arg0, %c0_i32_5 : i32
    %9 = arith.extui %8 : i1 to i32
    %c0_i32_6 = arith.constant 0 : i32
    %10 = arith.cmpi ne, %9, %c0_i32_6 : i32
    scf.if %10 {
      %c0_11 = arith.constant 0 : index
      %c0_12 = arith.constant 0 : index
      %19 = vector.load %arg7[%c0_11, %c0_12] : memref<8x1xf32, #tpu.memory_space<vmem>>, vector<8x1xf32>
      %cst_13 = arith.constant dense<0.000000e+00> : vector<8xf32>
      %20 = vector.multi_reduction <add>, %2, %cst_13 [1] : vector<8x128xf32> to vector<8xf32>
      %21 = vector.shape_cast %20 : vector<8xf32> to vector<8x1xf32>
      %22 = arith.addf %19, %21 : vector<8x1xf32>
      %c0_14 = arith.constant 0 : index
      %c0_15 = arith.constant 0 : index
      %23 = vector.load %arg7[%c0_14, %c0_15] : memref<8x1xf32, #tpu.memory_space<vmem>>, vector<8x1xf32>
      tpu.vector_store %arg7[%c0_14, %c0_15], %22 {strides = array<i32>} : memref<8x1xf32, #tpu.memory_space<vmem>>, vector<8x1xf32>,
      %c0_16 = arith.constant 0 : index
      %c0_17 = arith.constant 0 : index
      %24 = vector.load %arg8[%c0_16, %c0_17] : memref<8x1xf32, #tpu.memory_space<vmem>>, vector<8x1xf32>
      %25 = arith.mulf %2, %2 : vector<8x128xf32>
      %cst_18 = arith.constant dense<0.000000e+00> : vector<8xf32>
      %26 = vector.multi_reduction <add>, %25, %cst_18 [1] : vector<8x128xf32> to vector<8xf32>
      %27 = vector.shape_cast %26 : vector<8xf32> to vector<8x1xf32>
      %28 = arith.addf %24, %27 : vector<8x1xf32>
      %c0_19 = arith.constant 0 : index
      %c0_20 = arith.constant 0 : index
      %29 = vector.load %arg8[%c0_19, %c0_20] : memref<8x1xf32, #tpu.memory_space<vmem>>, vector<8x1xf32>
      tpu.vector_store %arg8[%c0_19, %c0_20], %28 {strides = array<i32>} : memref<8x1xf32, #tpu.memory_space<vmem>>, vector<8x1xf32>,
    } else {
    }
    %c0_i32_7 = arith.constant 0 : i32
    %11 = arith.cmpi eq, %arg0, %c0_i32_7 : i32
    %c0_i32_8 = arith.constant 0 : i32
    %12 = arith.cmpi eq, %arg1, %c0_i32_8 : i32
    %13 = arith.andi %11, %12 : i1
    %14 = arith.extui %13 : i1 to i32
    %c0_i32_9 = arith.constant 0 : i32
    %15 = arith.cmpi ne, %14, %c0_i32_9 : i32
    scf.if %15 {
      %c0_11 = arith.constant 0 : index
      %c0_12 = arith.constant 0 : index
      %19 = vector.load %arg7[%c0_11, %c0_12] : memref<8x1xf32, #tpu.memory_space<vmem>>, vector<8x1xf32>
      %cst_13 = arith.constant 3.125000e-02 : f32
      %20 = vector.broadcast %cst_13 : f32 to vector<8x1xf32>
      %21 = arith.mulf %19, %20 : vector<8x1xf32>
      %c0_14 = arith.constant 0 : index
      %c0_15 = arith.constant 0 : index
      %22 = vector.load %arg8[%c0_14, %c0_15] : memref<8x1xf32, #tpu.memory_space<vmem>>, vector<8x1xf32>
      %cst_16 = arith.constant 3.125000e-02 : f32
      %23 = vector.broadcast %cst_16 : f32 to vector<8x1xf32>
      %24 = arith.mulf %22, %23 : vector<8x1xf32>
      %25 = arith.mulf %21, %21 : vector<8x1xf32>
      %26 = arith.subf %24, %25 : vector<8x1xf32>
      %cst_17 = arith.constant 0.000000e+00 : f32
      %27 = vector.broadcast %cst_17 : f32 to vector<8x1xf32>
      %28 = arith.maximumf %26, %27 : vector<8x1xf32>
      %cst_18 = arith.constant 9.99999974E-6 : f32
      %29 = vector.broadcast %cst_18 : f32 to vector<8x1xf32>
      %30 = arith.addf %28, %29 : vector<8x1xf32>
      %31 = math.rsqrt %30 : vector<8x1xf32>
      %c0_19 = arith.constant 0 : index
      %c0_20 = arith.constant 0 : index
      %32 = vector.load %arg4[%c0_19, %c0_20] : memref<8x1xf32, #tpu.memory_space<vmem>>, vector<8x1xf32>
      %33 = arith.mulf %32, %31 : vector<8x1xf32>
      %c0_21 = arith.constant 0 : index
      %c0_22 = arith.constant 0 : index
      %34 = vector.load %arg9[%c0_21, %c0_22] : memref<8x1xf32, #tpu.memory_space<vmem>>, vector<8x1xf32>
      tpu.vector_store %arg9[%c0_21, %c0_22], %33 {strides = array<i32>} : memref<8x1xf32, #tpu.memory_space<vmem>>, vector<8x1xf32>,
      %c0_23 = arith.constant 0 : index
      %c0_24 = arith.constant 0 : index
      %35 = vector.load %arg5[%c0_23, %c0_24] : memref<8x1xf32, #tpu.memory_space<vmem>>, vector<8x1xf32>
      %36 = arith.mulf %21, %33 : vector<8x1xf32>
      %37 = arith.subf %35, %36 : vector<8x1xf32>
      %c0_25 = arith.constant 0 : index
      %c0_26 = arith.constant 0 : index
      %38 = vector.load %arg10[%c0_25, %c0_26] : memref<8x1xf32, #tpu.memory_space<vmem>>, vector<8x1xf32>
      tpu.vector_store %arg10[%c0_25, %c0_26], %37 {strides = array<i32>} : memref<8x1xf32, #tpu.memory_space<vmem>>, vector<8x1xf32>,
    } else {
    }
    %c1_i32 = arith.constant 1 : i32
    %16 = arith.cmpi eq, %arg0, %c1_i32 : i32
    %17 = arith.extui %16 : i1 to i32
    %c0_i32_10 = arith.constant 0 : i32
    %18 = arith.cmpi ne, %17, %c0_i32_10 : i32
    scf.if %18 {
      %c0_11 = arith.constant 0 : index
      %c0_12 = arith.constant 0 : index
      %19 = vector.load %arg9[%c0_11, %c0_12] : memref<8x1xf32, #tpu.memory_space<vmem>>, vector<8x1xf32>
      %20 = vector.broadcast %19 : vector<8x1xf32> to vector<8x128xf32>
      %21 = arith.mulf %2, %20 : vector<8x128xf32>
      %c0_13 = arith.constant 0 : index
      %c0_14 = arith.constant 0 : index
      %22 = vector.load %arg10[%c0_13, %c0_14] : memref<8x1xf32, #tpu.memory_space<vmem>>, vector<8x1xf32>
      %23 = vector.broadcast %22 : vector<8x1xf32> to vector<8x128xf32>
      %24 = arith.addf %21, %23 : vector<8x128xf32>
      %cst_15 = arith.constant 0.000000e+00 : f32
      %25 = vector.broadcast %cst_15 : f32 to vector<8x128xf32>
      %26 = arith.maximumf %24, %25 : vector<8x128xf32>
      %27 = arith.truncf %26 : vector<8x128xf32> to vector<8x128xbf16>
      %c0_16 = arith.constant 0 : index
      %c0_17 = arith.constant 0 : index
      %28 = vector.load %arg6[%c0_16, %c0_17] : memref<8x128xbf16, #tpu.memory_space<vmem>>, vector<8x128xbf16>
      tpu.vector_store %arg6[%c0_16, %c0_17], %27 {strides = array<i32>} : memref<8x128xbf16, #tpu.memory_space<vmem>>, vector<8x128xbf16>,
    } else {
    }
    return
  }
  func.func @transform_0(%arg0: i32, %arg1: i32) -> (i32, i32) {
    %c0_i32 = arith.constant 0 : i32
    %c0_i32_0 = arith.constant 0 : i32
    return %c0_i32, %arg1 : i32, i32
  }
  func.func @transform_1(%arg0: i32, %arg1: i32) -> (i32, i32) {
    %c0_i32 = arith.constant 0 : i32
    %c0_i32_0 = arith.constant 0 : i32
    %c0_i32_1 = arith.constant 0 : i32
    return %c0_i32, %c0_i32_0 : i32, i32
  }
  func.func @transform_2(%arg0: i32, %arg1: i32) -> (i32, i32) {
    %c0_i32 = arith.constant 0 : i32
    %c0_i32_0 = arith.constant 0 : i32
    %c0_i32_1 = arith.constant 0 : i32
    return %c0_i32, %c0_i32_0 : i32, i32
  }
  func.func @transform_3(%arg0: i32, %arg1: i32) -> (i32, i32) {
    %c0_i32 = arith.constant 0 : i32
    %c0_i32_0 = arith.constant 0 : i32
    %c0_i32_1 = arith.constant 0 : i32
    return %c0_i32, %c0_i32_0 : i32, i32
  }
  func.func @transform_4(%arg0: i32, %arg1: i32) -> (i32, i32) {
    %c0_i32 = arith.constant 0 : i32
    %c0_i32_0 = arith.constant 0 : i32
    return %c0_i32, %arg1 : i32, i32
  }
}

module attributes {stable_mosaic.version = 11 : i64} {
  func.func @kernel(%arg0: i32, %arg1: i32, %arg2: memref<80x128xbf16, #tpu.memory_space<vmem>>, %arg3: memref<8x80xbf16, #tpu.memory_space<vmem>>, %arg4: memref<8x1xf32, #tpu.memory_space<vmem>>, %arg5: memref<8x1xf32, #tpu.memory_space<vmem>>, %arg6: memref<8x128xbf16, #tpu.memory_space<vmem>>, %arg7: memref<8x1xf32, #tpu.memory_space<vmem>>, %arg8: memref<8x1xf32, #tpu.memory_space<vmem>>, %arg9: memref<8x1xf32, #tpu.memory_space<vmem>>, %arg10: memref<8x1xf32, #tpu.memory_space<vmem>>) attributes {dimension_semantics = [#tpu.dimension_semantics<arbitrary>, #tpu.dimension_semantics<arbitrary>], iteration_bounds = array<i64: 2, 1>, scalar_prefetch = 0 : i64, scratch_operands = 4 : i64, tpu.core_type = #tpu.core_type<tc>, window_params = [{transform_indices = @transform_0, window_bounds = array<i64: 80, 128>}, {pipeline_mode = #tpu.pipeline_mode<synchronous>, transform_indices = @transform_1, window_bounds = array<i64: 8, 80>}, {pipeline_mode = #tpu.pipeline_mode<synchronous>, transform_indices = @transform_2, window_bounds = array<i64: 8, 1>}, {pipeline_mode = #tpu.pipeline_mode<synchronous>, transform_indices = @transform_3, window_bounds = array<i64: 8, 1>}, {transform_indices = @transform_4, window_bounds = array<i64: 8, 128>}]} {
    %c0 = arith.constant 0 : index
    %c0_0 = arith.constant 0 : index
    %0 = vector.load %arg3[%c0, %c0_0] : memref<8x80xbf16, #tpu.memory_space<vmem>>, vector<8x80xbf16>
    %c0_1 = arith.constant 0 : index
    %c0_2 = arith.constant 0 : index
    %1 = vector.load %arg2[%c0_1, %c0_2] : memref<80x128xbf16, #tpu.memory_space<vmem>>, vector<80x128xbf16>
    %cst = arith.constant dense<0.000000e+00> : vector<8x128xf32>
    %2 = tpu.matmul %0, %1, %cst {dimension_numbers = #tpu.dot_dimension_numbers<[1], [0], [0], [1], [0, 0, 1, 1], [], []>} : vector<8x80xbf16>, vector<80x128xbf16>, vector<8x128xf32> -> vector<8x128xf32>
    %c0_i32 = arith.constant 0 : i32
    %3 = arith.cmpi eq, %arg0, %c0_i32 : i32
    %c0_i32_3 = arith.constant 0 : i32
    %4 = arith.cmpi eq, %arg1, %c0_i32_3 : i32
    %5 = arith.andi %3, %4 : i1
    %6 = arith.extui %5 : i1 to i32
    %c0_i32_4 = arith.constant 0 : i32
    %7 = arith.cmpi ne, %6, %c0_i32_4 : i32
    scf.if %7 {
      %cst_11 = arith.constant 0.000000e+00 : f32
      %19 = vector.broadcast %cst_11 : f32 to vector<8x1xf32>
      %c0_12 = arith.constant 0 : index
      %c0_13 = arith.constant 0 : index
      %20 = vector.load %arg7[%c0_12, %c0_13] : memref<8x1xf32, #tpu.memory_space<vmem>>, vector<8x1xf32>
      tpu.vector_store %arg7[%c0_12, %c0_13], %19 {strides = array<i32>} : memref<8x1xf32, #tpu.memory_space<vmem>>, vector<8x1xf32>,
      %cst_14 = arith.constant 0.000000e+00 : f32
      %21 = vector.broadcast %cst_14 : f32 to vector<8x1xf32>
      %c0_15 = arith.constant 0 : index
      %c0_16 = arith.constant 0 : index
      %22 = vector.load %arg8[%c0_15, %c0_16] : memref<8x1xf32, #tpu.memory_space<vmem>>, vector<8x1xf32>
      tpu.vector_store %arg8[%c0_15, %c0_16], %21 {strides = array<i32>} : memref<8x1xf32, #tpu.memory_space<vmem>>, vector<8x1xf32>,
    } else {
    }
    %c0_i32_5 = arith.constant 0 : i32
    %8 = arith.cmpi eq, %arg0, %c0_i32_5 : i32
    %9 = arith.extui %8 : i1 to i32
    %c0_i32_6 = arith.constant 0 : i32
    %10 = arith.cmpi ne, %9, %c0_i32_6 : i32
    scf.if %10 {
      %c0_11 = arith.constant 0 : index
      %c0_12 = arith.constant 0 : index
      %19 = vector.load %arg7[%c0_11, %c0_12] : memref<8x1xf32, #tpu.memory_space<vmem>>, vector<8x1xf32>
      %cst_13 = arith.constant dense<0.000000e+00> : vector<8xf32>
      %20 = vector.multi_reduction <add>, %2, %cst_13 [1] : vector<8x128xf32> to vector<8xf32>
      %21 = vector.shape_cast %20 : vector<8xf32> to vector<8x1xf32>
      %22 = arith.addf %19, %21 : vector<8x1xf32>
      %c0_14 = arith.constant 0 : index
      %c0_15 = arith.constant 0 : index
      %23 = vector.load %arg7[%c0_14, %c0_15] : memref<8x1xf32, #tpu.memory_space<vmem>>, vector<8x1xf32>
      tpu.vector_store %arg7[%c0_14, %c0_15], %22 {strides = array<i32>} : memref<8x1xf32, #tpu.memory_space<vmem>>, vector<8x1xf32>,
      %c0_16 = arith.constant 0 : index
      %c0_17 = arith.constant 0 : index
      %24 = vector.load %arg8[%c0_16, %c0_17] : memref<8x1xf32, #tpu.memory_space<vmem>>, vector<8x1xf32>
      %25 = arith.mulf %2, %2 : vector<8x128xf32>
      %cst_18 = arith.constant dense<0.000000e+00> : vector<8xf32>
      %26 = vector.multi_reduction <add>, %25, %cst_18 [1] : vector<8x128xf32> to vector<8xf32>
      %27 = vector.shape_cast %26 : vector<8xf32> to vector<8x1xf32>
      %28 = arith.addf %24, %27 : vector<8x1xf32>
      %c0_19 = arith.constant 0 : index
      %c0_20 = arith.constant 0 : index
      %29 = vector.load %arg8[%c0_19, %c0_20] : memref<8x1xf32, #tpu.memory_space<vmem>>, vector<8x1xf32>
      tpu.vector_store %arg8[%c0_19, %c0_20], %28 {strides = array<i32>} : memref<8x1xf32, #tpu.memory_space<vmem>>, vector<8x1xf32>,
    } else {
    }
    %c0_i32_7 = arith.constant 0 : i32
    %11 = arith.cmpi eq, %arg0, %c0_i32_7 : i32
    %c0_i32_8 = arith.constant 0 : i32
    %12 = arith.cmpi eq, %arg1, %c0_i32_8 : i32
    %13 = arith.andi %11, %12 : i1
    %14 = arith.extui %13 : i1 to i32
    %c0_i32_9 = arith.constant 0 : i32
    %15 = arith.cmpi ne, %14, %c0_i32_9 : i32
    scf.if %15 {
      %c0_11 = arith.constant 0 : index
      %c0_12 = arith.constant 0 : index
      %19 = vector.load %arg7[%c0_11, %c0_12] : memref<8x1xf32, #tpu.memory_space<vmem>>, vector<8x1xf32>
      %cst_13 = arith.constant 1.250000e-01 : f32
      %20 = vector.broadcast %cst_13 : f32 to vector<8x1xf32>
      %21 = arith.mulf %19, %20 : vector<8x1xf32>
      %c0_14 = arith.constant 0 : index
      %c0_15 = arith.constant 0 : index
      %22 = vector.load %arg8[%c0_14, %c0_15] : memref<8x1xf32, #tpu.memory_space<vmem>>, vector<8x1xf32>
      %cst_16 = arith.constant 1.250000e-01 : f32
      %23 = vector.broadcast %cst_16 : f32 to vector<8x1xf32>
      %24 = arith.mulf %22, %23 : vector<8x1xf32>
      %25 = arith.mulf %21, %21 : vector<8x1xf32>
      %26 = arith.subf %24, %25 : vector<8x1xf32>
      %cst_17 = arith.constant 0.000000e+00 : f32
      %27 = vector.broadcast %cst_17 : f32 to vector<8x1xf32>
      %28 = arith.maximumf %26, %27 : vector<8x1xf32>
      %cst_18 = arith.constant 9.99999974E-6 : f32
      %29 = vector.broadcast %cst_18 : f32 to vector<8x1xf32>
      %30 = arith.addf %28, %29 : vector<8x1xf32>
      %31 = math.rsqrt %30 : vector<8x1xf32>
      %c0_19 = arith.constant 0 : index
      %c0_20 = arith.constant 0 : index
      %32 = vector.load %arg4[%c0_19, %c0_20] : memref<8x1xf32, #tpu.memory_space<vmem>>, vector<8x1xf32>
      %33 = arith.mulf %32, %31 : vector<8x1xf32>
      %c0_21 = arith.constant 0 : index
      %c0_22 = arith.constant 0 : index
      %34 = vector.load %arg9[%c0_21, %c0_22] : memref<8x1xf32, #tpu.memory_space<vmem>>, vector<8x1xf32>
      tpu.vector_store %arg9[%c0_21, %c0_22], %33 {strides = array<i32>} : memref<8x1xf32, #tpu.memory_space<vmem>>, vector<8x1xf32>,
      %c0_23 = arith.constant 0 : index
      %c0_24 = arith.constant 0 : index
      %35 = vector.load %arg5[%c0_23, %c0_24] : memref<8x1xf32, #tpu.memory_space<vmem>>, vector<8x1xf32>
      %36 = arith.mulf %21, %33 : vector<8x1xf32>
      %37 = arith.subf %35, %36 : vector<8x1xf32>
      %c0_25 = arith.constant 0 : index
      %c0_26 = arith.constant 0 : index
      %38 = vector.load %arg10[%c0_25, %c0_26] : memref<8x1xf32, #tpu.memory_space<vmem>>, vector<8x1xf32>
      tpu.vector_store %arg10[%c0_25, %c0_26], %37 {strides = array<i32>} : memref<8x1xf32, #tpu.memory_space<vmem>>, vector<8x1xf32>,
    } else {
    }
    %c1_i32 = arith.constant 1 : i32
    %16 = arith.cmpi eq, %arg0, %c1_i32 : i32
    %17 = arith.extui %16 : i1 to i32
    %c0_i32_10 = arith.constant 0 : i32
    %18 = arith.cmpi ne, %17, %c0_i32_10 : i32
    scf.if %18 {
      %c0_11 = arith.constant 0 : index
      %c0_12 = arith.constant 0 : index
      %19 = vector.load %arg9[%c0_11, %c0_12] : memref<8x1xf32, #tpu.memory_space<vmem>>, vector<8x1xf32>
      %20 = vector.broadcast %19 : vector<8x1xf32> to vector<8x128xf32>
      %21 = arith.mulf %2, %20 : vector<8x128xf32>
      %c0_13 = arith.constant 0 : index
      %c0_14 = arith.constant 0 : index
      %22 = vector.load %arg10[%c0_13, %c0_14] : memref<8x1xf32, #tpu.memory_space<vmem>>, vector<8x1xf32>
      %23 = vector.broadcast %22 : vector<8x1xf32> to vector<8x128xf32>
      %24 = arith.addf %21, %23 : vector<8x128xf32>
      %cst_15 = arith.constant 0.000000e+00 : f32
      %25 = vector.broadcast %cst_15 : f32 to vector<8x128xf32>
      %26 = arith.maximumf %24, %25 : vector<8x128xf32>
      %27 = arith.truncf %26 : vector<8x128xf32> to vector<8x128xbf16>
      %c0_16 = arith.constant 0 : index
      %c0_17 = arith.constant 0 : index
      %28 = vector.load %arg6[%c0_16, %c0_17] : memref<8x128xbf16, #tpu.memory_space<vmem>>, vector<8x128xbf16>
      tpu.vector_store %arg6[%c0_16, %c0_17], %27 {strides = array<i32>} : memref<8x128xbf16, #tpu.memory_space<vmem>>, vector<8x128xbf16>,
    } else {
    }
    return
  }
  func.func @transform_0(%arg0: i32, %arg1: i32) -> (i32, i32) {
    %c0_i32 = arith.constant 0 : i32
    %c0_i32_0 = arith.constant 0 : i32
    return %c0_i32, %arg1 : i32, i32
  }
  func.func @transform_1(%arg0: i32, %arg1: i32) -> (i32, i32) {
    %c0_i32 = arith.constant 0 : i32
    %c0_i32_0 = arith.constant 0 : i32
    %c0_i32_1 = arith.constant 0 : i32
    return %c0_i32, %c0_i32_0 : i32, i32
  }
  func.func @transform_2(%arg0: i32, %arg1: i32) -> (i32, i32) {
    %c0_i32 = arith.constant 0 : i32
    %c0_i32_0 = arith.constant 0 : i32
    %c0_i32_1 = arith.constant 0 : i32
    return %c0_i32, %c0_i32_0 : i32, i32
  }
  func.func @transform_3(%arg0: i32, %arg1: i32) -> (i32, i32) {
    %c0_i32 = arith.constant 0 : i32
    %c0_i32_0 = arith.constant 0 : i32
    %c0_i32_1 = arith.constant 0 : i32
    return %c0_i32, %c0_i32_0 : i32, i32
  }
  func.func @transform_4(%arg0: i32, %arg1: i32) -> (i32, i32) {
    %c0_i32 = arith.constant 0 : i32
    %c0_i32_0 = arith.constant 0 : i32
    return %c0_i32, %arg1 : i32, i32
  }
}

module attributes {stable_mosaic.version = 11 : i64} {
  func.func @kernel(%arg0: i32, %arg1: i32, %arg2: memref<144x128xbf16, #tpu.memory_space<vmem>>, %arg3: memref<8x144xbf16, #tpu.memory_space<vmem>>, %arg4: memref<8x1xf32, #tpu.memory_space<vmem>>, %arg5: memref<8x1xf32, #tpu.memory_space<vmem>>, %arg6: memref<8x128xbf16, #tpu.memory_space<vmem>>, %arg7: memref<8x1xf32, #tpu.memory_space<vmem>>, %arg8: memref<8x1xf32, #tpu.memory_space<vmem>>, %arg9: memref<8x1xf32, #tpu.memory_space<vmem>>, %arg10: memref<8x1xf32, #tpu.memory_space<vmem>>) attributes {dimension_semantics = [#tpu.dimension_semantics<arbitrary>, #tpu.dimension_semantics<arbitrary>], iteration_bounds = array<i64: 2, 1>, scalar_prefetch = 0 : i64, scratch_operands = 4 : i64, tpu.core_type = #tpu.core_type<tc>, window_params = [{transform_indices = @transform_0, window_bounds = array<i64: 144, 128>}, {pipeline_mode = #tpu.pipeline_mode<synchronous>, transform_indices = @transform_1, window_bounds = array<i64: 8, 144>}, {pipeline_mode = #tpu.pipeline_mode<synchronous>, transform_indices = @transform_2, window_bounds = array<i64: 8, 1>}, {pipeline_mode = #tpu.pipeline_mode<synchronous>, transform_indices = @transform_3, window_bounds = array<i64: 8, 1>}, {transform_indices = @transform_4, window_bounds = array<i64: 8, 128>}]} {
    %c0 = arith.constant 0 : index
    %c0_0 = arith.constant 0 : index
    %0 = vector.load %arg3[%c0, %c0_0] : memref<8x144xbf16, #tpu.memory_space<vmem>>, vector<8x144xbf16>
    %c0_1 = arith.constant 0 : index
    %c0_2 = arith.constant 0 : index
    %1 = vector.load %arg2[%c0_1, %c0_2] : memref<144x128xbf16, #tpu.memory_space<vmem>>, vector<144x128xbf16>
    %cst = arith.constant dense<0.000000e+00> : vector<8x128xf32>
    %2 = tpu.matmul %0, %1, %cst {dimension_numbers = #tpu.dot_dimension_numbers<[1], [0], [0], [1], [0, 0, 1, 1], [], []>} : vector<8x144xbf16>, vector<144x128xbf16>, vector<8x128xf32> -> vector<8x128xf32>
    %c0_i32 = arith.constant 0 : i32
    %3 = arith.cmpi eq, %arg0, %c0_i32 : i32
    %c0_i32_3 = arith.constant 0 : i32
    %4 = arith.cmpi eq, %arg1, %c0_i32_3 : i32
    %5 = arith.andi %3, %4 : i1
    %6 = arith.extui %5 : i1 to i32
    %c0_i32_4 = arith.constant 0 : i32
    %7 = arith.cmpi ne, %6, %c0_i32_4 : i32
    scf.if %7 {
      %cst_11 = arith.constant 0.000000e+00 : f32
      %19 = vector.broadcast %cst_11 : f32 to vector<8x1xf32>
      %c0_12 = arith.constant 0 : index
      %c0_13 = arith.constant 0 : index
      %20 = vector.load %arg7[%c0_12, %c0_13] : memref<8x1xf32, #tpu.memory_space<vmem>>, vector<8x1xf32>
      tpu.vector_store %arg7[%c0_12, %c0_13], %19 {strides = array<i32>} : memref<8x1xf32, #tpu.memory_space<vmem>>, vector<8x1xf32>,
      %cst_14 = arith.constant 0.000000e+00 : f32
      %21 = vector.broadcast %cst_14 : f32 to vector<8x1xf32>
      %c0_15 = arith.constant 0 : index
      %c0_16 = arith.constant 0 : index
      %22 = vector.load %arg8[%c0_15, %c0_16] : memref<8x1xf32, #tpu.memory_space<vmem>>, vector<8x1xf32>
      tpu.vector_store %arg8[%c0_15, %c0_16], %21 {strides = array<i32>} : memref<8x1xf32, #tpu.memory_space<vmem>>, vector<8x1xf32>,
    } else {
    }
    %c0_i32_5 = arith.constant 0 : i32
    %8 = arith.cmpi eq, %arg0, %c0_i32_5 : i32
    %9 = arith.extui %8 : i1 to i32
    %c0_i32_6 = arith.constant 0 : i32
    %10 = arith.cmpi ne, %9, %c0_i32_6 : i32
    scf.if %10 {
      %c0_11 = arith.constant 0 : index
      %c0_12 = arith.constant 0 : index
      %19 = vector.load %arg7[%c0_11, %c0_12] : memref<8x1xf32, #tpu.memory_space<vmem>>, vector<8x1xf32>
      %cst_13 = arith.constant dense<0.000000e+00> : vector<8xf32>
      %20 = vector.multi_reduction <add>, %2, %cst_13 [1] : vector<8x128xf32> to vector<8xf32>
      %21 = vector.shape_cast %20 : vector<8xf32> to vector<8x1xf32>
      %22 = arith.addf %19, %21 : vector<8x1xf32>
      %c0_14 = arith.constant 0 : index
      %c0_15 = arith.constant 0 : index
      %23 = vector.load %arg7[%c0_14, %c0_15] : memref<8x1xf32, #tpu.memory_space<vmem>>, vector<8x1xf32>
      tpu.vector_store %arg7[%c0_14, %c0_15], %22 {strides = array<i32>} : memref<8x1xf32, #tpu.memory_space<vmem>>, vector<8x1xf32>,
      %c0_16 = arith.constant 0 : index
      %c0_17 = arith.constant 0 : index
      %24 = vector.load %arg8[%c0_16, %c0_17] : memref<8x1xf32, #tpu.memory_space<vmem>>, vector<8x1xf32>
      %25 = arith.mulf %2, %2 : vector<8x128xf32>
      %cst_18 = arith.constant dense<0.000000e+00> : vector<8xf32>
      %26 = vector.multi_reduction <add>, %25, %cst_18 [1] : vector<8x128xf32> to vector<8xf32>
      %27 = vector.shape_cast %26 : vector<8xf32> to vector<8x1xf32>
      %28 = arith.addf %24, %27 : vector<8x1xf32>
      %c0_19 = arith.constant 0 : index
      %c0_20 = arith.constant 0 : index
      %29 = vector.load %arg8[%c0_19, %c0_20] : memref<8x1xf32, #tpu.memory_space<vmem>>, vector<8x1xf32>
      tpu.vector_store %arg8[%c0_19, %c0_20], %28 {strides = array<i32>} : memref<8x1xf32, #tpu.memory_space<vmem>>, vector<8x1xf32>,
    } else {
    }
    %c0_i32_7 = arith.constant 0 : i32
    %11 = arith.cmpi eq, %arg0, %c0_i32_7 : i32
    %c0_i32_8 = arith.constant 0 : i32
    %12 = arith.cmpi eq, %arg1, %c0_i32_8 : i32
    %13 = arith.andi %11, %12 : i1
    %14 = arith.extui %13 : i1 to i32
    %c0_i32_9 = arith.constant 0 : i32
    %15 = arith.cmpi ne, %14, %c0_i32_9 : i32
    scf.if %15 {
      %c0_11 = arith.constant 0 : index
      %c0_12 = arith.constant 0 : index
      %19 = vector.load %arg7[%c0_11, %c0_12] : memref<8x1xf32, #tpu.memory_space<vmem>>, vector<8x1xf32>
      %cst_13 = arith.constant 3.125000e-02 : f32
      %20 = vector.broadcast %cst_13 : f32 to vector<8x1xf32>
      %21 = arith.mulf %19, %20 : vector<8x1xf32>
      %c0_14 = arith.constant 0 : index
      %c0_15 = arith.constant 0 : index
      %22 = vector.load %arg8[%c0_14, %c0_15] : memref<8x1xf32, #tpu.memory_space<vmem>>, vector<8x1xf32>
      %cst_16 = arith.constant 3.125000e-02 : f32
      %23 = vector.broadcast %cst_16 : f32 to vector<8x1xf32>
      %24 = arith.mulf %22, %23 : vector<8x1xf32>
      %25 = arith.mulf %21, %21 : vector<8x1xf32>
      %26 = arith.subf %24, %25 : vector<8x1xf32>
      %cst_17 = arith.constant 0.000000e+00 : f32
      %27 = vector.broadcast %cst_17 : f32 to vector<8x1xf32>
      %28 = arith.maximumf %26, %27 : vector<8x1xf32>
      %cst_18 = arith.constant 9.99999974E-6 : f32
      %29 = vector.broadcast %cst_18 : f32 to vector<8x1xf32>
      %30 = arith.addf %28, %29 : vector<8x1xf32>
      %31 = math.rsqrt %30 : vector<8x1xf32>
      %c0_19 = arith.constant 0 : index
      %c0_20 = arith.constant 0 : index
      %32 = vector.load %arg4[%c0_19, %c0_20] : memref<8x1xf32, #tpu.memory_space<vmem>>, vector<8x1xf32>
      %33 = arith.mulf %32, %31 : vector<8x1xf32>
      %c0_21 = arith.constant 0 : index
      %c0_22 = arith.constant 0 : index
      %34 = vector.load %arg9[%c0_21, %c0_22] : memref<8x1xf32, #tpu.memory_space<vmem>>, vector<8x1xf32>
      tpu.vector_store %arg9[%c0_21, %c0_22], %33 {strides = array<i32>} : memref<8x1xf32, #tpu.memory_space<vmem>>, vector<8x1xf32>,
      %c0_23 = arith.constant 0 : index
      %c0_24 = arith.constant 0 : index
      %35 = vector.load %arg5[%c0_23, %c0_24] : memref<8x1xf32, #tpu.memory_space<vmem>>, vector<8x1xf32>
      %36 = arith.mulf %21, %33 : vector<8x1xf32>
      %37 = arith.subf %35, %36 : vector<8x1xf32>
      %c0_25 = arith.constant 0 : index
      %c0_26 = arith.constant 0 : index
      %38 = vector.load %arg10[%c0_25, %c0_26] : memref<8x1xf32, #tpu.memory_space<vmem>>, vector<8x1xf32>
      tpu.vector_store %arg10[%c0_25, %c0_26], %37 {strides = array<i32>} : memref<8x1xf32, #tpu.memory_space<vmem>>, vector<8x1xf32>,
    } else {
    }
    %c1_i32 = arith.constant 1 : i32
    %16 = arith.cmpi eq, %arg0, %c1_i32 : i32
    %17 = arith.extui %16 : i1 to i32
    %c0_i32_10 = arith.constant 0 : i32
    %18 = arith.cmpi ne, %17, %c0_i32_10 : i32
    scf.if %18 {
      %c0_11 = arith.constant 0 : index
      %c0_12 = arith.constant 0 : index
      %19 = vector.load %arg9[%c0_11, %c0_12] : memref<8x1xf32, #tpu.memory_space<vmem>>, vector<8x1xf32>
      %20 = vector.broadcast %19 : vector<8x1xf32> to vector<8x128xf32>
      %21 = arith.mulf %2, %20 : vector<8x128xf32>
      %c0_13 = arith.constant 0 : index
      %c0_14 = arith.constant 0 : index
      %22 = vector.load %arg10[%c0_13, %c0_14] : memref<8x1xf32, #tpu.memory_space<vmem>>, vector<8x1xf32>
      %23 = vector.broadcast %22 : vector<8x1xf32> to vector<8x128xf32>
      %24 = arith.addf %21, %23 : vector<8x128xf32>
      %cst_15 = arith.constant 0.000000e+00 : f32
      %25 = vector.broadcast %cst_15 : f32 to vector<8x128xf32>
      %26 = arith.maximumf %24, %25 : vector<8x128xf32>
      %27 = arith.truncf %26 : vector<8x128xf32> to vector<8x128xbf16>
      %c0_16 = arith.constant 0 : index
      %c0_17 = arith.constant 0 : index
      %28 = vector.load %arg6[%c0_16, %c0_17] : memref<8x128xbf16, #tpu.memory_space<vmem>>, vector<8x128xbf16>
      tpu.vector_store %arg6[%c0_16, %c0_17], %27 {strides = array<i32>} : memref<8x128xbf16, #tpu.memory_space<vmem>>, vector<8x128xbf16>,
    } else {
    }
    return
  }
  func.func @transform_0(%arg0: i32, %arg1: i32) -> (i32, i32) {
    %c0_i32 = arith.constant 0 : i32
    %c0_i32_0 = arith.constant 0 : i32
    return %c0_i32, %arg1 : i32, i32
  }
  func.func @transform_1(%arg0: i32, %arg1: i32) -> (i32, i32) {
    %c0_i32 = arith.constant 0 : i32
    %c0_i32_0 = arith.constant 0 : i32
    %c0_i32_1 = arith.constant 0 : i32
    return %c0_i32, %c0_i32_0 : i32, i32
  }
  func.func @transform_2(%arg0: i32, %arg1: i32) -> (i32, i32) {
    %c0_i32 = arith.constant 0 : i32
    %c0_i32_0 = arith.constant 0 : i32
    %c0_i32_1 = arith.constant 0 : i32
    return %c0_i32, %c0_i32_0 : i32, i32
  }
  func.func @transform_3(%arg0: i32, %arg1: i32) -> (i32, i32) {
    %c0_i32 = arith.constant 0 : i32
    %c0_i32_0 = arith.constant 0 : i32
    %c0_i32_1 = arith.constant 0 : i32
    return %c0_i32, %c0_i32_0 : i32, i32
  }
  func.func @transform_4(%arg0: i32, %arg1: i32) -> (i32, i32) {
    %c0_i32 = arith.constant 0 : i32
    %c0_i32_0 = arith.constant 0 : i32
    return %c0_i32, %arg1 : i32, i32
  }
}

module attributes {stable_mosaic.version = 11 : i64} {
  func.func @kernel(%arg0: i32, %arg1: i32, %arg2: memref<144x128xbf16, #tpu.memory_space<vmem>>, %arg3: memref<8x144xbf16, #tpu.memory_space<vmem>>, %arg4: memref<8x1xf32, #tpu.memory_space<vmem>>, %arg5: memref<8x1xf32, #tpu.memory_space<vmem>>, %arg6: memref<8x128xbf16, #tpu.memory_space<vmem>>, %arg7: memref<8x1xf32, #tpu.memory_space<vmem>>, %arg8: memref<8x1xf32, #tpu.memory_space<vmem>>, %arg9: memref<8x1xf32, #tpu.memory_space<vmem>>, %arg10: memref<8x1xf32, #tpu.memory_space<vmem>>) attributes {dimension_semantics = [#tpu.dimension_semantics<arbitrary>, #tpu.dimension_semantics<arbitrary>], iteration_bounds = array<i64: 2, 1>, scalar_prefetch = 0 : i64, scratch_operands = 4 : i64, tpu.core_type = #tpu.core_type<tc>, window_params = [{transform_indices = @transform_0, window_bounds = array<i64: 144, 128>}, {pipeline_mode = #tpu.pipeline_mode<synchronous>, transform_indices = @transform_1, window_bounds = array<i64: 8, 144>}, {pipeline_mode = #tpu.pipeline_mode<synchronous>, transform_indices = @transform_2, window_bounds = array<i64: 8, 1>}, {pipeline_mode = #tpu.pipeline_mode<synchronous>, transform_indices = @transform_3, window_bounds = array<i64: 8, 1>}, {transform_indices = @transform_4, window_bounds = array<i64: 8, 128>}]} {
    %c0 = arith.constant 0 : index
    %c0_0 = arith.constant 0 : index
    %0 = vector.load %arg3[%c0, %c0_0] : memref<8x144xbf16, #tpu.memory_space<vmem>>, vector<8x144xbf16>
    %c0_1 = arith.constant 0 : index
    %c0_2 = arith.constant 0 : index
    %1 = vector.load %arg2[%c0_1, %c0_2] : memref<144x128xbf16, #tpu.memory_space<vmem>>, vector<144x128xbf16>
    %cst = arith.constant dense<0.000000e+00> : vector<8x128xf32>
    %2 = tpu.matmul %0, %1, %cst {dimension_numbers = #tpu.dot_dimension_numbers<[1], [0], [0], [1], [0, 0, 1, 1], [], []>} : vector<8x144xbf16>, vector<144x128xbf16>, vector<8x128xf32> -> vector<8x128xf32>
    %c0_i32 = arith.constant 0 : i32
    %3 = arith.cmpi eq, %arg0, %c0_i32 : i32
    %c0_i32_3 = arith.constant 0 : i32
    %4 = arith.cmpi eq, %arg1, %c0_i32_3 : i32
    %5 = arith.andi %3, %4 : i1
    %6 = arith.extui %5 : i1 to i32
    %c0_i32_4 = arith.constant 0 : i32
    %7 = arith.cmpi ne, %6, %c0_i32_4 : i32
    scf.if %7 {
      %cst_11 = arith.constant 0.000000e+00 : f32
      %19 = vector.broadcast %cst_11 : f32 to vector<8x1xf32>
      %c0_12 = arith.constant 0 : index
      %c0_13 = arith.constant 0 : index
      %20 = vector.load %arg7[%c0_12, %c0_13] : memref<8x1xf32, #tpu.memory_space<vmem>>, vector<8x1xf32>
      tpu.vector_store %arg7[%c0_12, %c0_13], %19 {strides = array<i32>} : memref<8x1xf32, #tpu.memory_space<vmem>>, vector<8x1xf32>,
      %cst_14 = arith.constant 0.000000e+00 : f32
      %21 = vector.broadcast %cst_14 : f32 to vector<8x1xf32>
      %c0_15 = arith.constant 0 : index
      %c0_16 = arith.constant 0 : index
      %22 = vector.load %arg8[%c0_15, %c0_16] : memref<8x1xf32, #tpu.memory_space<vmem>>, vector<8x1xf32>
      tpu.vector_store %arg8[%c0_15, %c0_16], %21 {strides = array<i32>} : memref<8x1xf32, #tpu.memory_space<vmem>>, vector<8x1xf32>,
    } else {
    }
    %c0_i32_5 = arith.constant 0 : i32
    %8 = arith.cmpi eq, %arg0, %c0_i32_5 : i32
    %9 = arith.extui %8 : i1 to i32
    %c0_i32_6 = arith.constant 0 : i32
    %10 = arith.cmpi ne, %9, %c0_i32_6 : i32
    scf.if %10 {
      %c0_11 = arith.constant 0 : index
      %c0_12 = arith.constant 0 : index
      %19 = vector.load %arg7[%c0_11, %c0_12] : memref<8x1xf32, #tpu.memory_space<vmem>>, vector<8x1xf32>
      %cst_13 = arith.constant dense<0.000000e+00> : vector<8xf32>
      %20 = vector.multi_reduction <add>, %2, %cst_13 [1] : vector<8x128xf32> to vector<8xf32>
      %21 = vector.shape_cast %20 : vector<8xf32> to vector<8x1xf32>
      %22 = arith.addf %19, %21 : vector<8x1xf32>
      %c0_14 = arith.constant 0 : index
      %c0_15 = arith.constant 0 : index
      %23 = vector.load %arg7[%c0_14, %c0_15] : memref<8x1xf32, #tpu.memory_space<vmem>>, vector<8x1xf32>
      tpu.vector_store %arg7[%c0_14, %c0_15], %22 {strides = array<i32>} : memref<8x1xf32, #tpu.memory_space<vmem>>, vector<8x1xf32>,
      %c0_16 = arith.constant 0 : index
      %c0_17 = arith.constant 0 : index
      %24 = vector.load %arg8[%c0_16, %c0_17] : memref<8x1xf32, #tpu.memory_space<vmem>>, vector<8x1xf32>
      %25 = arith.mulf %2, %2 : vector<8x128xf32>
      %cst_18 = arith.constant dense<0.000000e+00> : vector<8xf32>
      %26 = vector.multi_reduction <add>, %25, %cst_18 [1] : vector<8x128xf32> to vector<8xf32>
      %27 = vector.shape_cast %26 : vector<8xf32> to vector<8x1xf32>
      %28 = arith.addf %24, %27 : vector<8x1xf32>
      %c0_19 = arith.constant 0 : index
      %c0_20 = arith.constant 0 : index
      %29 = vector.load %arg8[%c0_19, %c0_20] : memref<8x1xf32, #tpu.memory_space<vmem>>, vector<8x1xf32>
      tpu.vector_store %arg8[%c0_19, %c0_20], %28 {strides = array<i32>} : memref<8x1xf32, #tpu.memory_space<vmem>>, vector<8x1xf32>,
    } else {
    }
    %c0_i32_7 = arith.constant 0 : i32
    %11 = arith.cmpi eq, %arg0, %c0_i32_7 : i32
    %c0_i32_8 = arith.constant 0 : i32
    %12 = arith.cmpi eq, %arg1, %c0_i32_8 : i32
    %13 = arith.andi %11, %12 : i1
    %14 = arith.extui %13 : i1 to i32
    %c0_i32_9 = arith.constant 0 : i32
    %15 = arith.cmpi ne, %14, %c0_i32_9 : i32
    scf.if %15 {
      %c0_11 = arith.constant 0 : index
      %c0_12 = arith.constant 0 : index
      %19 = vector.load %arg7[%c0_11, %c0_12] : memref<8x1xf32, #tpu.memory_space<vmem>>, vector<8x1xf32>
      %cst_13 = arith.constant 7.812500e-03 : f32
      %20 = vector.broadcast %cst_13 : f32 to vector<8x1xf32>
      %21 = arith.mulf %19, %20 : vector<8x1xf32>
      %c0_14 = arith.constant 0 : index
      %c0_15 = arith.constant 0 : index
      %22 = vector.load %arg8[%c0_14, %c0_15] : memref<8x1xf32, #tpu.memory_space<vmem>>, vector<8x1xf32>
      %cst_16 = arith.constant 7.812500e-03 : f32
      %23 = vector.broadcast %cst_16 : f32 to vector<8x1xf32>
      %24 = arith.mulf %22, %23 : vector<8x1xf32>
      %25 = arith.mulf %21, %21 : vector<8x1xf32>
      %26 = arith.subf %24, %25 : vector<8x1xf32>
      %cst_17 = arith.constant 0.000000e+00 : f32
      %27 = vector.broadcast %cst_17 : f32 to vector<8x1xf32>
      %28 = arith.maximumf %26, %27 : vector<8x1xf32>
      %cst_18 = arith.constant 9.99999974E-6 : f32
      %29 = vector.broadcast %cst_18 : f32 to vector<8x1xf32>
      %30 = arith.addf %28, %29 : vector<8x1xf32>
      %31 = math.rsqrt %30 : vector<8x1xf32>
      %c0_19 = arith.constant 0 : index
      %c0_20 = arith.constant 0 : index
      %32 = vector.load %arg4[%c0_19, %c0_20] : memref<8x1xf32, #tpu.memory_space<vmem>>, vector<8x1xf32>
      %33 = arith.mulf %32, %31 : vector<8x1xf32>
      %c0_21 = arith.constant 0 : index
      %c0_22 = arith.constant 0 : index
      %34 = vector.load %arg9[%c0_21, %c0_22] : memref<8x1xf32, #tpu.memory_space<vmem>>, vector<8x1xf32>
      tpu.vector_store %arg9[%c0_21, %c0_22], %33 {strides = array<i32>} : memref<8x1xf32, #tpu.memory_space<vmem>>, vector<8x1xf32>,
      %c0_23 = arith.constant 0 : index
      %c0_24 = arith.constant 0 : index
      %35 = vector.load %arg5[%c0_23, %c0_24] : memref<8x1xf32, #tpu.memory_space<vmem>>, vector<8x1xf32>
      %36 = arith.mulf %21, %33 : vector<8x1xf32>
      %37 = arith.subf %35, %36 : vector<8x1xf32>
      %c0_25 = arith.constant 0 : index
      %c0_26 = arith.constant 0 : index
      %38 = vector.load %arg10[%c0_25, %c0_26] : memref<8x1xf32, #tpu.memory_space<vmem>>, vector<8x1xf32>
      tpu.vector_store %arg10[%c0_25, %c0_26], %37 {strides = array<i32>} : memref<8x1xf32, #tpu.memory_space<vmem>>, vector<8x1xf32>,
    } else {
    }
    %c1_i32 = arith.constant 1 : i32
    %16 = arith.cmpi eq, %arg0, %c1_i32 : i32
    %17 = arith.extui %16 : i1 to i32
    %c0_i32_10 = arith.constant 0 : i32
    %18 = arith.cmpi ne, %17, %c0_i32_10 : i32
    scf.if %18 {
      %c0_11 = arith.constant 0 : index
      %c0_12 = arith.constant 0 : index
      %19 = vector.load %arg9[%c0_11, %c0_12] : memref<8x1xf32, #tpu.memory_space<vmem>>, vector<8x1xf32>
      %20 = vector.broadcast %19 : vector<8x1xf32> to vector<8x128xf32>
      %21 = arith.mulf %2, %20 : vector<8x128xf32>
      %c0_13 = arith.constant 0 : index
      %c0_14 = arith.constant 0 : index
      %22 = vector.load %arg10[%c0_13, %c0_14] : memref<8x1xf32, #tpu.memory_space<vmem>>, vector<8x1xf32>
      %23 = vector.broadcast %22 : vector<8x1xf32> to vector<8x128xf32>
      %24 = arith.addf %21, %23 : vector<8x128xf32>
      %cst_15 = arith.constant 0.000000e+00 : f32
      %25 = vector.broadcast %cst_15 : f32 to vector<8x128xf32>
      %26 = arith.maximumf %24, %25 : vector<8x128xf32>
      %27 = arith.truncf %26 : vector<8x128xf32> to vector<8x128xbf16>
      %c0_16 = arith.constant 0 : index
      %c0_17 = arith.constant 0 : index
      %28 = vector.load %arg6[%c0_16, %c0_17] : memref<8x128xbf16, #tpu.memory_space<vmem>>, vector<8x128xbf16>
      tpu.vector_store %arg6[%c0_16, %c0_17], %27 {strides = array<i32>} : memref<8x128xbf16, #tpu.memory_space<vmem>>, vector<8x128xbf16>,
    } else {
    }
    return
  }
  func.func @transform_0(%arg0: i32, %arg1: i32) -> (i32, i32) {
    %c0_i32 = arith.constant 0 : i32
    %c0_i32_0 = arith.constant 0 : i32
    return %c0_i32, %arg1 : i32, i32
  }
  func.func @transform_1(%arg0: i32, %arg1: i32) -> (i32, i32) {
    %c0_i32 = arith.constant 0 : i32
    %c0_i32_0 = arith.constant 0 : i32
    %c0_i32_1 = arith.constant 0 : i32
    return %c0_i32, %c0_i32_0 : i32, i32
  }
  func.func @transform_2(%arg0: i32, %arg1: i32) -> (i32, i32) {
    %c0_i32 = arith.constant 0 : i32
    %c0_i32_0 = arith.constant 0 : i32
    %c0_i32_1 = arith.constant 0 : i32
    return %c0_i32, %c0_i32_0 : i32, i32
  }
  func.func @transform_3(%arg0: i32, %arg1: i32) -> (i32, i32) {
    %c0_i32 = arith.constant 0 : i32
    %c0_i32_0 = arith.constant 0 : i32
    %c0_i32_1 = arith.constant 0 : i32
    return %c0_i32, %c0_i32_0 : i32, i32
  }
  func.func @transform_4(%arg0: i32, %arg1: i32) -> (i32, i32) {
    %c0_i32 = arith.constant 0 : i32
    %c0_i32_0 = arith.constant 0 : i32
    return %c0_i32, %arg1 : i32, i32
  }
}

module attributes {stable_mosaic.version = 11 : i64} {
  func.func @kernel(%arg0: i32, %arg1: i32, %arg2: memref<144x512xbf16, #tpu.memory_space<vmem>>, %arg3: memref<8x144xbf16, #tpu.memory_space<vmem>>, %arg4: memref<8x1xf32, #tpu.memory_space<vmem>>, %arg5: memref<8x1xf32, #tpu.memory_space<vmem>>, %arg6: memref<8x512xbf16, #tpu.memory_space<vmem>>, %arg7: memref<8x1xf32, #tpu.memory_space<vmem>>, %arg8: memref<8x1xf32, #tpu.memory_space<vmem>>, %arg9: memref<8x1xf32, #tpu.memory_space<vmem>>, %arg10: memref<8x1xf32, #tpu.memory_space<vmem>>) attributes {dimension_semantics = [#tpu.dimension_semantics<arbitrary>, #tpu.dimension_semantics<arbitrary>], iteration_bounds = array<i64: 2, 1>, scalar_prefetch = 0 : i64, scratch_operands = 4 : i64, tpu.core_type = #tpu.core_type<tc>, window_params = [{transform_indices = @transform_0, window_bounds = array<i64: 144, 512>}, {pipeline_mode = #tpu.pipeline_mode<synchronous>, transform_indices = @transform_1, window_bounds = array<i64: 8, 144>}, {pipeline_mode = #tpu.pipeline_mode<synchronous>, transform_indices = @transform_2, window_bounds = array<i64: 8, 1>}, {pipeline_mode = #tpu.pipeline_mode<synchronous>, transform_indices = @transform_3, window_bounds = array<i64: 8, 1>}, {transform_indices = @transform_4, window_bounds = array<i64: 8, 512>}]} {
    %c0 = arith.constant 0 : index
    %c0_0 = arith.constant 0 : index
    %0 = vector.load %arg3[%c0, %c0_0] : memref<8x144xbf16, #tpu.memory_space<vmem>>, vector<8x144xbf16>
    %c0_1 = arith.constant 0 : index
    %c0_2 = arith.constant 0 : index
    %1 = vector.load %arg2[%c0_1, %c0_2] : memref<144x512xbf16, #tpu.memory_space<vmem>>, vector<144x512xbf16>
    %cst = arith.constant dense<0.000000e+00> : vector<8x512xf32>
    %2 = tpu.matmul %0, %1, %cst {dimension_numbers = #tpu.dot_dimension_numbers<[1], [0], [0], [1], [0, 0, 1, 1], [], []>} : vector<8x144xbf16>, vector<144x512xbf16>, vector<8x512xf32> -> vector<8x512xf32>
    %c0_i32 = arith.constant 0 : i32
    %3 = arith.cmpi eq, %arg0, %c0_i32 : i32
    %c0_i32_3 = arith.constant 0 : i32
    %4 = arith.cmpi eq, %arg1, %c0_i32_3 : i32
    %5 = arith.andi %3, %4 : i1
    %6 = arith.extui %5 : i1 to i32
    %c0_i32_4 = arith.constant 0 : i32
    %7 = arith.cmpi ne, %6, %c0_i32_4 : i32
    scf.if %7 {
      %cst_11 = arith.constant 0.000000e+00 : f32
      %19 = vector.broadcast %cst_11 : f32 to vector<8x1xf32>
      %c0_12 = arith.constant 0 : index
      %c0_13 = arith.constant 0 : index
      %20 = vector.load %arg7[%c0_12, %c0_13] : memref<8x1xf32, #tpu.memory_space<vmem>>, vector<8x1xf32>
      tpu.vector_store %arg7[%c0_12, %c0_13], %19 {strides = array<i32>} : memref<8x1xf32, #tpu.memory_space<vmem>>, vector<8x1xf32>,
      %cst_14 = arith.constant 0.000000e+00 : f32
      %21 = vector.broadcast %cst_14 : f32 to vector<8x1xf32>
      %c0_15 = arith.constant 0 : index
      %c0_16 = arith.constant 0 : index
      %22 = vector.load %arg8[%c0_15, %c0_16] : memref<8x1xf32, #tpu.memory_space<vmem>>, vector<8x1xf32>
      tpu.vector_store %arg8[%c0_15, %c0_16], %21 {strides = array<i32>} : memref<8x1xf32, #tpu.memory_space<vmem>>, vector<8x1xf32>,
    } else {
    }
    %c0_i32_5 = arith.constant 0 : i32
    %8 = arith.cmpi eq, %arg0, %c0_i32_5 : i32
    %9 = arith.extui %8 : i1 to i32
    %c0_i32_6 = arith.constant 0 : i32
    %10 = arith.cmpi ne, %9, %c0_i32_6 : i32
    scf.if %10 {
      %c0_11 = arith.constant 0 : index
      %c0_12 = arith.constant 0 : index
      %19 = vector.load %arg7[%c0_11, %c0_12] : memref<8x1xf32, #tpu.memory_space<vmem>>, vector<8x1xf32>
      %cst_13 = arith.constant dense<0.000000e+00> : vector<8xf32>
      %20 = vector.multi_reduction <add>, %2, %cst_13 [1] : vector<8x512xf32> to vector<8xf32>
      %21 = vector.shape_cast %20 : vector<8xf32> to vector<8x1xf32>
      %22 = arith.addf %19, %21 : vector<8x1xf32>
      %c0_14 = arith.constant 0 : index
      %c0_15 = arith.constant 0 : index
      %23 = vector.load %arg7[%c0_14, %c0_15] : memref<8x1xf32, #tpu.memory_space<vmem>>, vector<8x1xf32>
      tpu.vector_store %arg7[%c0_14, %c0_15], %22 {strides = array<i32>} : memref<8x1xf32, #tpu.memory_space<vmem>>, vector<8x1xf32>,
      %c0_16 = arith.constant 0 : index
      %c0_17 = arith.constant 0 : index
      %24 = vector.load %arg8[%c0_16, %c0_17] : memref<8x1xf32, #tpu.memory_space<vmem>>, vector<8x1xf32>
      %25 = arith.mulf %2, %2 : vector<8x512xf32>
      %cst_18 = arith.constant dense<0.000000e+00> : vector<8xf32>
      %26 = vector.multi_reduction <add>, %25, %cst_18 [1] : vector<8x512xf32> to vector<8xf32>
      %27 = vector.shape_cast %26 : vector<8xf32> to vector<8x1xf32>
      %28 = arith.addf %24, %27 : vector<8x1xf32>
      %c0_19 = arith.constant 0 : index
      %c0_20 = arith.constant 0 : index
      %29 = vector.load %arg8[%c0_19, %c0_20] : memref<8x1xf32, #tpu.memory_space<vmem>>, vector<8x1xf32>
      tpu.vector_store %arg8[%c0_19, %c0_20], %28 {strides = array<i32>} : memref<8x1xf32, #tpu.memory_space<vmem>>, vector<8x1xf32>,
    } else {
    }
    %c0_i32_7 = arith.constant 0 : i32
    %11 = arith.cmpi eq, %arg0, %c0_i32_7 : i32
    %c0_i32_8 = arith.constant 0 : i32
    %12 = arith.cmpi eq, %arg1, %c0_i32_8 : i32
    %13 = arith.andi %11, %12 : i1
    %14 = arith.extui %13 : i1 to i32
    %c0_i32_9 = arith.constant 0 : i32
    %15 = arith.cmpi ne, %14, %c0_i32_9 : i32
    scf.if %15 {
      %c0_11 = arith.constant 0 : index
      %c0_12 = arith.constant 0 : index
      %19 = vector.load %arg7[%c0_11, %c0_12] : memref<8x1xf32, #tpu.memory_space<vmem>>, vector<8x1xf32>
      %cst_13 = arith.constant 0.001953125 : f32
      %20 = vector.broadcast %cst_13 : f32 to vector<8x1xf32>
      %21 = arith.mulf %19, %20 : vector<8x1xf32>
      %c0_14 = arith.constant 0 : index
      %c0_15 = arith.constant 0 : index
      %22 = vector.load %arg8[%c0_14, %c0_15] : memref<8x1xf32, #tpu.memory_space<vmem>>, vector<8x1xf32>
      %cst_16 = arith.constant 0.001953125 : f32
      %23 = vector.broadcast %cst_16 : f32 to vector<8x1xf32>
      %24 = arith.mulf %22, %23 : vector<8x1xf32>
      %25 = arith.mulf %21, %21 : vector<8x1xf32>
      %26 = arith.subf %24, %25 : vector<8x1xf32>
      %cst_17 = arith.constant 0.000000e+00 : f32
      %27 = vector.broadcast %cst_17 : f32 to vector<8x1xf32>
      %28 = arith.maximumf %26, %27 : vector<8x1xf32>
      %cst_18 = arith.constant 9.99999974E-6 : f32
      %29 = vector.broadcast %cst_18 : f32 to vector<8x1xf32>
      %30 = arith.addf %28, %29 : vector<8x1xf32>
      %31 = math.rsqrt %30 : vector<8x1xf32>
      %c0_19 = arith.constant 0 : index
      %c0_20 = arith.constant 0 : index
      %32 = vector.load %arg4[%c0_19, %c0_20] : memref<8x1xf32, #tpu.memory_space<vmem>>, vector<8x1xf32>
      %33 = arith.mulf %32, %31 : vector<8x1xf32>
      %c0_21 = arith.constant 0 : index
      %c0_22 = arith.constant 0 : index
      %34 = vector.load %arg9[%c0_21, %c0_22] : memref<8x1xf32, #tpu.memory_space<vmem>>, vector<8x1xf32>
      tpu.vector_store %arg9[%c0_21, %c0_22], %33 {strides = array<i32>} : memref<8x1xf32, #tpu.memory_space<vmem>>, vector<8x1xf32>,
      %c0_23 = arith.constant 0 : index
      %c0_24 = arith.constant 0 : index
      %35 = vector.load %arg5[%c0_23, %c0_24] : memref<8x1xf32, #tpu.memory_space<vmem>>, vector<8x1xf32>
      %36 = arith.mulf %21, %33 : vector<8x1xf32>
      %37 = arith.subf %35, %36 : vector<8x1xf32>
      %c0_25 = arith.constant 0 : index
      %c0_26 = arith.constant 0 : index
      %38 = vector.load %arg10[%c0_25, %c0_26] : memref<8x1xf32, #tpu.memory_space<vmem>>, vector<8x1xf32>
      tpu.vector_store %arg10[%c0_25, %c0_26], %37 {strides = array<i32>} : memref<8x1xf32, #tpu.memory_space<vmem>>, vector<8x1xf32>,
    } else {
    }
    %c1_i32 = arith.constant 1 : i32
    %16 = arith.cmpi eq, %arg0, %c1_i32 : i32
    %17 = arith.extui %16 : i1 to i32
    %c0_i32_10 = arith.constant 0 : i32
    %18 = arith.cmpi ne, %17, %c0_i32_10 : i32
    scf.if %18 {
      %c0_11 = arith.constant 0 : index
      %c0_12 = arith.constant 0 : index
      %19 = vector.load %arg9[%c0_11, %c0_12] : memref<8x1xf32, #tpu.memory_space<vmem>>, vector<8x1xf32>
      %20 = vector.broadcast %19 : vector<8x1xf32> to vector<8x512xf32>
      %21 = arith.mulf %2, %20 : vector<8x512xf32>
      %c0_13 = arith.constant 0 : index
      %c0_14 = arith.constant 0 : index
      %22 = vector.load %arg10[%c0_13, %c0_14] : memref<8x1xf32, #tpu.memory_space<vmem>>, vector<8x1xf32>
      %23 = vector.broadcast %22 : vector<8x1xf32> to vector<8x512xf32>
      %24 = arith.addf %21, %23 : vector<8x512xf32>
      %cst_15 = arith.constant 0.000000e+00 : f32
      %25 = vector.broadcast %cst_15 : f32 to vector<8x512xf32>
      %26 = arith.maximumf %24, %25 : vector<8x512xf32>
      %27 = arith.truncf %26 : vector<8x512xf32> to vector<8x512xbf16>
      %c0_16 = arith.constant 0 : index
      %c0_17 = arith.constant 0 : index
      %28 = vector.load %arg6[%c0_16, %c0_17] : memref<8x512xbf16, #tpu.memory_space<vmem>>, vector<8x512xbf16>
      tpu.vector_store %arg6[%c0_16, %c0_17], %27 {strides = array<i32>} : memref<8x512xbf16, #tpu.memory_space<vmem>>, vector<8x512xbf16>,
    } else {
    }
    return
  }
  func.func @transform_0(%arg0: i32, %arg1: i32) -> (i32, i32) {
    %c0_i32 = arith.constant 0 : i32
    %c0_i32_0 = arith.constant 0 : i32
    return %c0_i32, %arg1 : i32, i32
  }
  func.func @transform_1(%arg0: i32, %arg1: i32) -> (i32, i32) {
    %c0_i32 = arith.constant 0 : i32
    %c0_i32_0 = arith.constant 0 : i32
    %c0_i32_1 = arith.constant 0 : i32
    return %c0_i32, %c0_i32_0 : i32, i32
  }
  func.func @transform_2(%arg0: i32, %arg1: i32) -> (i32, i32) {
    %c0_i32 = arith.constant 0 : i32
    %c0_i32_0 = arith.constant 0 : i32
    %c0_i32_1 = arith.constant 0 : i32
    return %c0_i32, %c0_i32_0 : i32, i32
  }
  func.func @transform_3(%arg0: i32, %arg1: i32) -> (i32, i32) {
    %c0_i32 = arith.constant 0 : i32
    %c0_i32_0 = arith.constant 0 : i32
    %c0_i32_1 = arith.constant 0 : i32
    return %c0_i32, %c0_i32_0 : i32, i32
  }
  func.func @transform_4(%arg0: i32, %arg1: i32) -> (i32, i32) {
    %c0_i32 = arith.constant 0 : i32
    %c0_i32_0 = arith.constant 0 : i32
    return %c0_i32, %arg1 : i32, i32
  }
}

module attributes {stable_mosaic.version = 11 : i64} {
  func.func @kernel(%arg0: i32, %arg1: i32, %arg2: memref<80x512xbf16, #tpu.memory_space<vmem>>, %arg3: memref<8x80xbf16, #tpu.memory_space<vmem>>, %arg4: memref<8x1xf32, #tpu.memory_space<vmem>>, %arg5: memref<8x1xf32, #tpu.memory_space<vmem>>, %arg6: memref<1x8xf32, #tpu.memory_space<vmem>>, %arg7: memref<1x512xf32, #tpu.memory_space<vmem>>, %arg8: memref<8x1xf32, #tpu.memory_space<vmem>>, %arg9: memref<8x1xf32, #tpu.memory_space<vmem>>, %arg10: memref<8x1xf32, #tpu.memory_space<vmem>>, %arg11: memref<8x1xf32, #tpu.memory_space<vmem>>) attributes {dimension_semantics = [#tpu.dimension_semantics<arbitrary>, #tpu.dimension_semantics<arbitrary>], iteration_bounds = array<i64: 2, 1>, scalar_prefetch = 0 : i64, scratch_operands = 4 : i64, tpu.core_type = #tpu.core_type<tc>, window_params = [{transform_indices = @transform_0, window_bounds = array<i64: 80, 512>}, {pipeline_mode = #tpu.pipeline_mode<synchronous>, transform_indices = @transform_1, window_bounds = array<i64: 8, 80>}, {pipeline_mode = #tpu.pipeline_mode<synchronous>, transform_indices = @transform_2, window_bounds = array<i64: 8, 1>}, {pipeline_mode = #tpu.pipeline_mode<synchronous>, transform_indices = @transform_3, window_bounds = array<i64: 8, 1>}, {pipeline_mode = #tpu.pipeline_mode<synchronous>, transform_indices = @transform_4, window_bounds = array<i64: 1, 8>}, {transform_indices = @transform_5, window_bounds = array<i64: 1, 512>}]} {
    %c0 = arith.constant 0 : index
    %c0_0 = arith.constant 0 : index
    %0 = vector.load %arg3[%c0, %c0_0] : memref<8x80xbf16, #tpu.memory_space<vmem>>, vector<8x80xbf16>
    %c0_1 = arith.constant 0 : index
    %c0_2 = arith.constant 0 : index
    %1 = vector.load %arg2[%c0_1, %c0_2] : memref<80x512xbf16, #tpu.memory_space<vmem>>, vector<80x512xbf16>
    %cst = arith.constant dense<0.000000e+00> : vector<8x512xf32>
    %2 = tpu.matmul %0, %1, %cst {dimension_numbers = #tpu.dot_dimension_numbers<[1], [0], [0], [1], [0, 0, 1, 1], [], []>} : vector<8x80xbf16>, vector<80x512xbf16>, vector<8x512xf32> -> vector<8x512xf32>
    %c0_i32 = arith.constant 0 : i32
    %3 = arith.cmpi eq, %arg0, %c0_i32 : i32
    %c0_i32_3 = arith.constant 0 : i32
    %4 = arith.cmpi eq, %arg1, %c0_i32_3 : i32
    %5 = arith.andi %3, %4 : i1
    %6 = arith.extui %5 : i1 to i32
    %c0_i32_4 = arith.constant 0 : i32
    %7 = arith.cmpi ne, %6, %c0_i32_4 : i32
    scf.if %7 {
      %cst_11 = arith.constant 0.000000e+00 : f32
      %19 = vector.broadcast %cst_11 : f32 to vector<8x1xf32>
      %c0_12 = arith.constant 0 : index
      %c0_13 = arith.constant 0 : index
      %20 = vector.load %arg8[%c0_12, %c0_13] : memref<8x1xf32, #tpu.memory_space<vmem>>, vector<8x1xf32>
      tpu.vector_store %arg8[%c0_12, %c0_13], %19 {strides = array<i32>} : memref<8x1xf32, #tpu.memory_space<vmem>>, vector<8x1xf32>,
      %cst_14 = arith.constant 0.000000e+00 : f32
      %21 = vector.broadcast %cst_14 : f32 to vector<8x1xf32>
      %c0_15 = arith.constant 0 : index
      %c0_16 = arith.constant 0 : index
      %22 = vector.load %arg9[%c0_15, %c0_16] : memref<8x1xf32, #tpu.memory_space<vmem>>, vector<8x1xf32>
      tpu.vector_store %arg9[%c0_15, %c0_16], %21 {strides = array<i32>} : memref<8x1xf32, #tpu.memory_space<vmem>>, vector<8x1xf32>,
    } else {
    }
    %c0_i32_5 = arith.constant 0 : i32
    %8 = arith.cmpi eq, %arg0, %c0_i32_5 : i32
    %9 = arith.extui %8 : i1 to i32
    %c0_i32_6 = arith.constant 0 : i32
    %10 = arith.cmpi ne, %9, %c0_i32_6 : i32
    scf.if %10 {
      %c0_11 = arith.constant 0 : index
      %c0_12 = arith.constant 0 : index
      %19 = vector.load %arg8[%c0_11, %c0_12] : memref<8x1xf32, #tpu.memory_space<vmem>>, vector<8x1xf32>
      %cst_13 = arith.constant dense<0.000000e+00> : vector<8xf32>
      %20 = vector.multi_reduction <add>, %2, %cst_13 [1] : vector<8x512xf32> to vector<8xf32>
      %21 = vector.shape_cast %20 : vector<8xf32> to vector<8x1xf32>
      %22 = arith.addf %19, %21 : vector<8x1xf32>
      %c0_14 = arith.constant 0 : index
      %c0_15 = arith.constant 0 : index
      %23 = vector.load %arg8[%c0_14, %c0_15] : memref<8x1xf32, #tpu.memory_space<vmem>>, vector<8x1xf32>
      tpu.vector_store %arg8[%c0_14, %c0_15], %22 {strides = array<i32>} : memref<8x1xf32, #tpu.memory_space<vmem>>, vector<8x1xf32>,
      %c0_16 = arith.constant 0 : index
      %c0_17 = arith.constant 0 : index
      %24 = vector.load %arg9[%c0_16, %c0_17] : memref<8x1xf32, #tpu.memory_space<vmem>>, vector<8x1xf32>
      %25 = arith.mulf %2, %2 : vector<8x512xf32>
      %cst_18 = arith.constant dense<0.000000e+00> : vector<8xf32>
      %26 = vector.multi_reduction <add>, %25, %cst_18 [1] : vector<8x512xf32> to vector<8xf32>
      %27 = vector.shape_cast %26 : vector<8xf32> to vector<8x1xf32>
      %28 = arith.addf %24, %27 : vector<8x1xf32>
      %c0_19 = arith.constant 0 : index
      %c0_20 = arith.constant 0 : index
      %29 = vector.load %arg9[%c0_19, %c0_20] : memref<8x1xf32, #tpu.memory_space<vmem>>, vector<8x1xf32>
      tpu.vector_store %arg9[%c0_19, %c0_20], %28 {strides = array<i32>} : memref<8x1xf32, #tpu.memory_space<vmem>>, vector<8x1xf32>,
    } else {
    }
    %c0_i32_7 = arith.constant 0 : i32
    %11 = arith.cmpi eq, %arg0, %c0_i32_7 : i32
    %c0_i32_8 = arith.constant 0 : i32
    %12 = arith.cmpi eq, %arg1, %c0_i32_8 : i32
    %13 = arith.andi %11, %12 : i1
    %14 = arith.extui %13 : i1 to i32
    %c0_i32_9 = arith.constant 0 : i32
    %15 = arith.cmpi ne, %14, %c0_i32_9 : i32
    scf.if %15 {
      %c0_11 = arith.constant 0 : index
      %c0_12 = arith.constant 0 : index
      %19 = vector.load %arg8[%c0_11, %c0_12] : memref<8x1xf32, #tpu.memory_space<vmem>>, vector<8x1xf32>
      %cst_13 = arith.constant 0.001953125 : f32
      %20 = vector.broadcast %cst_13 : f32 to vector<8x1xf32>
      %21 = arith.mulf %19, %20 : vector<8x1xf32>
      %c0_14 = arith.constant 0 : index
      %c0_15 = arith.constant 0 : index
      %22 = vector.load %arg9[%c0_14, %c0_15] : memref<8x1xf32, #tpu.memory_space<vmem>>, vector<8x1xf32>
      %cst_16 = arith.constant 0.001953125 : f32
      %23 = vector.broadcast %cst_16 : f32 to vector<8x1xf32>
      %24 = arith.mulf %22, %23 : vector<8x1xf32>
      %25 = arith.mulf %21, %21 : vector<8x1xf32>
      %26 = arith.subf %24, %25 : vector<8x1xf32>
      %cst_17 = arith.constant 0.000000e+00 : f32
      %27 = vector.broadcast %cst_17 : f32 to vector<8x1xf32>
      %28 = arith.maximumf %26, %27 : vector<8x1xf32>
      %cst_18 = arith.constant 9.99999974E-6 : f32
      %29 = vector.broadcast %cst_18 : f32 to vector<8x1xf32>
      %30 = arith.addf %28, %29 : vector<8x1xf32>
      %31 = math.rsqrt %30 : vector<8x1xf32>
      %c0_19 = arith.constant 0 : index
      %c0_20 = arith.constant 0 : index
      %32 = vector.load %arg4[%c0_19, %c0_20] : memref<8x1xf32, #tpu.memory_space<vmem>>, vector<8x1xf32>
      %33 = arith.mulf %32, %31 : vector<8x1xf32>
      %c0_21 = arith.constant 0 : index
      %c0_22 = arith.constant 0 : index
      %34 = vector.load %arg10[%c0_21, %c0_22] : memref<8x1xf32, #tpu.memory_space<vmem>>, vector<8x1xf32>
      tpu.vector_store %arg10[%c0_21, %c0_22], %33 {strides = array<i32>} : memref<8x1xf32, #tpu.memory_space<vmem>>, vector<8x1xf32>,
      %c0_23 = arith.constant 0 : index
      %c0_24 = arith.constant 0 : index
      %35 = vector.load %arg5[%c0_23, %c0_24] : memref<8x1xf32, #tpu.memory_space<vmem>>, vector<8x1xf32>
      %36 = arith.mulf %21, %33 : vector<8x1xf32>
      %37 = arith.subf %35, %36 : vector<8x1xf32>
      %c0_25 = arith.constant 0 : index
      %c0_26 = arith.constant 0 : index
      %38 = vector.load %arg11[%c0_25, %c0_26] : memref<8x1xf32, #tpu.memory_space<vmem>>, vector<8x1xf32>
      tpu.vector_store %arg11[%c0_25, %c0_26], %37 {strides = array<i32>} : memref<8x1xf32, #tpu.memory_space<vmem>>, vector<8x1xf32>,
    } else {
    }
    %c1_i32 = arith.constant 1 : i32
    %16 = arith.cmpi eq, %arg0, %c1_i32 : i32
    %17 = arith.extui %16 : i1 to i32
    %c0_i32_10 = arith.constant 0 : i32
    %18 = arith.cmpi ne, %17, %c0_i32_10 : i32
    scf.if %18 {
      %c0_11 = arith.constant 0 : index
      %c0_12 = arith.constant 0 : index
      %19 = vector.load %arg10[%c0_11, %c0_12] : memref<8x1xf32, #tpu.memory_space<vmem>>, vector<8x1xf32>
      %20 = vector.broadcast %19 : vector<8x1xf32> to vector<8x512xf32>
      %21 = arith.mulf %2, %20 : vector<8x512xf32>
      %c0_13 = arith.constant 0 : index
      %c0_14 = arith.constant 0 : index
      %22 = vector.load %arg11[%c0_13, %c0_14] : memref<8x1xf32, #tpu.memory_space<vmem>>, vector<8x1xf32>
      %23 = vector.broadcast %22 : vector<8x1xf32> to vector<8x512xf32>
      %24 = arith.addf %21, %23 : vector<8x512xf32>
      %cst_15 = arith.constant 0.000000e+00 : f32
      %25 = vector.broadcast %cst_15 : f32 to vector<8x512xf32>
      %26 = arith.maximumf %24, %25 : vector<8x512xf32>
      %c0_16 = arith.constant 0 : index
      %c0_17 = arith.constant 0 : index
      %27 = vector.load %arg6[%c0_16, %c0_17] : memref<1x8xf32, #tpu.memory_space<vmem>>, vector<1x8xf32>
      %cst_18 = arith.constant dense<0.000000e+00> : vector<1x512xf32>
      %28 = tpu.matmul %27, %26, %cst_18 {dimension_numbers = #tpu.dot_dimension_numbers<[1], [0], [0], [1], [0, 0, 1, 1], [], []>} : vector<1x8xf32>, vector<8x512xf32>, vector<1x512xf32> -> vector<1x512xf32>
      %c0_19 = arith.constant 0 : index
      %c0_20 = arith.constant 0 : index
      %29 = vector.load %arg7[%c0_19, %c0_20] : memref<1x512xf32, #tpu.memory_space<vmem>>, vector<1x512xf32>
      tpu.vector_store %arg7[%c0_19, %c0_20], %28 {strides = array<i32>} : memref<1x512xf32, #tpu.memory_space<vmem>>, vector<1x512xf32>,
    } else {
    }
    return
  }
  func.func @transform_0(%arg0: i32, %arg1: i32) -> (i32, i32) {
    %c0_i32 = arith.constant 0 : i32
    %c0_i32_0 = arith.constant 0 : i32
    return %c0_i32, %arg1 : i32, i32
  }
  func.func @transform_1(%arg0: i32, %arg1: i32) -> (i32, i32) {
    %c0_i32 = arith.constant 0 : i32
    %c0_i32_0 = arith.constant 0 : i32
    %c0_i32_1 = arith.constant 0 : i32
    return %c0_i32, %c0_i32_0 : i32, i32
  }
  func.func @transform_2(%arg0: i32, %arg1: i32) -> (i32, i32) {
    %c0_i32 = arith.constant 0 : i32
    %c0_i32_0 = arith.constant 0 : i32
    %c0_i32_1 = arith.constant 0 : i32
    return %c0_i32, %c0_i32_0 : i32, i32
  }
  func.func @transform_3(%arg0: i32, %arg1: i32) -> (i32, i32) {
    %c0_i32 = arith.constant 0 : i32
    %c0_i32_0 = arith.constant 0 : i32
    %c0_i32_1 = arith.constant 0 : i32
    return %c0_i32, %c0_i32_0 : i32, i32
  }
  func.func @transform_4(%arg0: i32, %arg1: i32) -> (i32, i32) {
    %c0_i32 = arith.constant 0 : i32
    %c0_i32_0 = arith.constant 0 : i32
    %c0_i32_1 = arith.constant 0 : i32
    return %c0_i32, %c0_i32_0 : i32, i32
  }
  func.func @transform_5(%arg0: i32, %arg1: i32) -> (i32, i32) {
    %c0_i32 = arith.constant 0 : i32
    %c0_i32_0 = arith.constant 0 : i32
    return %c0_i32, %arg1 : i32, i32
  }
}

</mosaic_0001>

<bundles_post_ra>
// kernel: unet_old_forward.14
= control target key start
LH: loop header
LB: loop body
LE: loop exit
PB: predicated region body
PF: predicated region fallthrough
CT: control target
= control target key end

     0   :  { %s613_s15 = smov 0   ;;  %s615_s16 = smov 0   ;;  %s736_s0 = inlined_call_operand.vmem [shape: bf16[32,512], index: 0, kind: input, shape index: {}]   ;;  %s737_s1 = inlined_call_operand.vmem [shape: bf16[8,32], index: 1, kind: input, shape index: {}]   ;;  %s738_s2 = inlined_call_operand.vmem [shape: f32[8,1], index: 2, kind: input, shape index: {}]   ;;  %s739_s3 = inlined_call_operand.vmem [shape: f32[8,1], index: 3, kind: input, shape index: {}]   ;;  %s740_s4 = inlined_call_operand.vmem [shape: bf16[8,512], index: 4, kind: output, shape index: {}]  }
   0x1   :  { %s617_s17 = smov 0  }
   0x2 LB: > { %s26_s18 = sadd.s32 1, %s580_s16  ;;  %p480_p0 = scmp.ge.s32.totalorder %s584_s17, 1  ;;  %s584_s17 = sphi %s617_s17, %s14_s17   ;;  %s580_s16 = sphi %s615_s16, %s742_s16   ;;  %s576_s15 = sphi %s613_s15, %s741_s15  }
   0x3   : > { %p28_p1 = scmp.ge.s32.totalorder %s26_s18, 2  ;;  %p175_p2 = scmp.lt.s32.totalorder %s584_s17, 3 }
   0x5   : > { %s744_s18 = smov (%p28_p1, %s26_s18), 0  ;;  %p176_p3 = pnand %p480_p0, %p175_p2 }
   0x6   : > { %p319_p4 = scmp.eq.s32.totalorder (!%p176_p3), %s576_s15, 0 }
   0x7   : > { %179 = sbr.rel (%p176_p3) target bundleno = 484 (0x1e4), region = 36 }
   0xc   : > { %v499_v0 = vld [vmem:[%s736_s0 + $0x20] sm:$0xf]  ;;  %v530_v1 = vld [vmem:[%s736_s0 + $0x2c] sm:$0xf0]  ;;  %v528_v2 = vld [vmem:[%s736_s0 + $0x24] sm:$0xf] }
   0xd   : > { %v500_v3 = vor.u32 %v530_v1, %v499_v0  ;;  %v501_v4 = vld [vmem:[%s736_s0 + $0x30] sm:$0xf0]  ;;  %v507_v5 = vld [vmem:[%s736_s0 + $0x28] sm:$0xf]  ;;  %v531_v6 = vld [vmem:[%s736_s0 + $0x34] sm:$0xf0] }
   0xe   : > { %v504_v7 = vor.u32 %v528_v2, %v501_v4  ;;  %v508_v8 = vor.u32 %v531_v6, %v507_v5  ;;  %v529_v9 = vld [vmem:[%s736_s0 + $0x2c] sm:$0xf]  ;;  %v509_v10 = vld [vmem:[%s736_s0 + $0x38] sm:$0xf0]  ;;  %v483_v11 = vld [vmem:[%s736_s0] sm:$0xf] }
   0xf   : > { %273 = vmatpush.bf16.msra.mxu0 %v500_v3  ;;  %v512_v12 = vor.u32 %v529_v9, %v509_v10  ;;  %v526_v13 = vld [vmem:[%s736_s0 + $0xc] sm:$0xf0]  ;;  %v524_v14 = vld [vmem:[%s736_s0 + $0x4] sm:$0xf]  ;;  %v485_v15 = vld [vmem:[%s736_s0 + $0x10] sm:$0xf0] }
  0x10   : > { %286 = vmatpush.bf16.msra.mxu1 %v504_v7  ;;  %299 = vmatpush.bf16.msra.mxu2 %v508_v8  ;;  %v484_v16 = vor.u32 %v526_v13, %v483_v11  ;;  %v488_v17 = vor.u32 %v524_v14, %v485_v15  ;;  %v491_v18 = vld [vmem:[%s736_s0 + $0x8] sm:$0xf]  ;;  %v527_v19 = vld [vmem:[%s736_s0 + $0x14] sm:$0xf0]  ;;  %v525_v20 = vld [vmem:[%s736_s0 + $0xc] sm:$0xf] }
  0x11   : > { %312 = vmatpush.bf16.msra.mxu3 %v512_v12  ;;  %v492_v21 = vor.u32 %v527_v19, %v491_v18  ;;  %v493_v22 = vld [vmem:[%s736_s0 + $0x18] sm:$0xf0]  ;;  %v214_v24 = vld [vmem:[%s737_s1] sm:$0xf]  ;;  %vm263_vm0 = vcmask 261120   ;;  %vm325_vm1 = vcmask (%p319_p4), 7168  }
  0x12   : > { %v496_v23 = vor.u32 %v525_v20, %v493_v22  ;;  %v586_v33 = vmov (%p319_p4), 0.0  }
  0x13   : > { %274 = vmatpush.bf16.msra.mxu0 %v484_v16  ;;  %326 = vst.msk [vmem:[#allocation2] sm:$0xff] (%p319_p4), %vm325_vm1, %v586_v33 }
  0x14   : > { %287 = vmatpush.bf16.msra.mxu1 %v488_v17  ;;  %300 = vmatpush.bf16.msra.mxu2 %v492_v21  ;;  %327 = vst.msk [vmem:[#allocation3] sm:$0xff] (%p319_p4), %vm325_vm1, %v586_v33 }
  0x15   : > { %313 = vmatpush.bf16.msra.mxu3 %v496_v23 }
  0x16   : > { %513 = vmatmul.msk.bf16.vlgmr.msra.gmra.mxu0 %vm263_vm0, %v214_v24 }
  0x17   : > { %514 = vmatmul.msk.bf16.vlgmr.msra.gmra.mxu1 %vm263_vm0, %v214_v24  ;;  %515 = vmatmul.msk.bf16.vlgmr.msra.gmra.mxu2 %vm263_vm0, %v214_v24 }
  0x18   : > { %516 = vmatmul.msk.bf16.vlgmr.msra.gmra.mxu3 %vm263_vm0, %v214_v24 }
  0x93   : > { %v685_v25 = vpop.f32.mrf.mxu0 }
  0x94   : > { %v687_v26 = vpop.f32.mrf.mxu1 }
  0x9a   : > { %v689_v27 = vpop.f32.mrf.mxu2 }
  0x9b   : > { %v691_v28 = vpop.f32.mrf.mxu3  ;;  %v278_v29 = vpop.f32.mrf.mxu0 }
  0x9c   : > { %v291_v30 = vpop.f32.mrf.mxu1 }
  0x9f   : > { %324 = sbr.rel (!%p319_p4) target bundleno = 164 (0xa4), region = 40 }
  0xa2   : > { %v304_v31 = vpop.f32.mrf.mxu2 }
  0xa3   : > { %v317_v32 = vpop.f32.mrf.mxu3 }
  0xa4 PF: > { %p518_p5 = scmp.ne.s32.totalorder %s576_s15, 0 }
  0xa6   : > { %330 = sbr.rel (%p518_p5) target bundleno = 304 (0x130), region = 44 }
  0xab   : > { %v332_v34 = vadd.f32 %v687_v26, %v685_v25  ;;  %v341_v35 = vmul.f32 %v685_v25, %v685_v25  ;;  %v342_v36 = vmul.f32 %v687_v26, %v687_v26  ;;  %v343_v38 = vmul.f32 %v689_v27, %v689_v27  ;;  %v331_v44 = vld [vmem:[#allocation2] sm:$0xff]  ;;  %v340_v47 = vld [vmem:[#allocation3] sm:$0xff] }
  0xac   : > { %v344_v41 = vmul.f32 %v691_v28, %v691_v28  ;;  %vm338_vm2 = vcmask 7168  }
  0xad   : > { %v333_v37 = vadd.f32 %v332_v34, %v689_v27  ;;  %v345_v39 = vadd.f32 %v342_v36, %v341_v35 }
  0xaf   : > { %v334_v40 = vadd.f32 %v333_v37, %v691_v28  ;;  %v346_v42 = vadd.f32 %v345_v39, %v343_v38 }
  0xb1   : > { %335 = vadd.xlane.f32.xlu0 %v334_v40  ;;  %v347_v43 = vadd.f32 %v346_v42, %v344_v41 }
  0xb9   : > { %348 = vadd.xlane.f32.xlu0 %v347_v43 }
 0x124   : > { %v336_v45 = vpop.xlane.xlu0 %335 }
 0x125   : > { %v337_v46 = vadd.f32 %v336_v45, %v331_v44 }
 0x127   : > { %339 = vst.msk [vmem:[#allocation2] sm:$0xff] %vm338_vm2, %v337_v46 }
 0x12c   : > { %v349_v48 = vpop.xlane.xlu0 %348 }
 0x12d   : > { %v350_v49 = vadd.f32 %v349_v48, %v340_v47 }
 0x12f   : > { %351 = vst.msk [vmem:[#allocation3] sm:$0xff] %vm338_vm2, %v350_v49 }
 0x130 PF: > { %353 = sbr.rel (!%p319_p4) target bundleno = 344 (0x158), region = 48  ;;  %v354_v50 = vld [vmem:[#allocation2] sm:$0xff] (%p319_p4)  ;;  %vm374_vm6 = vcmask (%p319_p4), 7168  }
 0x131   : > { %v355_v52 = vmul.f32 (%p319_p4), 0.001953125, %v354_v50  ;;  %v372_v0 = vld [vmem:[%s738_s2] sm:$0xff] (%p319_p4) }
 0x132   : > { %v376_v3 = vld [vmem:[%s739_s3] sm:$0xff] (%p319_p4) }
 0x133   : > { %v358_v54 = vmul.f32 (%p319_p4), %v355_v52, %v355_v52 }
 0x136   : > { %v356_v51 = vld [vmem:[#allocation3] sm:$0xff] }
 0x137   : > { %v357_v53 = vmul.f32 0.001953125, %v356_v51 }
 0x139   : > { %v359_v55 = vsub.f32 %v357_v53, %v358_v54 }
 0x13b   : > { %v360_v56 = vmax.f32 %v359_v55, 0.0 }
 0x13d   : > { %v361_v57 = vadd.f32 1e-05, %v360_v56 }
 0x13f   : > { %559 = vrsqrt.f32 %v361_v57  ;;  %vm368_vm3 = vweird.f32 %v361_v57 }
 0x145   : > { %v560_v58 = vpop.eup %559 }
 0x146   : > { %v363_v59 = vmul.f32 %v560_v58, %v361_v57  ;;  %vm369_vm4 = vweird.f32 %v560_v58 }
 0x147   : > { %vm370_vm5 = vmor %vm368_vm3, %vm369_vm4 }
 0x148   : > { %v364_v60 = vmul.f32 %v560_v58, %v363_v59 }
 0x14a   : > { %v365_v61 = vmul.f32 0.5, %v364_v60 }
 0x14c   : > { %v366_v62 = vsub.f32 1.5, %v365_v61 }
 0x14e   : > { %v367_v63 = vmul.f32 %v560_v58, %v366_v62 }
 0x150   : > { %v371_v1 = vsel %vm370_vm5, %v560_v58, %v367_v63 }
 0x151   : > { %v373_v2 = vmul.f32 %v372_v0, %v371_v1 }
 0x153   : > { %375 = vst.msk [vmem:[#allocation4] sm:$0xff] %vm374_vm6, %v373_v2  ;;  %v377_v4 = vmul.f32 %v373_v2, %v355_v52 }
 0x155   : > { %v378_v5 = vsub.f32 %v376_v3, %v377_v4 }
 0x157   : > { %379 = vst.msk [vmem:[#allocation5] sm:$0xff] %vm374_vm6, %v378_v5 }
 0x158 PF: > { %p519_p6 = scmp.ne.s32.totalorder %s576_s15, 1 }
 0x15a   : > { %383 = sbr.rel (%p519_p6) target bundleno = 484 (0x1e4), region = 52 }
 0x15f   : > { %v384_v6 = vld [vmem:[#allocation4] sm:$0xff]  ;;  %v587_v7 = vmov 0   ;;  %v394_v8 = vld [vmem:[#allocation5] sm:$0xff] }
 0x160   : > { %561 = vset.pattern.permute.xlu0 %v587_v7 }
 0x161   : > { %387 = vperm.xlu0 %561, %v384_v6  }
 0x169   : > { %397 = vperm.xlu0 %561, %v394_v8  }
 0x1d3   : > { %v388_v9 = vpop.permute.xlu0 %387 }
 0x1d4   : > { %v390_v10 = vmul.f32 %v388_v9, %v685_v25  ;;  %v391_v11 = vmul.f32 %v388_v9, %v687_v26  ;;  %v392_v12 = vmul.f32 %v388_v9, %v689_v27  ;;  %v393_v13 = vmul.f32 %v388_v9, %v691_v28 }
 0x1db   : > { %v398_v14 = vpop.permute.xlu0 %397 }
 0x1dc   : > { %v400_v15 = vadd.f32 %v398_v14, %v390_v10  ;;  %v401_v16 = vadd.f32 %v398_v14, %v391_v11  ;;  %v402_v17 = vadd.f32 %v398_v14, %v392_v12  ;;  %v403_v18 = vadd.f32 %v398_v14, %v393_v13 }
 0x1de   : > { %v404_v19 = vmax.f32 %v400_v15, 0.0  ;;  %v405_v20 = vmax.f32 %v401_v16, 0.0  ;;  %v406_v21 = vmax.f32 %v402_v17, 0.0  ;;  %v407_v22 = vmax.f32 %v403_v18, 0.0 }
 0x1e0   : > { %v408_v23 = vpack.c.bf16 %v405_v20, %v404_v19  ;;  %v409_v24 = vpack.c.bf16 %v407_v22, %v406_v21 }
 0x1e2   : > { %410 = vst [vmem:[%s740_s4] sm:$0xff] %v408_v23 }
 0x1e3   : > { %411 = vst [vmem:[%s740_s4 + $0x8] sm:$0xff] %v409_v24 }
 0x1e4 PF: > { %s14_s17 = sadd.s32 1, %s584_s17   ;;  %s741_s15 = smov %s580_s16 }
 0x1e5   : > { %p11_p7 = scmp.ge.s32.totalorder %s14_s17, 4   ;;  %s742_s16 = smov %s744_s18 }
 0x1e7   :  { %13 = sbr.rel (!%p11_p7) target bundleno = 2 (0x2), region = 82 }

// kernel: unet_old_forward.15
= control target key start
LH: loop header
LB: loop body
LE: loop exit
PB: predicated region body
PF: predicated region fallthrough
CT: control target
= control target key end

     0   :  { %s745_s15 = smov 0   ;;  %s747_s16 = smov 0   ;;  %s940_s0 = inlined_call_operand.vmem [shape: bf16[80,512], index: 0, kind: input, shape index: {}]   ;;  %s941_s1 = inlined_call_operand.vmem [shape: bf16[8,80], index: 1, kind: input, shape index: {}]   ;;  %s942_s2 = inlined_call_operand.vmem [shape: f32[8,1], index: 2, kind: input, shape index: {}]   ;;  %s943_s3 = inlined_call_operand.vmem [shape: f32[8,1], index: 3, kind: input, shape index: {}]   ;;  %s944_s4 = inlined_call_operand.vmem [shape: bf16[8,512], index: 4, kind: output, shape index: {}]  }
   0x1   :  { %s749_s17 = smov 0  }
   0x2 LB: > { %s26_s18 = sadd.s32 1, %s712_s16  ;;  %p552_p0 = scmp.ge.s32.totalorder %s716_s17, 1  ;;  %s716_s17 = sphi %s749_s17, %s14_s17   ;;  %s712_s16 = sphi %s747_s16, %s946_s16   ;;  %s708_s15 = sphi %s745_s15, %s945_s15  }
   0x3   : > { %p28_p1 = scmp.ge.s32.totalorder %s26_s18, 2  ;;  %p175_p2 = scmp.lt.s32.totalorder %s716_s17, 3 }
   0x5   : > { %s948_s18 = smov (%p28_p1, %s26_s18), 0  ;;  %p176_p3 = pnand %p552_p0, %p175_p2 }
   0x6   : > { %p391_p4 = scmp.eq.s32.totalorder (!%p176_p3), %s708_s15, 0 }
   0x7   : > { %179 = sbr.rel (%p176_p3) target bundleno = 496 (0x1f0), region = 36 }
   0xc   : > { %v619_v0 = vld [vmem:[%s940_s0 + $0x80] sm:$0xf]  ;;  %v662_v1 = vld [vmem:[%s940_s0 + $0x8c] sm:$0xf0]  ;;  %v660_v2 = vld [vmem:[%s940_s0 + $0x84] sm:$0xf] }
   0xd   : > { %v620_v3 = vor.u32 %v662_v1, %v619_v0  ;;  %v621_v4 = vld [vmem:[%s940_s0 + $0x90] sm:$0xf0]  ;;  %v627_v5 = vld [vmem:[%s940_s0 + $0x88] sm:$0xf]  ;;  %v663_v6 = vld [vmem:[%s940_s0 + $0x94] sm:$0xf0] }
   0xe   : > { %v624_v7 = vor.u32 %v660_v2, %v621_v4  ;;  %v628_v8 = vor.u32 %v663_v6, %v627_v5  ;;  %v661_v9 = vld [vmem:[%s940_s0 + $0x8c] sm:$0xf]  ;;  %v629_v10 = vld [vmem:[%s940_s0 + $0x98] sm:$0xf0]  ;;  %v603_v11 = vld [vmem:[%s940_s0 + $0x60] sm:$0xf] }
   0xf   : > { %342 = vmatpush.bf16.msra.mxu0 %v620_v3  ;;  %v632_v12 = vor.u32 %v661_v9, %v629_v10  ;;  %v658_v13 = vld [vmem:[%s940_s0 + $0x6c] sm:$0xf0]  ;;  %v656_v14 = vld [vmem:[%s940_s0 + $0x64] sm:$0xf]  ;;  %v605_v15 = vld [vmem:[%s940_s0 + $0x70] sm:$0xf0] }
  0x10   : > { %355 = vmatpush.bf16.msra.mxu1 %v624_v7  ;;  %368 = vmatpush.bf16.msra.mxu2 %v628_v8  ;;  %v604_v16 = vor.u32 %v658_v13, %v603_v11  ;;  %v608_v17 = vor.u32 %v656_v14, %v605_v15  ;;  %v611_v18 = vld [vmem:[%s940_s0 + $0x68] sm:$0xf]  ;;  %v659_v19 = vld [vmem:[%s940_s0 + $0x74] sm:$0xf0]  ;;  %v657_v20 = vld [vmem:[%s940_s0 + $0x6c] sm:$0xf] }
  0x11   : > { %381 = vmatpush.bf16.msra.mxu3 %v632_v12  ;;  %v612_v21 = vor.u32 %v659_v19, %v611_v18  ;;  %v613_v22 = vld [vmem:[%s940_s0 + $0x78] sm:$0xf0]  ;;  %v587_v23 = vld [vmem:[%s940_s0 + $0x40] sm:$0xf]  ;;  %v654_v24 = vld [vmem:[%s940_s0 + $0x4c] sm:$0xf0] }
  0x12   : > { %v616_v25 = vor.u32 %v657_v20, %v613_v22  ;;  %v652_v26 = vld [vmem:[%s940_s0 + $0x44] sm:$0xf]  ;;  %v589_v27 = vld [vmem:[%s940_s0 + $0x50] sm:$0xf0]  ;;  %v595_v28 = vld [vmem:[%s940_s0 + $0x48] sm:$0xf]  ;;  %v588_v29 = vor.u32 %v654_v24, %v587_v23 }
  0x13   : > { %343 = vmatpush.bf16.msra.mxu0 %v604_v16  ;;  %v655_v30 = vld [vmem:[%s940_s0 + $0x54] sm:$0xf0]  ;;  %v653_v31 = vld [vmem:[%s940_s0 + $0x4c] sm:$0xf]  ;;  %v597_v32 = vld [vmem:[%s940_s0 + $0x58] sm:$0xf0]  ;;  %v592_v33 = vor.u32 %v652_v26, %v589_v27 }
  0x14   : > { %356 = vmatpush.bf16.msra.mxu1 %v608_v17  ;;  %369 = vmatpush.bf16.msra.mxu2 %v612_v21  ;;  %v596_v34 = vor.u32 %v655_v30, %v595_v28  ;;  %v571_v35 = vld [vmem:[%s940_s0 + $0x20] sm:$0xf]  ;;  %v650_v36 = vld [vmem:[%s940_s0 + $0x2c] sm:$0xf0]  ;;  %v648_v37 = vld [vmem:[%s940_s0 + $0x24] sm:$0xf]  ;;  %v600_v38 = vor.u32 %v653_v31, %v597_v32 }
  0x15   : > { %382 = vmatpush.bf16.msra.mxu3 %v616_v25  ;;  %v573_v39 = vld [vmem:[%s940_s0 + $0x30] sm:$0xf0]  ;;  %v579_v40 = vld [vmem:[%s940_s0 + $0x28] sm:$0xf]  ;;  %v651_v41 = vld [vmem:[%s940_s0 + $0x34] sm:$0xf0]  ;;  %v572_v44 = vor.u32 %v650_v36, %v571_v35 }
  0x16   : > { %v649_v42 = vld [vmem:[%s940_s0 + $0x2c] sm:$0xf]  ;;  %v581_v43 = vld [vmem:[%s940_s0 + $0x38] sm:$0xf0]  ;;  %v576_v45 = vor.u32 %v648_v37, %v573_v39  ;;  %v580_v46 = vor.u32 %v651_v41, %v579_v40  ;;  %v555_v47 = vld [vmem:[%s940_s0] sm:$0xf] }
  0x17   : > { %344 = vmatpush.bf16.msra.mxu0 %v588_v29  ;;  %v646_v48 = vld [vmem:[%s940_s0 + $0xc] sm:$0xf0]  ;;  %v644_v49 = vld [vmem:[%s940_s0 + $0x4] sm:$0xf]  ;;  %v584_v50 = vor.u32 %v649_v42, %v581_v43  ;;  %v557_v51 = vld [vmem:[%s940_s0 + $0x10] sm:$0xf0] }
  0x18   : > { %357 = vmatpush.bf16.msra.mxu1 %v592_v33  ;;  %370 = vmatpush.bf16.msra.mxu2 %v596_v34  ;;  %v563_v52 = vld [vmem:[%s940_s0 + $0x8] sm:$0xf]  ;;  %v647_v53 = vld [vmem:[%s940_s0 + $0x14] sm:$0xf0]  ;;  %v645_v54 = vld [vmem:[%s940_s0 + $0xc] sm:$0xf]  ;;  %v556_v56 = vor.u32 %v646_v48, %v555_v47  ;;  %v560_v57 = vor.u32 %v644_v49, %v557_v51 }
  0x19   : > { %383 = vmatpush.bf16.msra.mxu3 %v600_v38  ;;  %v565_v55 = vld [vmem:[%s940_s0 + $0x18] sm:$0xf0]  ;;  %v564_v58 = vor.u32 %v647_v53, %v563_v52  ;;  %v214_v60 = vld [vmem:[%s941_s1] sm:$0xf]  ;;  %vm335_vm0 = vcmask 654336   ;;  %vm397_vm1 = vcmask (%p391_p4), 7168  }
  0x1a   : > { %v568_v59 = vor.u32 %v645_v54, %v565_v55  ;;  %v718_v5 = vmov (%p391_p4), 0.0  }
  0x1b   : > { %345 = vmatpush.bf16.msra.mxu0 %v572_v44  ;;  %398 = vst.msk [vmem:[#allocation2] sm:$0xff] (%p391_p4), %vm397_vm1, %v718_v5 }
  0x1c   : > { %358 = vmatpush.bf16.msra.mxu1 %v576_v45  ;;  %371 = vmatpush.bf16.msra.mxu2 %v580_v46  ;;  %399 = vst.msk [vmem:[#allocation3] sm:$0xff] (%p391_p4), %vm397_vm1, %v718_v5 }
  0x1d   : > { %384 = vmatpush.bf16.msra.mxu3 %v584_v50 }
  0x1f   : > { %346 = vmatpush.bf16.msra.mxu0 %v556_v56 }
  0x20   : > { %359 = vmatpush.bf16.msra.mxu1 %v560_v57  ;;  %372 = vmatpush.bf16.msra.mxu2 %v564_v58 }
  0x21   : > { %385 = vmatpush.bf16.msra.mxu3 %v568_v59 }
  0x22   : > { %633 = vmatmul.msk.bf16.vlgmr.msra.gmra.mxu0 %vm335_vm0, %v214_v60 }
  0x23   : > { %634 = vmatmul.msk.bf16.vlgmr.msra.gmra.mxu1 %vm335_vm0, %v214_v60  ;;  %635 = vmatmul.msk.bf16.vlgmr.msra.gmra.mxu2 %vm335_vm0, %v214_v60 }
  0x24   : > { %636 = vmatmul.msk.bf16.vlgmr.msra.gmra.mxu3 %vm335_vm0, %v214_v60 }
  0x9f   : > { %v889_v61 = vpop.f32.mrf.mxu0 }
  0xa0   : > { %v891_v62 = vpop.f32.mrf.mxu1 }
  0xa6   : > { %v893_v63 = vpop.f32.mrf.mxu2 }
  0xa7   : > { %v895_v0 = vpop.f32.mrf.mxu3  ;;  %v350_v1 = vpop.f32.mrf.mxu0 }
  0xa8   : > { %v363_v2 = vpop.f32.mrf.mxu1 }
  0xab   : > { %396 = sbr.rel (!%p391_p4) target bundleno = 176 (0xb0), region = 40 }
  0xae   : > { %v376_v3 = vpop.f32.mrf.mxu2 }
  0xaf   : > { %v389_v4 = vpop.f32.mrf.mxu3 }
  0xb0 PF: > { %p638_p5 = scmp.ne.s32.totalorder %s708_s15, 0 }
  0xb2   : > { %402 = sbr.rel (%p638_p5) target bundleno = 316 (0x13c), region = 44 }
  0xb7   : > { %v404_v6 = vadd.f32 %v891_v62, %v889_v61  ;;  %v413_v7 = vmul.f32 %v889_v61, %v889_v61  ;;  %v414_v8 = vmul.f32 %v891_v62, %v891_v62  ;;  %v415_v10 = vmul.f32 %v893_v63, %v893_v63  ;;  %v403_v16 = vld [vmem:[#allocation2] sm:$0xff]  ;;  %v412_v19 = vld [vmem:[#allocation3] sm:$0xff] }
  0xb8   : > { %v416_v13 = vmul.f32 %v895_v0, %v895_v0  ;;  %vm410_vm2 = vcmask 7168  }
  0xb9   : > { %v405_v9 = vadd.f32 %v404_v6, %v893_v63  ;;  %v417_v11 = vadd.f32 %v414_v8, %v413_v7 }
  0xbb   : > { %v406_v12 = vadd.f32 %v405_v9, %v895_v0  ;;  %v418_v14 = vadd.f32 %v417_v11, %v415_v10 }
  0xbd   : > { %407 = vadd.xlane.f32.xlu0 %v406_v12  ;;  %v419_v15 = vadd.f32 %v418_v14, %v416_v13 }
  0xc5   : > { %420 = vadd.xlane.f32.xlu0 %v419_v15 }
 0x130   : > { %v408_v17 = vpop.xlane.xlu0 %407 }
 0x131   : > { %v409_v18 = vadd.f32 %v408_v17, %v403_v16 }
 0x133   : > { %411 = vst.msk [vmem:[#allocation2] sm:$0xff] %vm410_vm2, %v409_v18 }
 0x138   : > { %v421_v20 = vpop.xlane.xlu0 %420 }
 0x139   : > { %v422_v21 = vadd.f32 %v421_v20, %v412_v19 }
 0x13b   : > { %423 = vst.msk [vmem:[#allocation3] sm:$0xff] %vm410_vm2, %v422_v21 }
 0x13c PF: > { %425 = sbr.rel (!%p391_p4) target bundleno = 356 (0x164), region = 48  ;;  %v426_v22 = vld [vmem:[#allocation2] sm:$0xff] (%p391_p4)  ;;  %vm446_vm6 = vcmask (%p391_p4), 7168  }
 0x13d   : > { %v427_v24 = vmul.f32 (%p391_p4), 0.001953125, %v426_v22  ;;  %v444_v36 = vld [vmem:[%s942_s2] sm:$0xff] (%p391_p4) }
 0x13e   : > { %v448_v39 = vld [vmem:[%s943_s3] sm:$0xff] (%p391_p4) }
 0x13f   : > { %v430_v26 = vmul.f32 (%p391_p4), %v427_v24, %v427_v24 }
 0x142   : > { %v428_v23 = vld [vmem:[#allocation3] sm:$0xff] }
 0x143   : > { %v429_v25 = vmul.f32 0.001953125, %v428_v23 }
 0x145   : > { %v431_v27 = vsub.f32 %v429_v25, %v430_v26 }
 0x147   : > { %v432_v28 = vmax.f32 %v431_v27, 0.0 }
 0x149   : > { %v433_v29 = vadd.f32 1e-05, %v432_v28 }
 0x14b   : > { %691 = vrsqrt.f32 %v433_v29  ;;  %vm440_vm3 = vweird.f32 %v433_v29 }
 0x151   : > { %v692_v30 = vpop.eup %691 }
 0x152   : > { %v435_v31 = vmul.f32 %v692_v30, %v433_v29  ;;  %vm441_vm4 = vweird.f32 %v692_v30 }
 0x153   : > { %vm442_vm5 = vmor %vm440_vm3, %vm441_vm4 }
 0x154   : > { %v436_v32 = vmul.f32 %v692_v30, %v435_v31 }
 0x156   : > { %v437_v33 = vmul.f32 0.5, %v436_v32 }
 0x158   : > { %v438_v34 = vsub.f32 1.5, %v437_v33 }
 0x15a   : > { %v439_v35 = vmul.f32 %v692_v30, %v438_v34 }
 0x15c   : > { %v443_v37 = vsel %vm442_vm5, %v692_v30, %v439_v35 }
 0x15d   : > { %v445_v38 = vmul.f32 %v444_v36, %v443_v37 }
 0x15f   : > { %447 = vst.msk [vmem:[#allocation4] sm:$0xff] %vm446_vm6, %v445_v38  ;;  %v449_v40 = vmul.f32 %v445_v38, %v427_v24 }
 0x161   : > { %v450_v41 = vsub.f32 %v448_v39, %v449_v40 }
 0x163   : > { %451 = vst.msk [vmem:[#allocation5] sm:$0xff] %vm446_vm6, %v450_v41 }
 0x164 PF: > { %p639_p6 = scmp.ne.s32.totalorder %s708_s15, 1 }
 0x166   : > { %455 = sbr.rel (%p639_p6) target bundleno = 496 (0x1f0), region = 52 }
 0x16b   : > { %v456_v42 = vld [vmem:[#allocation4] sm:$0xff]  ;;  %v719_v43 = vmov 0   ;;  %v466_v44 = vld [vmem:[#allocation5] sm:$0xff] }
 0x16c   : > { %693 = vset.pattern.permute.xlu0 %v719_v43 }
 0x16d   : > { %459 = vperm.xlu0 %693, %v456_v42  }
 0x175   : > { %469 = vperm.xlu0 %693, %v466_v44  }
 0x1df   : > { %v460_v45 = vpop.permute.xlu0 %459 }
 0x1e0   : > { %v462_v46 = vmul.f32 %v460_v45, %v889_v61  ;;  %v463_v47 = vmul.f32 %v460_v45, %v891_v62  ;;  %v464_v48 = vmul.f32 %v460_v45, %v893_v63  ;;  %v465_v49 = vmul.f32 %v460_v45, %v895_v0 }
 0x1e7   : > { %v470_v50 = vpop.permute.xlu0 %469 }
 0x1e8   : > { %v472_v51 = vadd.f32 %v470_v50, %v462_v46  ;;  %v473_v52 = vadd.f32 %v470_v50, %v463_v47  ;;  %v474_v53 = vadd.f32 %v470_v50, %v464_v48  ;;  %v475_v54 = vadd.f32 %v470_v50, %v465_v49 }
 0x1ea   : > { %v476_v55 = vmax.f32 %v472_v51, 0.0  ;;  %v477_v56 = vmax.f32 %v473_v52, 0.0  ;;  %v478_v57 = vmax.f32 %v474_v53, 0.0  ;;  %v479_v58 = vmax.f32 %v475_v54, 0.0 }
 0x1ec   : > { %v480_v59 = vpack.c.bf16 %v477_v56, %v476_v55  ;;  %v481_v60 = vpack.c.bf16 %v479_v58, %v478_v57 }
 0x1ee   : > { %482 = vst [vmem:[%s944_s4] sm:$0xff] %v480_v59 }
 0x1ef   : > { %483 = vst [vmem:[%s944_s4 + $0x8] sm:$0xff] %v481_v60 }
 0x1f0 PF: > { %s14_s17 = sadd.s32 1, %s716_s17   ;;  %s945_s15 = smov %s712_s16 }
 0x1f1   : > { %p11_p7 = scmp.ge.s32.totalorder %s14_s17, 4   ;;  %s946_s16 = smov %s948_s18 }
 0x1f3   :  { %13 = sbr.rel (!%p11_p7) target bundleno = 2 (0x2), region = 82 }

// kernel: unet_old_forward.16
= control target key start
LH: loop header
LB: loop body
LE: loop exit
PB: predicated region body
PF: predicated region fallthrough
CT: control target
= control target key end

     0   :  { %s516_s15 = smov 0   ;;  %s518_s16 = smov 0   ;;  %s579_s0 = inlined_call_operand.vmem [shape: bf16[80,128], index: 0, kind: input, shape index: {}]   ;;  %s580_s1 = inlined_call_operand.vmem [shape: bf16[8,80], index: 1, kind: input, shape index: {}]   ;;  %s581_s2 = inlined_call_operand.vmem [shape: f32[8,1], index: 2, kind: input, shape index: {}]   ;;  %s582_s3 = inlined_call_operand.vmem [shape: f32[8,1], index: 3, kind: input, shape index: {}]   ;;  %s583_s4 = inlined_call_operand.vmem [shape: bf16[8,128], index: 4, kind: output, shape index: {}]  }
   0x1   :  { %s520_s17 = smov 0  }
   0x2 LB: > { %s26_s18 = sadd.s32 1, %s483_s16  ;;  %p402_p0 = scmp.ge.s32.totalorder %s487_s17, 1  ;;  %s487_s17 = sphi %s520_s17, %s14_s17   ;;  %s483_s16 = sphi %s518_s16, %s585_s16   ;;  %s479_s15 = sphi %s516_s15, %s584_s15  }
   0x3   : > { %p28_p1 = scmp.ge.s32.totalorder %s26_s18, 2  ;;  %p173_p2 = scmp.lt.s32.totalorder %s487_s17, 3 }
   0x5   : > { %s587_s18 = smov (%p28_p1, %s26_s18), 0  ;;  %p174_p3 = pnand %p402_p0, %p173_p2 }
   0x6   : > { %p264_p4 = scmp.eq.s32.totalorder (!%p174_p3), %s479_s15, 0 }
   0x7   : > { %177 = sbr.rel (%p174_p3) target bundleno = 479 (0x1df), region = 36 }
   0xc   : > { %v434_v0 = vld [vmem:[%s579_s0 + $0x20] sm:$0xff]  ;;  %v433_v1 = vld [vmem:[%s579_s0 + $0x18] sm:$0xff]  ;;  %v432_v2 = vld [vmem:[%s579_s0 + $0x10] sm:$0xff]  ;;  %vm247_vm0 = vcmask 654336   ;;  %vm270_vm1 = vcmask (%p264_p4), 7168   ;;  %v489_v8 = vmov (%p264_p4), 0.0  }
   0xd   : > { %254 = vmatpush.bf16.msra.mxu0 %v434_v0  ;;  %v431_v3 = vld [vmem:[%s579_s0 + $0x8] sm:$0xff]  ;;  %v430_v4 = vld [vmem:[%s579_s0] sm:$0xff]  ;;  %271 = vst.msk [vmem:[#allocation2] sm:$0xff] (%p264_p4), %vm270_vm1, %v489_v8 }
   0xe   : > { %v206_v5 = vld [vmem:[%s580_s1] sm:$0xf]  ;;  %272 = vst.msk [vmem:[#allocation3] sm:$0xff] (%p264_p4), %vm270_vm1, %v489_v8 }
  0x11   : > { %255 = vmatpush.bf16.msra.mxu0 %v433_v1 }
  0x15   : > { %256 = vmatpush.bf16.msra.mxu0 %v432_v2 }
  0x19   : > { %257 = vmatpush.bf16.msra.mxu0 %v431_v3 }
  0x1d   : > { %258 = vmatpush.bf16.msra.mxu0 %v430_v4 }
  0x20   : > { %423 = vmatmul.msk.bf16.vlgmr.msra.gmra.mxu0 %vm247_vm0, %v206_v5 }
  0x9d   : > { %v260_v6 = vpop.f32.mrf.mxu0 }
  0xa1   : > { %269 = sbr.rel (!%p264_p4) target bundleno = 166 (0xa6), region = 40 }
  0xa5   : > { %v262_v7 = vpop.f32.mrf.mxu0 }
  0xa6 PF: > { %p425_p5 = scmp.ne.s32.totalorder %s479_s15, 0 }
  0xa8   : > { %275 = sbr.rel (%p425_p5) target bundleno = 300 (0x12c), region = 44 }
  0xad   : > { %277 = vadd.xlane.f32.xlu0 %v260_v6  ;;  %v283_v9 = vmul.f32 %v260_v6, %v260_v6  ;;  %v276_v10 = vld [vmem:[#allocation2] sm:$0xff]  ;;  %vm280_vm2 = vcmask 7168   ;;  %v282_v13 = vld [vmem:[#allocation3] sm:$0xff] }
  0xb5   : > { %284 = vadd.xlane.f32.xlu0 %v283_v9 }
 0x120   : > { %v278_v11 = vpop.xlane.xlu0 %277 }
 0x121   : > { %v279_v12 = vadd.f32 %v278_v11, %v276_v10 }
 0x123   : > { %281 = vst.msk [vmem:[#allocation2] sm:$0xff] %vm280_vm2, %v279_v12 }
 0x128   : > { %v285_v14 = vpop.xlane.xlu0 %284 }
 0x129   : > { %v286_v15 = vadd.f32 %v285_v14, %v282_v13 }
 0x12b   : > { %287 = vst.msk [vmem:[#allocation3] sm:$0xff] %vm280_vm2, %v286_v15 }
 0x12c PF: > { %289 = sbr.rel (!%p264_p4) target bundleno = 340 (0x154), region = 48  ;;  %v290_v16 = vld [vmem:[#allocation2] sm:$0xff] (%p264_p4)  ;;  %vm310_vm6 = vcmask (%p264_p4), 7168  }
 0x12d   : > { %v291_v18 = vmul.f32 (%p264_p4), 0.0078125, %v290_v16  ;;  %v308_v30 = vld [vmem:[%s581_s2] sm:$0xff] (%p264_p4) }
 0x12e   : > { %v312_v33 = vld [vmem:[%s582_s3] sm:$0xff] (%p264_p4) }
 0x12f   : > { %v294_v20 = vmul.f32 (%p264_p4), %v291_v18, %v291_v18 }
 0x132   : > { %v292_v17 = vld [vmem:[#allocation3] sm:$0xff] }
 0x133   : > { %v293_v19 = vmul.f32 0.0078125, %v292_v17 }
 0x135   : > { %v295_v21 = vsub.f32 %v293_v19, %v294_v20 }
 0x137   : > { %v296_v22 = vmax.f32 %v295_v21, 0.0 }
 0x139   : > { %v297_v23 = vadd.f32 1e-05, %v296_v22 }
 0x13b   : > { %462 = vrsqrt.f32 %v297_v23  ;;  %vm304_vm3 = vweird.f32 %v297_v23 }
 0x141   : > { %v463_v24 = vpop.eup %462 }
 0x142   : > { %v299_v25 = vmul.f32 %v463_v24, %v297_v23  ;;  %vm305_vm4 = vweird.f32 %v463_v24 }
 0x143   : > { %vm306_vm5 = vmor %vm304_vm3, %vm305_vm4 }
 0x144   : > { %v300_v26 = vmul.f32 %v463_v24, %v299_v25 }
 0x146   : > { %v301_v27 = vmul.f32 0.5, %v300_v26 }
 0x148   : > { %v302_v28 = vsub.f32 1.5, %v301_v27 }
 0x14a   : > { %v303_v29 = vmul.f32 %v463_v24, %v302_v28 }
 0x14c   : > { %v307_v31 = vsel %vm306_vm5, %v463_v24, %v303_v29 }
 0x14d   : > { %v309_v32 = vmul.f32 %v308_v30, %v307_v31 }
 0x14f   : > { %311 = vst.msk [vmem:[#allocation4] sm:$0xff] %vm310_vm6, %v309_v32  ;;  %v313_v34 = vmul.f32 %v309_v32, %v291_v18 }
 0x151   : > { %v314_v35 = vsub.f32 %v312_v33, %v313_v34 }
 0x153   : > { %315 = vst.msk [vmem:[#allocation5] sm:$0xff] %vm310_vm6, %v314_v35 }
 0x154 PF: > { %p426_p6 = scmp.ne.s32.totalorder %s479_s15, 1 }
 0x156   : > { %319 = sbr.rel (%p426_p6) target bundleno = 479 (0x1df), region = 52 }
 0x15b   : > { %v320_v36 = vld [vmem:[#allocation4] sm:$0xff]  ;;  %v490_v37 = vmov 0   ;;  %v327_v38 = vld [vmem:[#allocation5] sm:$0xff] }
 0x15c   : > { %464 = vset.pattern.permute.xlu0 %v490_v37 }
 0x15d   : > { %323 = vperm.xlu0 %464, %v320_v36  }
 0x165   : > { %330 = vperm.xlu0 %464, %v327_v38  }
 0x1cf   : > { %v324_v39 = vpop.permute.xlu0 %323 }
 0x1d0   : > { %v326_v40 = vmul.f32 %v324_v39, %v260_v6 }
 0x1d7   : > { %v331_v41 = vpop.permute.xlu0 %330 }
 0x1d8   : > { %v333_v42 = vadd.f32 %v331_v41, %v326_v40 }
 0x1da   : > { %v334_v43 = vmax.f32 %v333_v42, 0.0 }
 0x1dc   : > { %v335_v44 = vpack.c.bf16 %v334_v43, %v334_v43 }
 0x1de   : > { %336 = vst [vmem:[%s583_s4] sm:$0xf] %v335_v44 }
 0x1df PF: > { %s14_s17 = sadd.s32 1, %s487_s17   ;;  %s584_s15 = smov %s483_s16 }
 0x1e0   : > { %p11_p7 = scmp.ge.s32.totalorder %s14_s17, 4   ;;  %s585_s16 = smov %s587_s18 }
 0x1e2   :  { %13 = sbr.rel (!%p11_p7) target bundleno = 2 (0x2), region = 82 }

// kernel: unet_old_forward.18
= control target key start
LH: loop header
LB: loop body
LE: loop exit
PB: predicated region body
PF: predicated region fallthrough
CT: control target
= control target key end

     0   :  { %s516_s15 = smov 0   ;;  %s518_s16 = smov 0   ;;  %s579_s0 = inlined_call_operand.vmem [shape: bf16[80,128], index: 0, kind: input, shape index: {}]   ;;  %s580_s1 = inlined_call_operand.vmem [shape: bf16[8,80], index: 1, kind: input, shape index: {}]   ;;  %s581_s2 = inlined_call_operand.vmem [shape: f32[8,1], index: 2, kind: input, shape index: {}]   ;;  %s582_s3 = inlined_call_operand.vmem [shape: f32[8,1], index: 3, kind: input, shape index: {}]   ;;  %s583_s4 = inlined_call_operand.vmem [shape: bf16[8,128], index: 4, kind: output, shape index: {}]  }
   0x1   :  { %s520_s17 = smov 0  }
   0x2 LB: > { %s26_s18 = sadd.s32 1, %s483_s16  ;;  %p402_p0 = scmp.ge.s32.totalorder %s487_s17, 1  ;;  %s487_s17 = sphi %s520_s17, %s14_s17   ;;  %s483_s16 = sphi %s518_s16, %s585_s16   ;;  %s479_s15 = sphi %s516_s15, %s584_s15  }
   0x3   : > { %p28_p1 = scmp.ge.s32.totalorder %s26_s18, 2  ;;  %p173_p2 = scmp.lt.s32.totalorder %s487_s17, 3 }
   0x5   : > { %s587_s18 = smov (%p28_p1, %s26_s18), 0  ;;  %p174_p3 = pnand %p402_p0, %p173_p2 }
   0x6   : > { %p264_p4 = scmp.eq.s32.totalorder (!%p174_p3), %s479_s15, 0 }
   0x7   : > { %177 = sbr.rel (%p174_p3) target bundleno = 479 (0x1df), region = 36 }
   0xc   : > { %v434_v0 = vld [vmem:[%s579_s0 + $0x20] sm:$0xff]  ;;  %v433_v1 = vld [vmem:[%s579_s0 + $0x18] sm:$0xff]  ;;  %v432_v2 = vld [vmem:[%s579_s0 + $0x10] sm:$0xff]  ;;  %vm247_vm0 = vcmask 654336   ;;  %vm270_vm1 = vcmask (%p264_p4), 7168   ;;  %v489_v8 = vmov (%p264_p4), 0.0  }
   0xd   : > { %254 = vmatpush.bf16.msra.mxu0 %v434_v0  ;;  %v431_v3 = vld [vmem:[%s579_s0 + $0x8] sm:$0xff]  ;;  %v430_v4 = vld [vmem:[%s579_s0] sm:$0xff]  ;;  %271 = vst.msk [vmem:[#allocation2] sm:$0xff] (%p264_p4), %vm270_vm1, %v489_v8 }
   0xe   : > { %v206_v5 = vld [vmem:[%s580_s1] sm:$0xf]  ;;  %272 = vst.msk [vmem:[#allocation3] sm:$0xff] (%p264_p4), %vm270_vm1, %v489_v8 }
  0x11   : > { %255 = vmatpush.bf16.msra.mxu0 %v433_v1 }
  0x15   : > { %256 = vmatpush.bf16.msra.mxu0 %v432_v2 }
  0x19   : > { %257 = vmatpush.bf16.msra.mxu0 %v431_v3 }
  0x1d   : > { %258 = vmatpush.bf16.msra.mxu0 %v430_v4 }
  0x20   : > { %423 = vmatmul.msk.bf16.vlgmr.msra.gmra.mxu0 %vm247_vm0, %v206_v5 }
  0x9d   : > { %v260_v6 = vpop.f32.mrf.mxu0 }
  0xa1   : > { %269 = sbr.rel (!%p264_p4) target bundleno = 166 (0xa6), region = 40 }
  0xa5   : > { %v262_v7 = vpop.f32.mrf.mxu0 }
  0xa6 PF: > { %p425_p5 = scmp.ne.s32.totalorder %s479_s15, 0 }
  0xa8   : > { %275 = sbr.rel (%p425_p5) target bundleno = 300 (0x12c), region = 44 }
  0xad   : > { %277 = vadd.xlane.f32.xlu0 %v260_v6  ;;  %v283_v9 = vmul.f32 %v260_v6, %v260_v6  ;;  %v276_v10 = vld [vmem:[#allocation2] sm:$0xff]  ;;  %vm280_vm2 = vcmask 7168   ;;  %v282_v13 = vld [vmem:[#allocation3] sm:$0xff] }
  0xb5   : > { %284 = vadd.xlane.f32.xlu0 %v283_v9 }
 0x120   : > { %v278_v11 = vpop.xlane.xlu0 %277 }
 0x121   : > { %v279_v12 = vadd.f32 %v278_v11, %v276_v10 }
 0x123   : > { %281 = vst.msk [vmem:[#allocation2] sm:$0xff] %vm280_vm2, %v279_v12 }
 0x128   : > { %v285_v14 = vpop.xlane.xlu0 %284 }
 0x129   : > { %v286_v15 = vadd.f32 %v285_v14, %v282_v13 }
 0x12b   : > { %287 = vst.msk [vmem:[#allocation3] sm:$0xff] %vm280_vm2, %v286_v15 }
 0x12c PF: > { %289 = sbr.rel (!%p264_p4) target bundleno = 340 (0x154), region = 48  ;;  %v290_v16 = vld [vmem:[#allocation2] sm:$0xff] (%p264_p4)  ;;  %vm310_vm6 = vcmask (%p264_p4), 7168  }
 0x12d   : > { %v291_v18 = vmul.f32 (%p264_p4), 0.03125, %v290_v16  ;;  %v308_v30 = vld [vmem:[%s581_s2] sm:$0xff] (%p264_p4) }
 0x12e   : > { %v312_v33 = vld [vmem:[%s582_s3] sm:$0xff] (%p264_p4) }
 0x12f   : > { %v294_v20 = vmul.f32 (%p264_p4), %v291_v18, %v291_v18 }
 0x132   : > { %v292_v17 = vld [vmem:[#allocation3] sm:$0xff] }
 0x133   : > { %v293_v19 = vmul.f32 0.03125, %v292_v17 }
 0x135   : > { %v295_v21 = vsub.f32 %v293_v19, %v294_v20 }
 0x137   : > { %v296_v22 = vmax.f32 %v295_v21, 0.0 }
 0x139   : > { %v297_v23 = vadd.f32 1e-05, %v296_v22 }
 0x13b   : > { %462 = vrsqrt.f32 %v297_v23  ;;  %vm304_vm3 = vweird.f32 %v297_v23 }
 0x141   : > { %v463_v24 = vpop.eup %462 }
 0x142   : > { %v299_v25 = vmul.f32 %v463_v24, %v297_v23  ;;  %vm305_vm4 = vweird.f32 %v463_v24 }
 0x143   : > { %vm306_vm5 = vmor %vm304_vm3, %vm305_vm4 }
 0x144   : > { %v300_v26 = vmul.f32 %v463_v24, %v299_v25 }
 0x146   : > { %v301_v27 = vmul.f32 0.5, %v300_v26 }
 0x148   : > { %v302_v28 = vsub.f32 1.5, %v301_v27 }
 0x14a   : > { %v303_v29 = vmul.f32 %v463_v24, %v302_v28 }
 0x14c   : > { %v307_v31 = vsel %vm306_vm5, %v463_v24, %v303_v29 }
 0x14d   : > { %v309_v32 = vmul.f32 %v308_v30, %v307_v31 }
 0x14f   : > { %311 = vst.msk [vmem:[#allocation4] sm:$0xff] %vm310_vm6, %v309_v32  ;;  %v313_v34 = vmul.f32 %v309_v32, %v291_v18 }
 0x151   : > { %v314_v35 = vsub.f32 %v312_v33, %v313_v34 }
 0x153   : > { %315 = vst.msk [vmem:[#allocation5] sm:$0xff] %vm310_vm6, %v314_v35 }
 0x154 PF: > { %p426_p6 = scmp.ne.s32.totalorder %s479_s15, 1 }
 0x156   : > { %319 = sbr.rel (%p426_p6) target bundleno = 479 (0x1df), region = 52 }
 0x15b   : > { %v320_v36 = vld [vmem:[#allocation4] sm:$0xff]  ;;  %v490_v37 = vmov 0   ;;  %v327_v38 = vld [vmem:[#allocation5] sm:$0xff] }
 0x15c   : > { %464 = vset.pattern.permute.xlu0 %v490_v37 }
 0x15d   : > { %323 = vperm.xlu0 %464, %v320_v36  }
 0x165   : > { %330 = vperm.xlu0 %464, %v327_v38  }
 0x1cf   : > { %v324_v39 = vpop.permute.xlu0 %323 }
 0x1d0   : > { %v326_v40 = vmul.f32 %v324_v39, %v260_v6 }
 0x1d7   : > { %v331_v41 = vpop.permute.xlu0 %330 }
 0x1d8   : > { %v333_v42 = vadd.f32 %v331_v41, %v326_v40 }
 0x1da   : > { %v334_v43 = vmax.f32 %v333_v42, 0.0 }
 0x1dc   : > { %v335_v44 = vpack.c.bf16 %v334_v43, %v334_v43 }
 0x1de   : > { %336 = vst [vmem:[%s583_s4] sm:$0xf] %v335_v44 }
 0x1df PF: > { %s14_s17 = sadd.s32 1, %s487_s17   ;;  %s584_s15 = smov %s483_s16 }
 0x1e0   : > { %p11_p7 = scmp.ge.s32.totalorder %s14_s17, 4   ;;  %s585_s16 = smov %s587_s18 }
 0x1e2   :  { %13 = sbr.rel (!%p11_p7) target bundleno = 2 (0x2), region = 82 }

// kernel: unet_old_forward.20
= control target key start
LH: loop header
LB: loop body
LE: loop exit
PB: predicated region body
PF: predicated region fallthrough
CT: control target
= control target key end

     0   :  { %s516_s15 = smov 0   ;;  %s518_s16 = smov 0   ;;  %s579_s0 = inlined_call_operand.vmem [shape: bf16[80,128], index: 0, kind: input, shape index: {}]   ;;  %s580_s1 = inlined_call_operand.vmem [shape: bf16[8,80], index: 1, kind: input, shape index: {}]   ;;  %s581_s2 = inlined_call_operand.vmem [shape: f32[8,1], index: 2, kind: input, shape index: {}]   ;;  %s582_s3 = inlined_call_operand.vmem [shape: f32[8,1], index: 3, kind: input, shape index: {}]   ;;  %s583_s4 = inlined_call_operand.vmem [shape: bf16[8,128], index: 4, kind: output, shape index: {}]  }
   0x1   :  { %s520_s17 = smov 0  }
   0x2 LB: > { %s26_s18 = sadd.s32 1, %s483_s16  ;;  %p402_p0 = scmp.ge.s32.totalorder %s487_s17, 1  ;;  %s487_s17 = sphi %s520_s17, %s14_s17   ;;  %s483_s16 = sphi %s518_s16, %s585_s16   ;;  %s479_s15 = sphi %s516_s15, %s584_s15  }
   0x3   : > { %p28_p1 = scmp.ge.s32.totalorder %s26_s18, 2  ;;  %p173_p2 = scmp.lt.s32.totalorder %s487_s17, 3 }
   0x5   : > { %s587_s18 = smov (%p28_p1, %s26_s18), 0  ;;  %p174_p3 = pnand %p402_p0, %p173_p2 }
   0x6   : > { %p264_p4 = scmp.eq.s32.totalorder (!%p174_p3), %s479_s15, 0 }
   0x7   : > { %177 = sbr.rel (%p174_p3) target bundleno = 479 (0x1df), region = 36 }
   0xc   : > { %v434_v0 = vld [vmem:[%s579_s0 + $0x20] sm:$0xff]  ;;  %v433_v1 = vld [vmem:[%s579_s0 + $0x18] sm:$0xff]  ;;  %v432_v2 = vld [vmem:[%s579_s0 + $0x10] sm:$0xff]  ;;  %vm247_vm0 = vcmask 654336   ;;  %vm270_vm1 = vcmask (%p264_p4), 7168   ;;  %v489_v8 = vmov (%p264_p4), 0.0  }
   0xd   : > { %254 = vmatpush.bf16.msra.mxu0 %v434_v0  ;;  %v431_v3 = vld [vmem:[%s579_s0 + $0x8] sm:$0xff]  ;;  %v430_v4 = vld [vmem:[%s579_s0] sm:$0xff]  ;;  %271 = vst.msk [vmem:[#allocation2] sm:$0xff] (%p264_p4), %vm270_vm1, %v489_v8 }
   0xe   : > { %v206_v5 = vld [vmem:[%s580_s1] sm:$0xf]  ;;  %272 = vst.msk [vmem:[#allocation3] sm:$0xff] (%p264_p4), %vm270_vm1, %v489_v8 }
  0x11   : > { %255 = vmatpush.bf16.msra.mxu0 %v433_v1 }
  0x15   : > { %256 = vmatpush.bf16.msra.mxu0 %v432_v2 }
  0x19   : > { %257 = vmatpush.bf16.msra.mxu0 %v431_v3 }
  0x1d   : > { %258 = vmatpush.bf16.msra.mxu0 %v430_v4 }
  0x20   : > { %423 = vmatmul.msk.bf16.vlgmr.msra.gmra.mxu0 %vm247_vm0, %v206_v5 }
  0x9d   : > { %v260_v6 = vpop.f32.mrf.mxu0 }
  0xa1   : > { %269 = sbr.rel (!%p264_p4) target bundleno = 166 (0xa6), region = 40 }
  0xa5   : > { %v262_v7 = vpop.f32.mrf.mxu0 }
  0xa6 PF: > { %p425_p5 = scmp.ne.s32.totalorder %s479_s15, 0 }
  0xa8   : > { %275 = sbr.rel (%p425_p5) target bundleno = 300 (0x12c), region = 44 }
  0xad   : > { %277 = vadd.xlane.f32.xlu0 %v260_v6  ;;  %v283_v9 = vmul.f32 %v260_v6, %v260_v6  ;;  %v276_v10 = vld [vmem:[#allocation2] sm:$0xff]  ;;  %vm280_vm2 = vcmask 7168   ;;  %v282_v13 = vld [vmem:[#allocation3] sm:$0xff] }
  0xb5   : > { %284 = vadd.xlane.f32.xlu0 %v283_v9 }
 0x120   : > { %v278_v11 = vpop.xlane.xlu0 %277 }
 0x121   : > { %v279_v12 = vadd.f32 %v278_v11, %v276_v10 }
 0x123   : > { %281 = vst.msk [vmem:[#allocation2] sm:$0xff] %vm280_vm2, %v279_v12 }
 0x128   : > { %v285_v14 = vpop.xlane.xlu0 %284 }
 0x129   : > { %v286_v15 = vadd.f32 %v285_v14, %v282_v13 }
 0x12b   : > { %287 = vst.msk [vmem:[#allocation3] sm:$0xff] %vm280_vm2, %v286_v15 }
 0x12c PF: > { %289 = sbr.rel (!%p264_p4) target bundleno = 340 (0x154), region = 48  ;;  %v290_v16 = vld [vmem:[#allocation2] sm:$0xff] (%p264_p4)  ;;  %vm310_vm6 = vcmask (%p264_p4), 7168  }
 0x12d   : > { %v291_v18 = vmul.f32 (%p264_p4), 0.125, %v290_v16  ;;  %v308_v30 = vld [vmem:[%s581_s2] sm:$0xff] (%p264_p4) }
 0x12e   : > { %v312_v33 = vld [vmem:[%s582_s3] sm:$0xff] (%p264_p4) }
 0x12f   : > { %v294_v20 = vmul.f32 (%p264_p4), %v291_v18, %v291_v18 }
 0x132   : > { %v292_v17 = vld [vmem:[#allocation3] sm:$0xff] }
 0x133   : > { %v293_v19 = vmul.f32 0.125, %v292_v17 }
 0x135   : > { %v295_v21 = vsub.f32 %v293_v19, %v294_v20 }
 0x137   : > { %v296_v22 = vmax.f32 %v295_v21, 0.0 }
 0x139   : > { %v297_v23 = vadd.f32 1e-05, %v296_v22 }
 0x13b   : > { %462 = vrsqrt.f32 %v297_v23  ;;  %vm304_vm3 = vweird.f32 %v297_v23 }
 0x141   : > { %v463_v24 = vpop.eup %462 }
 0x142   : > { %v299_v25 = vmul.f32 %v463_v24, %v297_v23  ;;  %vm305_vm4 = vweird.f32 %v463_v24 }
 0x143   : > { %vm306_vm5 = vmor %vm304_vm3, %vm305_vm4 }
 0x144   : > { %v300_v26 = vmul.f32 %v463_v24, %v299_v25 }
 0x146   : > { %v301_v27 = vmul.f32 0.5, %v300_v26 }
 0x148   : > { %v302_v28 = vsub.f32 1.5, %v301_v27 }
 0x14a   : > { %v303_v29 = vmul.f32 %v463_v24, %v302_v28 }
 0x14c   : > { %v307_v31 = vsel %vm306_vm5, %v463_v24, %v303_v29 }
 0x14d   : > { %v309_v32 = vmul.f32 %v308_v30, %v307_v31 }
 0x14f   : > { %311 = vst.msk [vmem:[#allocation4] sm:$0xff] %vm310_vm6, %v309_v32  ;;  %v313_v34 = vmul.f32 %v309_v32, %v291_v18 }
 0x151   : > { %v314_v35 = vsub.f32 %v312_v33, %v313_v34 }
 0x153   : > { %315 = vst.msk [vmem:[#allocation5] sm:$0xff] %vm310_vm6, %v314_v35 }
 0x154 PF: > { %p426_p6 = scmp.ne.s32.totalorder %s479_s15, 1 }
 0x156   : > { %319 = sbr.rel (%p426_p6) target bundleno = 479 (0x1df), region = 52 }
 0x15b   : > { %v320_v36 = vld [vmem:[#allocation4] sm:$0xff]  ;;  %v490_v37 = vmov 0   ;;  %v327_v38 = vld [vmem:[#allocation5] sm:$0xff] }
 0x15c   : > { %464 = vset.pattern.permute.xlu0 %v490_v37 }
 0x15d   : > { %323 = vperm.xlu0 %464, %v320_v36  }
 0x165   : > { %330 = vperm.xlu0 %464, %v327_v38  }
 0x1cf   : > { %v324_v39 = vpop.permute.xlu0 %323 }
 0x1d0   : > { %v326_v40 = vmul.f32 %v324_v39, %v260_v6 }
 0x1d7   : > { %v331_v41 = vpop.permute.xlu0 %330 }
 0x1d8   : > { %v333_v42 = vadd.f32 %v331_v41, %v326_v40 }
 0x1da   : > { %v334_v43 = vmax.f32 %v333_v42, 0.0 }
 0x1dc   : > { %v335_v44 = vpack.c.bf16 %v334_v43, %v334_v43 }
 0x1de   : > { %336 = vst [vmem:[%s583_s4] sm:$0xf] %v335_v44 }
 0x1df PF: > { %s14_s17 = sadd.s32 1, %s487_s17   ;;  %s584_s15 = smov %s483_s16 }
 0x1e0   : > { %p11_p7 = scmp.ge.s32.totalorder %s14_s17, 4   ;;  %s585_s16 = smov %s587_s18 }
 0x1e2   :  { %13 = sbr.rel (!%p11_p7) target bundleno = 2 (0x2), region = 82 }

// kernel: unet_old_forward.22
= control target key start
LH: loop header
LB: loop body
LE: loop exit
PB: predicated region body
PF: predicated region fallthrough
CT: control target
= control target key end

     0   :  { %s587_s15 = smov 0   ;;  %s589_s16 = smov 0   ;;  %s662_s0 = inlined_call_operand.vmem [shape: bf16[144,128], index: 0, kind: input, shape index: {}]   ;;  %s663_s1 = inlined_call_operand.vmem [shape: bf16[8,144], index: 1, kind: input, shape index: {}]   ;;  %s664_s2 = inlined_call_operand.vmem [shape: f32[8,1], index: 2, kind: input, shape index: {}]   ;;  %s665_s3 = inlined_call_operand.vmem [shape: f32[8,1], index: 3, kind: input, shape index: {}]   ;;  %s666_s4 = inlined_call_operand.vmem [shape: bf16[8,128], index: 4, kind: output, shape index: {}]  }
   0x1   :  { %s591_s17 = smov 0  }
   0x2 LB: > { %s26_s18 = sadd.s32 1, %s554_s16  ;;  %p453_p0 = scmp.ge.s32.totalorder %s558_s17, 1  ;;  %s558_s17 = sphi %s591_s17, %s14_s17   ;;  %s554_s16 = sphi %s589_s16, %s668_s16   ;;  %s550_s15 = sphi %s587_s15, %s667_s15  }
   0x3   : > { %p28_p1 = scmp.ge.s32.totalorder %s26_s18, 2  ;;  %p173_p2 = scmp.lt.s32.totalorder %s558_s17, 3 }
   0x5   : > { %s670_s18 = smov (%p28_p1, %s26_s18), 0  ;;  %p174_p3 = pnand %p453_p0, %p173_p2 }
   0x6   : > { %p315_p4 = scmp.eq.s32.totalorder (!%p174_p3), %s550_s15, 0 }
   0x7   : > { %177 = sbr.rel (%p174_p3) target bundleno = 491 (0x1eb), region = 36 }
   0xc   : > { %v504_v0 = vld [vmem:[%s662_s0 + $0x38] sm:$0xff]  ;;  %v503_v1 = vld [vmem:[%s662_s0 + $0x30] sm:$0xff]  ;;  %v505_v2 = vld [vmem:[%s662_s0 + $0x40] sm:$0xff]  ;;  %vm285_vm0 = vcmask 130048   ;;  %vm321_vm1 = vcmask (%p315_p4), 7168   ;;  %v560_v19 = vmov (%p315_p4), 0.0  }
   0xd   : > { %289 = vmatpush.bf16.msra.mxu0 %v504_v0  ;;  %v206_v3 = vld [vmem:[%s663_s1] sm:$0xff]  ;;  %309 = vmatpush.bf16.msra.mxu1 %v505_v2  ;;  %v502_v6 = vld [vmem:[%s662_s0 + $0x28] sm:$0xff]  ;;  %v500_v8 = vld [vmem:[%s662_s0 + $0x18] sm:$0xff]  ;;  %322 = vst.msk [vmem:[#allocation2] sm:$0xff] (%p315_p4), %vm321_vm1, %v560_v19 }
   0xe   : > { %v227_v4 = vunpack.c.h.b16 %v206_v3  ;;  %v501_v7 = vld [vmem:[%s662_s0 + $0x20] sm:$0xff]  ;;  %v499_v9 = vld [vmem:[%s662_s0 + $0x10] sm:$0xff]  ;;  %v498_v10 = vld [vmem:[%s662_s0 + $0x8] sm:$0xff]  ;;  %v226_v11 = vunpack.c.l.b16 %v206_v3  ;;  %323 = vst.msk [vmem:[#allocation3] sm:$0xff] (%p315_p4), %vm321_vm1, %v560_v19 }
   0xf   : > { %v497_v12 = vld [vmem:[%s662_s0] sm:$0xff] }
  0x10   : > { %v229_v5 = vpack.c.b16 %v227_v4, %v227_v4  ;;  %v228_v13 = vpack.c.b16 %v226_v11, %v226_v11 }
  0x11   : > { %290 = vmatpush.bf16.msra.mxu0 %v503_v1 }
  0x12   : > { %490 = vmatmul.msk.bf16.vlgmr.msra.gmra.mxu1 %vm285_vm0, %v229_v5 }
  0x15   : > { %291 = vmatpush.bf16.msra.mxu0 %v502_v6 }
  0x19   : > { %292 = vmatpush.bf16.msra.mxu0 %v501_v7 }
  0x1d   : > { %293 = vmatpush.bf16.msra.mxu0 %v500_v8 }
  0x21   : > { %294 = vmatpush.bf16.msra.mxu0 %v499_v9 }
  0x25   : > { %295 = vmatpush.bf16.msra.mxu0 %v498_v10 }
  0x29   : > { %296 = vmatpush.bf16.msra.mxu0 %v497_v12 }
  0x2c   : > { %297 = vmatmul.bf16.vlgmr.msra.gmra.mxu0 %v228_v13 }
  0x8f   : > { %v311_v14 = vpop.f32.mrf.mxu1 }
  0x97   : > { %v313_v15 = vpop.f32.mrf.mxu1 }
  0xa9   : > { %v298_v16 = vpop.f32.mrf.mxu0 }
  0xaa   : > { %v312_v17 = vadd.f32 %v311_v14, %v298_v16 }
  0xad   : > { %320 = sbr.rel (!%p315_p4) target bundleno = 178 (0xb2), region = 40 }
  0xb1   : > { %v300_v18 = vpop.f32.mrf.mxu0 }
  0xb2 PF: > { %p492_p5 = scmp.ne.s32.totalorder %s550_s15, 0 }
  0xb4   : > { %326 = sbr.rel (%p492_p5) target bundleno = 312 (0x138), region = 44 }
  0xb9   : > { %328 = vadd.xlane.f32.xlu0 %v312_v17  ;;  %v334_v20 = vmul.f32 %v312_v17, %v312_v17  ;;  %v327_v21 = vld [vmem:[#allocation2] sm:$0xff]  ;;  %vm331_vm2 = vcmask 7168   ;;  %v333_v24 = vld [vmem:[#allocation3] sm:$0xff] }
  0xc1   : > { %335 = vadd.xlane.f32.xlu0 %v334_v20 }
 0x12c   : > { %v329_v22 = vpop.xlane.xlu0 %328 }
 0x12d   : > { %v330_v23 = vadd.f32 %v329_v22, %v327_v21 }
 0x12f   : > { %332 = vst.msk [vmem:[#allocation2] sm:$0xff] %vm331_vm2, %v330_v23 }
 0x134   : > { %v336_v25 = vpop.xlane.xlu0 %335 }
 0x135   : > { %v337_v26 = vadd.f32 %v336_v25, %v333_v24 }
 0x137   : > { %338 = vst.msk [vmem:[#allocation3] sm:$0xff] %vm331_vm2, %v337_v26 }
 0x138 PF: > { %340 = sbr.rel (!%p315_p4) target bundleno = 352 (0x160), region = 48  ;;  %v341_v27 = vld [vmem:[#allocation2] sm:$0xff] (%p315_p4)  ;;  %vm361_vm6 = vcmask (%p315_p4), 7168  }
 0x139   : > { %v342_v29 = vmul.f32 (%p315_p4), 0.03125, %v341_v27  ;;  %v359_v41 = vld [vmem:[%s664_s2] sm:$0xff] (%p315_p4) }
 0x13a   : > { %v363_v44 = vld [vmem:[%s665_s3] sm:$0xff] (%p315_p4) }
 0x13b   : > { %v345_v31 = vmul.f32 (%p315_p4), %v342_v29, %v342_v29 }
 0x13e   : > { %v343_v28 = vld [vmem:[#allocation3] sm:$0xff] }
 0x13f   : > { %v344_v30 = vmul.f32 0.03125, %v343_v28 }
 0x141   : > { %v346_v32 = vsub.f32 %v344_v30, %v345_v31 }
 0x143   : > { %v347_v33 = vmax.f32 %v346_v32, 0.0 }
 0x145   : > { %v348_v34 = vadd.f32 1e-05, %v347_v33 }
 0x147   : > { %533 = vrsqrt.f32 %v348_v34  ;;  %vm355_vm3 = vweird.f32 %v348_v34 }
 0x14d   : > { %v534_v35 = vpop.eup %533 }
 0x14e   : > { %v350_v36 = vmul.f32 %v534_v35, %v348_v34  ;;  %vm356_vm4 = vweird.f32 %v534_v35 }
 0x14f   : > { %vm357_vm5 = vmor %vm355_vm3, %vm356_vm4 }
 0x150   : > { %v351_v37 = vmul.f32 %v534_v35, %v350_v36 }
 0x152   : > { %v352_v38 = vmul.f32 0.5, %v351_v37 }
 0x154   : > { %v353_v39 = vsub.f32 1.5, %v352_v38 }
 0x156   : > { %v354_v40 = vmul.f32 %v534_v35, %v353_v39 }
 0x158   : > { %v358_v42 = vsel %vm357_vm5, %v534_v35, %v354_v40 }
 0x159   : > { %v360_v43 = vmul.f32 %v359_v41, %v358_v42 }
 0x15b   : > { %362 = vst.msk [vmem:[#allocation4] sm:$0xff] %vm361_vm6, %v360_v43  ;;  %v364_v45 = vmul.f32 %v360_v43, %v342_v29 }
 0x15d   : > { %v365_v46 = vsub.f32 %v363_v44, %v364_v45 }
 0x15f   : > { %366 = vst.msk [vmem:[#allocation5] sm:$0xff] %vm361_vm6, %v365_v46 }
 0x160 PF: > { %p493_p6 = scmp.ne.s32.totalorder %s550_s15, 1 }
 0x162   : > { %370 = sbr.rel (%p493_p6) target bundleno = 491 (0x1eb), region = 52 }
 0x167   : > { %v371_v47 = vld [vmem:[#allocation4] sm:$0xff]  ;;  %v561_v48 = vmov 0   ;;  %v378_v49 = vld [vmem:[#allocation5] sm:$0xff] }
 0x168   : > { %535 = vset.pattern.permute.xlu0 %v561_v48 }
 0x169   : > { %374 = vperm.xlu0 %535, %v371_v47  }
 0x171   : > { %381 = vperm.xlu0 %535, %v378_v49  }
 0x1db   : > { %v375_v50 = vpop.permute.xlu0 %374 }
 0x1dc   : > { %v377_v51 = vmul.f32 %v375_v50, %v312_v17 }
 0x1e3   : > { %v382_v52 = vpop.permute.xlu0 %381 }
 0x1e4   : > { %v384_v53 = vadd.f32 %v382_v52, %v377_v51 }
 0x1e6   : > { %v385_v54 = vmax.f32 %v384_v53, 0.0 }
 0x1e8   : > { %v386_v55 = vpack.c.bf16 %v385_v54, %v385_v54 }
 0x1ea   : > { %387 = vst [vmem:[%s666_s4] sm:$0xf] %v386_v55 }
 0x1eb PF: > { %s14_s17 = sadd.s32 1, %s558_s17   ;;  %s667_s15 = smov %s554_s16 }
 0x1ec   : > { %p11_p7 = scmp.ge.s32.totalorder %s14_s17, 4   ;;  %s668_s16 = smov %s670_s18 }
 0x1ee   :  { %13 = sbr.rel (!%p11_p7) target bundleno = 2 (0x2), region = 82 }

// kernel: unet_old_forward.24
= control target key start
LH: loop header
LB: loop body
LE: loop exit
PB: predicated region body
PF: predicated region fallthrough
CT: control target
= control target key end

     0   :  { %s587_s15 = smov 0   ;;  %s589_s16 = smov 0   ;;  %s662_s0 = inlined_call_operand.vmem [shape: bf16[144,128], index: 0, kind: input, shape index: {}]   ;;  %s663_s1 = inlined_call_operand.vmem [shape: bf16[8,144], index: 1, kind: input, shape index: {}]   ;;  %s664_s2 = inlined_call_operand.vmem [shape: f32[8,1], index: 2, kind: input, shape index: {}]   ;;  %s665_s3 = inlined_call_operand.vmem [shape: f32[8,1], index: 3, kind: input, shape index: {}]   ;;  %s666_s4 = inlined_call_operand.vmem [shape: bf16[8,128], index: 4, kind: output, shape index: {}]  }
   0x1   :  { %s591_s17 = smov 0  }
   0x2 LB: > { %s26_s18 = sadd.s32 1, %s554_s16  ;;  %p453_p0 = scmp.ge.s32.totalorder %s558_s17, 1  ;;  %s558_s17 = sphi %s591_s17, %s14_s17   ;;  %s554_s16 = sphi %s589_s16, %s668_s16   ;;  %s550_s15 = sphi %s587_s15, %s667_s15  }
   0x3   : > { %p28_p1 = scmp.ge.s32.totalorder %s26_s18, 2  ;;  %p173_p2 = scmp.lt.s32.totalorder %s558_s17, 3 }
   0x5   : > { %s670_s18 = smov (%p28_p1, %s26_s18), 0  ;;  %p174_p3 = pnand %p453_p0, %p173_p2 }
   0x6   : > { %p315_p4 = scmp.eq.s32.totalorder (!%p174_p3), %s550_s15, 0 }
   0x7   : > { %177 = sbr.rel (%p174_p3) target bundleno = 491 (0x1eb), region = 36 }
   0xc   : > { %v504_v0 = vld [vmem:[%s662_s0 + $0x38] sm:$0xff]  ;;  %v503_v1 = vld [vmem:[%s662_s0 + $0x30] sm:$0xff]  ;;  %v505_v2 = vld [vmem:[%s662_s0 + $0x40] sm:$0xff]  ;;  %vm285_vm0 = vcmask 130048   ;;  %vm321_vm1 = vcmask (%p315_p4), 7168   ;;  %v560_v19 = vmov (%p315_p4), 0.0  }
   0xd   : > { %289 = vmatpush.bf16.msra.mxu0 %v504_v0  ;;  %v206_v3 = vld [vmem:[%s663_s1] sm:$0xff]  ;;  %309 = vmatpush.bf16.msra.mxu1 %v505_v2  ;;  %v502_v6 = vld [vmem:[%s662_s0 + $0x28] sm:$0xff]  ;;  %v500_v8 = vld [vmem:[%s662_s0 + $0x18] sm:$0xff]  ;;  %322 = vst.msk [vmem:[#allocation2] sm:$0xff] (%p315_p4), %vm321_vm1, %v560_v19 }
   0xe   : > { %v227_v4 = vunpack.c.h.b16 %v206_v3  ;;  %v501_v7 = vld [vmem:[%s662_s0 + $0x20] sm:$0xff]  ;;  %v499_v9 = vld [vmem:[%s662_s0 + $0x10] sm:$0xff]  ;;  %v498_v10 = vld [vmem:[%s662_s0 + $0x8] sm:$0xff]  ;;  %v226_v11 = vunpack.c.l.b16 %v206_v3  ;;  %323 = vst.msk [vmem:[#allocation3] sm:$0xff] (%p315_p4), %vm321_vm1, %v560_v19 }
   0xf   : > { %v497_v12 = vld [vmem:[%s662_s0] sm:$0xff] }
  0x10   : > { %v229_v5 = vpack.c.b16 %v227_v4, %v227_v4  ;;  %v228_v13 = vpack.c.b16 %v226_v11, %v226_v11 }
  0x11   : > { %290 = vmatpush.bf16.msra.mxu0 %v503_v1 }
  0x12   : > { %490 = vmatmul.msk.bf16.vlgmr.msra.gmra.mxu1 %vm285_vm0, %v229_v5 }
  0x15   : > { %291 = vmatpush.bf16.msra.mxu0 %v502_v6 }
  0x19   : > { %292 = vmatpush.bf16.msra.mxu0 %v501_v7 }
  0x1d   : > { %293 = vmatpush.bf16.msra.mxu0 %v500_v8 }
  0x21   : > { %294 = vmatpush.bf16.msra.mxu0 %v499_v9 }
  0x25   : > { %295 = vmatpush.bf16.msra.mxu0 %v498_v10 }
  0x29   : > { %296 = vmatpush.bf16.msra.mxu0 %v497_v12 }
  0x2c   : > { %297 = vmatmul.bf16.vlgmr.msra.gmra.mxu0 %v228_v13 }
  0x8f   : > { %v311_v14 = vpop.f32.mrf.mxu1 }
  0x97   : > { %v313_v15 = vpop.f32.mrf.mxu1 }
  0xa9   : > { %v298_v16 = vpop.f32.mrf.mxu0 }
  0xaa   : > { %v312_v17 = vadd.f32 %v311_v14, %v298_v16 }
  0xad   : > { %320 = sbr.rel (!%p315_p4) target bundleno = 178 (0xb2), region = 40 }
  0xb1   : > { %v300_v18 = vpop.f32.mrf.mxu0 }
  0xb2 PF: > { %p492_p5 = scmp.ne.s32.totalorder %s550_s15, 0 }
  0xb4   : > { %326 = sbr.rel (%p492_p5) target bundleno = 312 (0x138), region = 44 }
  0xb9   : > { %328 = vadd.xlane.f32.xlu0 %v312_v17  ;;  %v334_v20 = vmul.f32 %v312_v17, %v312_v17  ;;  %v327_v21 = vld [vmem:[#allocation2] sm:$0xff]  ;;  %vm331_vm2 = vcmask 7168   ;;  %v333_v24 = vld [vmem:[#allocation3] sm:$0xff] }
  0xc1   : > { %335 = vadd.xlane.f32.xlu0 %v334_v20 }
 0x12c   : > { %v329_v22 = vpop.xlane.xlu0 %328 }
 0x12d   : > { %v330_v23 = vadd.f32 %v329_v22, %v327_v21 }
 0x12f   : > { %332 = vst.msk [vmem:[#allocation2] sm:$0xff] %vm331_vm2, %v330_v23 }
 0x134   : > { %v336_v25 = vpop.xlane.xlu0 %335 }
 0x135   : > { %v337_v26 = vadd.f32 %v336_v25, %v333_v24 }
 0x137   : > { %338 = vst.msk [vmem:[#allocation3] sm:$0xff] %vm331_vm2, %v337_v26 }
 0x138 PF: > { %340 = sbr.rel (!%p315_p4) target bundleno = 352 (0x160), region = 48  ;;  %v341_v27 = vld [vmem:[#allocation2] sm:$0xff] (%p315_p4)  ;;  %vm361_vm6 = vcmask (%p315_p4), 7168  }
 0x139   : > { %v342_v29 = vmul.f32 (%p315_p4), 0.0078125, %v341_v27  ;;  %v359_v41 = vld [vmem:[%s664_s2] sm:$0xff] (%p315_p4) }
 0x13a   : > { %v363_v44 = vld [vmem:[%s665_s3] sm:$0xff] (%p315_p4) }
 0x13b   : > { %v345_v31 = vmul.f32 (%p315_p4), %v342_v29, %v342_v29 }
 0x13e   : > { %v343_v28 = vld [vmem:[#allocation3] sm:$0xff] }
 0x13f   : > { %v344_v30 = vmul.f32 0.0078125, %v343_v28 }
 0x141   : > { %v346_v32 = vsub.f32 %v344_v30, %v345_v31 }
 0x143   : > { %v347_v33 = vmax.f32 %v346_v32, 0.0 }
 0x145   : > { %v348_v34 = vadd.f32 1e-05, %v347_v33 }
 0x147   : > { %533 = vrsqrt.f32 %v348_v34  ;;  %vm355_vm3 = vweird.f32 %v348_v34 }
 0x14d   : > { %v534_v35 = vpop.eup %533 }
 0x14e   : > { %v350_v36 = vmul.f32 %v534_v35, %v348_v34  ;;  %vm356_vm4 = vweird.f32 %v534_v35 }
 0x14f   : > { %vm357_vm5 = vmor %vm355_vm3, %vm356_vm4 }
 0x150   : > { %v351_v37 = vmul.f32 %v534_v35, %v350_v36 }
 0x152   : > { %v352_v38 = vmul.f32 0.5, %v351_v37 }
 0x154   : > { %v353_v39 = vsub.f32 1.5, %v352_v38 }
 0x156   : > { %v354_v40 = vmul.f32 %v534_v35, %v353_v39 }
 0x158   : > { %v358_v42 = vsel %vm357_vm5, %v534_v35, %v354_v40 }
 0x159   : > { %v360_v43 = vmul.f32 %v359_v41, %v358_v42 }
 0x15b   : > { %362 = vst.msk [vmem:[#allocation4] sm:$0xff] %vm361_vm6, %v360_v43  ;;  %v364_v45 = vmul.f32 %v360_v43, %v342_v29 }
 0x15d   : > { %v365_v46 = vsub.f32 %v363_v44, %v364_v45 }
 0x15f   : > { %366 = vst.msk [vmem:[#allocation5] sm:$0xff] %vm361_vm6, %v365_v46 }
 0x160 PF: > { %p493_p6 = scmp.ne.s32.totalorder %s550_s15, 1 }
 0x162   : > { %370 = sbr.rel (%p493_p6) target bundleno = 491 (0x1eb), region = 52 }
 0x167   : > { %v371_v47 = vld [vmem:[#allocation4] sm:$0xff]  ;;  %v561_v48 = vmov 0   ;;  %v378_v49 = vld [vmem:[#allocation5] sm:$0xff] }
 0x168   : > { %535 = vset.pattern.permute.xlu0 %v561_v48 }
 0x169   : > { %374 = vperm.xlu0 %535, %v371_v47  }
 0x171   : > { %381 = vperm.xlu0 %535, %v378_v49  }
 0x1db   : > { %v375_v50 = vpop.permute.xlu0 %374 }
 0x1dc   : > { %v377_v51 = vmul.f32 %v375_v50, %v312_v17 }
 0x1e3   : > { %v382_v52 = vpop.permute.xlu0 %381 }
 0x1e4   : > { %v384_v53 = vadd.f32 %v382_v52, %v377_v51 }
 0x1e6   : > { %v385_v54 = vmax.f32 %v384_v53, 0.0 }
 0x1e8   : > { %v386_v55 = vpack.c.bf16 %v385_v54, %v385_v54 }
 0x1ea   : > { %387 = vst [vmem:[%s666_s4] sm:$0xf] %v386_v55 }
 0x1eb PF: > { %s14_s17 = sadd.s32 1, %s558_s17   ;;  %s667_s15 = smov %s554_s16 }
 0x1ec   : > { %p11_p7 = scmp.ge.s32.totalorder %s14_s17, 4   ;;  %s668_s16 = smov %s670_s18 }
 0x1ee   :  { %13 = sbr.rel (!%p11_p7) target bundleno = 2 (0x2), region = 82 }

// kernel: unet_old_forward.26
= control target key start
LH: loop header
LB: loop body
LE: loop exit
PB: predicated region body
PF: predicated region fallthrough
CT: control target
= control target key end

     0   :  { %s979_s15 = smov 0   ;;  %s981_s16 = smov 0   ;;  %s1284_s0 = inlined_call_operand.vmem [shape: bf16[144,512], index: 0, kind: input, shape index: {}]   ;;  %s1285_s1 = inlined_call_operand.vmem [shape: bf16[8,144], index: 1, kind: input, shape index: {}]   ;;  %s1286_s2 = inlined_call_operand.vmem [shape: f32[8,1], index: 2, kind: input, shape index: {}]   ;;  %s1287_s3 = inlined_call_operand.vmem [shape: f32[8,1], index: 3, kind: input, shape index: {}]   ;;  %s1288_s4 = inlined_call_operand.vmem [shape: bf16[8,512], index: 4, kind: output, shape index: {}]  }
   0x1   :  { %s983_s17 = smov 0  }
   0x2 LB: > { %s26_s18 = sadd.s32 1, %s946_s16  ;;  %p706_p0 = scmp.ge.s32.totalorder %s950_s17, 1  ;;  %s950_s17 = sphi %s983_s17, %s14_s17   ;;  %s946_s16 = sphi %s981_s16, %s1290_s16   ;;  %s942_s15 = sphi %s979_s15, %s1289_s15  }
   0x3   : > { %p28_p1 = scmp.ge.s32.totalorder %s26_s18, 2  ;;  %p175_p2 = scmp.lt.s32.totalorder %s950_s17, 3 }
   0x5   : > { %s1292_s18 = smov (%p28_p1, %s26_s18), 0  ;;  %p176_p3 = pnand %p706_p0, %p175_p2 }
   0x6   : > { %p545_p4 = scmp.eq.s32.totalorder (!%p176_p3), %s942_s15, 0 }
   0x7   : > { %179 = sbr.rel (%p176_p3) target bundleno = 525 (0x20d), region = 36 }
   0xc   : > { %v821_v0 = vld [vmem:[%s1284_s0 + $0xe0] sm:$0xf]  ;;  %v892_v1 = vld [vmem:[%s1284_s0 + $0xec] sm:$0xf0]  ;;  %v890_v2 = vld [vmem:[%s1284_s0 + $0xe4] sm:$0xf] }
   0xd   : > { %v822_v3 = vor.u32 %v892_v1, %v821_v0  ;;  %v823_v4 = vld [vmem:[%s1284_s0 + $0xf0] sm:$0xf0]  ;;  %v805_v5 = vld [vmem:[%s1284_s0 + $0xc0] sm:$0xf]  ;;  %v888_v6 = vld [vmem:[%s1284_s0 + $0xcc] sm:$0xf0] }
   0xe   : > { %v826_v7 = vor.u32 %v890_v2, %v823_v4  ;;  %v886_v8 = vld [vmem:[%s1284_s0 + $0xc4] sm:$0xf]  ;;  %v807_v9 = vld [vmem:[%s1284_s0 + $0xd0] sm:$0xf0]  ;;  %v837_v10 = vld [vmem:[%s1284_s0 + $0x100] sm:$0xf]  ;;  %v806_v11 = vor.u32 %v888_v6, %v805_v5 }
   0xf   : > { %441 = vmatpush.bf16.msra.mxu0 %v822_v3  ;;  %v896_v12 = vld [vmem:[%s1284_s0 + $0x10c] sm:$0xf0]  ;;  %v829_v13 = vld [vmem:[%s1284_s0 + $0xe8] sm:$0xf]  ;;  %v893_v14 = vld [vmem:[%s1284_s0 + $0xf4] sm:$0xf0]  ;;  %v810_v15 = vor.u32 %v886_v8, %v807_v9 }
  0x10   : > { %467 = vmatpush.bf16.msra.mxu2 %v826_v7  ;;  %v838_v16 = vor.u32 %v896_v12, %v837_v10  ;;  %v830_v17 = vor.u32 %v893_v14, %v829_v13  ;;  %v845_v18 = vld [vmem:[%s1284_s0 + $0x108] sm:$0xf]  ;;  %v897_v19 = vld [vmem:[%s1284_s0 + $0x114] sm:$0xf0]  ;;  %v789_v20 = vld [vmem:[%s1284_s0 + $0xa0] sm:$0xf] }
  0x11   : > { %v846_v21 = vor.u32 %v897_v19, %v845_v18  ;;  %v884_v22 = vld [vmem:[%s1284_s0 + $0xac] sm:$0xf0]  ;;  %v882_v23 = vld [vmem:[%s1284_s0 + $0xa4] sm:$0xf]  ;;  %v791_v24 = vld [vmem:[%s1284_s0 + $0xb0] sm:$0xf0] }
  0x12   : > { %461 = vmatpush.bf16.msra.mxu1 %v838_v16  ;;  %v891_v25 = vld [vmem:[%s1284_s0 + $0xec] sm:$0xf]  ;;  %v831_v26 = vld [vmem:[%s1284_s0 + $0xf8] sm:$0xf0]  ;;  %v813_v27 = vld [vmem:[%s1284_s0 + $0xc8] sm:$0xf]  ;;  %v790_v28 = vor.u32 %v884_v22, %v789_v20  ;;  %v794_v33 = vor.u32 %v882_v23, %v791_v24 }
  0x13   : > { %442 = vmatpush.bf16.msra.mxu0 %v806_v11  ;;  %v834_v29 = vor.u32 %v891_v25, %v831_v26  ;;  %v889_v30 = vld [vmem:[%s1284_s0 + $0xd4] sm:$0xf0]  ;;  %v773_v31 = vld [vmem:[%s1284_s0 + $0x80] sm:$0xf]  ;;  %v880_v32 = vld [vmem:[%s1284_s0 + $0x8c] sm:$0xf0]  ;;  %513 = vmatpush.bf16.msra.mxu3 %v846_v21 }
  0x14   : > { %468 = vmatpush.bf16.msra.mxu2 %v810_v15  ;;  %v814_v34 = vor.u32 %v889_v30, %v813_v27  ;;  %v878_v35 = vld [vmem:[%s1284_s0 + $0x84] sm:$0xf]  ;;  %v775_v36 = vld [vmem:[%s1284_s0 + $0x90] sm:$0xf0]  ;;  %v887_v37 = vld [vmem:[%s1284_s0 + $0xcc] sm:$0xf]  ;;  %v774_v42 = vor.u32 %v880_v32, %v773_v31 }
  0x15   : > { %v815_v38 = vld [vmem:[%s1284_s0 + $0xd8] sm:$0xf0]  ;;  %v797_v39 = vld [vmem:[%s1284_s0 + $0xa8] sm:$0xf]  ;;  %v885_v40 = vld [vmem:[%s1284_s0 + $0xb4] sm:$0xf0]  ;;  %v778_v47 = vor.u32 %v878_v35, %v775_v36 }
  0x16   : > { %493 = vmatpush.bf16.msrb.mxu1 %v830_v17  ;;  %v818_v41 = vor.u32 %v887_v37, %v815_v38  ;;  %v798_v43 = vor.u32 %v885_v40, %v797_v39  ;;  %v757_v44 = vld [vmem:[%s1284_s0 + $0x60] sm:$0xf]  ;;  %v883_v45 = vld [vmem:[%s1284_s0 + $0xac] sm:$0xf]  ;;  %v799_v46 = vld [vmem:[%s1284_s0 + $0xb8] sm:$0xf0] }
  0x17   : > { %519 = vmatpush.bf16.msrb.mxu3 %v834_v29  ;;  %443 = vmatpush.bf16.msra.mxu0 %v790_v28  ;;  %v876_v48 = vld [vmem:[%s1284_s0 + $0x6c] sm:$0xf0]  ;;  %v781_v49 = vld [vmem:[%s1284_s0 + $0x88] sm:$0xf]  ;;  %v881_v50 = vld [vmem:[%s1284_s0 + $0x94] sm:$0xf0]  ;;  %v802_v53 = vor.u32 %v883_v45, %v799_v46 }
  0x18   : > { %469 = vmatpush.bf16.msra.mxu2 %v794_v33  ;;  %v874_v51 = vld [vmem:[%s1284_s0 + $0x64] sm:$0xf]  ;;  %v759_v52 = vld [vmem:[%s1284_s0 + $0x70] sm:$0xf0]  ;;  %v879_v54 = vld [vmem:[%s1284_s0 + $0x8c] sm:$0xf]  ;;  %v758_v57 = vor.u32 %v876_v48, %v757_v44  ;;  %v782_v58 = vor.u32 %v881_v50, %v781_v49 }
  0x19   : > { %v783_v55 = vld [vmem:[%s1284_s0 + $0x98] sm:$0xf0]  ;;  %v1122_v56 = vld [vmem:[%s1285_s1] sm:$0xff]  ;;  %v762_v61 = vor.u32 %v874_v51, %v759_v52  ;;  %v872_v62 = vld [vmem:[%s1284_s0 + $0x4c] sm:$0xf0]  ;;  %vm437_vm0 = vcmask 130048  }
  0x1a   : > { %494 = vmatpush.bf16.msrb.mxu1 %v814_v34  ;;  %v741_v59 = vld [vmem:[%s1284_s0 + $0x40] sm:$0xf]  ;;  %v253_v60 = vunpack.c.h.b16 %v1122_v56  ;;  %v765_v63 = vld [vmem:[%s1284_s0 + $0x68] sm:$0xf]  ;;  %v877_v0 = vld [vmem:[%s1284_s0 + $0x74] sm:$0xf0]  ;;  %v786_v3 = vor.u32 %v879_v54, %v783_v55  ;;  %v252_v32 = vunpack.c.l.b16 %v1122_v56 }
  0x1b   : > { %520 = vmatpush.bf16.msrb.mxu3 %v818_v41  ;;  %444 = vmatpush.bf16.msra.mxu0 %v774_v42  ;;  %v870_v1 = vld [vmem:[%s1284_s0 + $0x44] sm:$0xf]  ;;  %v743_v2 = vld [vmem:[%s1284_s0 + $0x50] sm:$0xf0]  ;;  %v875_v5 = vld [vmem:[%s1284_s0 + $0x6c] sm:$0xf]  ;;  %v742_v7 = vor.u32 %v872_v62, %v741_v59  ;;  %v766_v8 = vor.u32 %v877_v0, %v765_v63 }
  0x1c   : > { %470 = vmatpush.bf16.msra.mxu2 %v778_v47  ;;  %v1143_v4 = vpack.c.b16 %v253_v60, %v253_v60  ;;  %v767_v6 = vld [vmem:[%s1284_s0 + $0x78] sm:$0xf0]  ;;  %v725_v9 = vld [vmem:[%s1284_s0 + $0x20] sm:$0xf]  ;;  %v746_v10 = vor.u32 %v870_v1, %v743_v2  ;;  %v868_v11 = vld [vmem:[%s1284_s0 + $0x2c] sm:$0xf0]  ;;  %v254_v44 = vpack.c.b16 %v252_v32, %v252_v32 }
  0x1d   : > { %v749_v12 = vld [vmem:[%s1284_s0 + $0x48] sm:$0xf]  ;;  %v873_v13 = vld [vmem:[%s1284_s0 + $0x54] sm:$0xf0]  ;;  %v866_v14 = vld [vmem:[%s1284_s0 + $0x24] sm:$0xf]  ;;  %v770_v16 = vor.u32 %v875_v5, %v767_v6  ;;  %v726_v19 = vor.u32 %v868_v11, %v725_v9 }
  0x1e   : > { %495 = vmatpush.bf16.msrb.mxu1 %v798_v43  ;;  %v727_v15 = vld [vmem:[%s1284_s0 + $0x30] sm:$0xf0]  ;;  %853 = vmatmul.msk.bf16.vlgmr.msra.gmra.mxu3 %vm437_vm0, %v1143_v4  ;;  %v871_v17 = vld [vmem:[%s1284_s0 + $0x4c] sm:$0xf]  ;;  %v751_v18 = vld [vmem:[%s1284_s0 + $0x58] sm:$0xf0]  ;;  %v750_v20 = vor.u32 %v873_v13, %v749_v12 }
  0x1f   : > { %521 = vmatpush.bf16.msrb.mxu3 %v802_v53  ;;  %445 = vmatpush.bf16.msra.mxu0 %v758_v57  ;;  %v709_v21 = vld [vmem:[%s1284_s0] sm:$0xf]  ;;  %v864_v22 = vld [vmem:[%s1284_s0 + $0xc] sm:$0xf0]  ;;  %v862_v23 = vld [vmem:[%s1284_s0 + $0x4] sm:$0xf]  ;;  %v730_v24 = vor.u32 %v866_v14, %v727_v15  ;;  %v754_v28 = vor.u32 %v871_v17, %v751_v18 }
  0x20   : > { %471 = vmatpush.bf16.msra.mxu2 %v762_v61  ;;  %851 = vmatmul.msk.bf16.vlgmr.msra.gmra.mxu1 %vm437_vm0, %v1143_v4  ;;  %v711_v25 = vld [vmem:[%s1284_s0 + $0x10] sm:$0xf0]  ;;  %v733_v26 = vld [vmem:[%s1284_s0 + $0x28] sm:$0xf]  ;;  %v869_v27 = vld [vmem:[%s1284_s0 + $0x34] sm:$0xf0]  ;;  %v710_v36 = vor.u32 %v864_v22, %v709_v21 }
  0x21   : > { %v894_v29 = vld [vmem:[%s1284_s0 + $0x104] sm:$0xf]  ;;  %v895_v30 = vld [vmem:[%s1284_s0 + $0x10c] sm:$0xf]  ;;  %v847_v31 = vld [vmem:[%s1284_s0 + $0x118] sm:$0xf0]  ;;  %v734_v37 = vor.u32 %v869_v27, %v733_v26  ;;  %v714_v38 = vor.u32 %v862_v23, %v711_v25 }
  0x22   : > { %496 = vmatpush.bf16.msrb.mxu1 %v782_v58  ;;  %v839_v33 = vld [vmem:[%s1284_s0 + $0x110] sm:$0xf0]  ;;  %v867_v34 = vld [vmem:[%s1284_s0 + $0x2c] sm:$0xf]  ;;  %v735_v35 = vld [vmem:[%s1284_s0 + $0x38] sm:$0xf0]  ;;  %v850_v41 = vor.u32 %v895_v30, %v847_v31 }
  0x23   : > { %522 = vmatpush.bf16.msrb.mxu3 %v786_v3  ;;  %446 = vmatpush.bf16.msra.mxu0 %v742_v7  ;;  %v717_v39 = vld [vmem:[%s1284_s0 + $0x8] sm:$0xf]  ;;  %v865_v40 = vld [vmem:[%s1284_s0 + $0x14] sm:$0xf0]  ;;  %v842_v42 = vor.u32 %v894_v29, %v839_v33  ;;  %v738_v43 = vor.u32 %v867_v34, %v735_v35  ;;  %v863_v45 = vld [vmem:[%s1284_s0 + $0xc] sm:$0xf] }
  0x24   : > { %472 = vmatpush.bf16.msra.mxu2 %v746_v10  ;;  %v719_v46 = vld [vmem:[%s1284_s0 + $0x18] sm:$0xf0]  ;;  %v718_v47 = vor.u32 %v865_v40, %v717_v39  ;;  %vm551_vm1 = vcmask (%p545_p4), 7168   ;;  %v952_v5 = vmov (%p545_p4), 0.0  }
  0x25   : > { %v722_v48 = vor.u32 %v863_v45, %v719_v46  ;;  %552 = vst.msk [vmem:[#allocation2] sm:$0xff] (%p545_p4), %vm551_vm1, %v952_v5 }
  0x26   : > { %497 = vmatpush.bf16.msrb.mxu1 %v766_v8  ;;  %553 = vst.msk [vmem:[#allocation3] sm:$0xff] (%p545_p4), %vm551_vm1, %v952_v5 }
  0x27   : > { %523 = vmatpush.bf16.msrb.mxu3 %v770_v16  ;;  %447 = vmatpush.bf16.msra.mxu0 %v726_v19 }
  0x28   : > { %473 = vmatpush.bf16.msra.mxu2 %v730_v24 }
  0x2a   : > { %498 = vmatpush.bf16.msrb.mxu1 %v750_v20 }
  0x2b   : > { %524 = vmatpush.bf16.msrb.mxu3 %v754_v28  ;;  %448 = vmatpush.bf16.msra.mxu0 %v710_v36 }
  0x2c   : > { %474 = vmatpush.bf16.msra.mxu2 %v714_v38 }
  0x2e   : > { %499 = vmatpush.bf16.msrb.mxu1 %v734_v37  ;;  %449 = vmatmul.bf16.vlgmr.msra.gmra.mxu0 %v254_v44 }
  0x2f   : > { %539 = vmatpush.bf16.msrb.mxu0 %v850_v41  ;;  %525 = vmatpush.bf16.msrb.mxu3 %v738_v43 }
  0x30   : > { %487 = vmatpush.bf16.msrb.mxu2 %v842_v42 }
  0x31   : > { %475 = vmatmul.bf16.vlgmr.msra.gmra.mxu2 %v254_v44 }
  0x32   : > { %500 = vmatpush.bf16.msrb.mxu1 %v718_v47 }
  0x33   : > { %526 = vmatpush.bf16.msrb.mxu3 %v722_v48 }
  0x35   : > { %501 = vmatmul.bf16.vlgmr.msrb.gmra.mxu1 %v254_v44 }
  0x36   : > { %527 = vmatmul.bf16.vlgmr.msrb.gmra.mxu3 %v254_v44 }
  0x3e   : > { %854 = vmatmul.msk.bf16.vlgmr.msrb.gmra.mxu0 %vm437_vm0, %v1143_v4 }
  0x41   : > { %852 = vmatmul.msk.bf16.vlgmr.msrb.gmra.mxu2 %vm437_vm0, %v1143_v4 }
  0x9d   : > { %v463_v49 = vpop.f32.mrf.mxu1 }
  0xa1   : > { %v515_v51 = vpop.f32.mrf.mxu3 }
  0xa5   : > { %v465_v50 = vpop.f32.mrf.mxu1 }
  0xa9   : > { %v517_v54 = vpop.f32.mrf.mxu3 }
  0xab   : > { %v450_v52 = vpop.f32.mrf.mxu0 }
  0xac   : > { %v1233_v53 = vadd.f32 %v463_v49, %v450_v52 }
  0xb2   : > { %v502_v55 = vpop.f32.mrf.mxu1 }
  0xb3   : > { %v1235_v56 = vadd.f32 %v515_v51, %v502_v55  ;;  %v452_v58 = vpop.f32.mrf.mxu0 }
  0xb4   : > { %v476_v57 = vpop.f32.mrf.mxu2 }
  0xb9   : > { %v528_v59 = vpop.f32.mrf.mxu3 }
  0xba   : > { %v504_v60 = vpop.f32.mrf.mxu1 }
  0xbb   : > { %v541_v62 = vpop.f32.mrf.mxu0 }
  0xbc   : > { %v478_v61 = vpop.f32.mrf.mxu2  ;;  %v1237_v63 = vadd.f32 %v541_v62, %v528_v59 }
  0xc1   : > { %v530_v0 = vpop.f32.mrf.mxu3 }
  0xc3   : > { %v543_v3 = vpop.f32.mrf.mxu0 }
  0xc4   : > { %v489_v1 = vpop.f32.mrf.mxu2 }
  0xc5   : > { %v1239_v2 = vadd.f32 %v489_v1, %v476_v57 }
  0xc8   : > { %550 = sbr.rel (!%p545_p4) target bundleno = 205 (0xcd), region = 40 }
  0xcc   : > { %v491_v4 = vpop.f32.mrf.mxu2 }
  0xcd PF: > { %p856_p5 = scmp.ne.s32.totalorder %s942_s15, 0 }
  0xcf   : > { %556 = sbr.rel (%p856_p5) target bundleno = 345 (0x159), region = 44 }
  0xd4   : > { %v558_v6 = vadd.f32 %v1239_v2, %v1233_v53  ;;  %v567_v7 = vmul.f32 %v1233_v53, %v1233_v53  ;;  %v568_v8 = vmul.f32 %v1239_v2, %v1239_v2  ;;  %v569_v10 = vmul.f32 %v1235_v56, %v1235_v56  ;;  %v557_v16 = vld [vmem:[#allocation2] sm:$0xff]  ;;  %v566_v19 = vld [vmem:[#allocation3] sm:$0xff] }
  0xd5   : > { %v570_v13 = vmul.f32 %v1237_v63, %v1237_v63  ;;  %vm564_vm2 = vcmask 7168  }
  0xd6   : > { %v559_v9 = vadd.f32 %v558_v6, %v1235_v56  ;;  %v571_v11 = vadd.f32 %v568_v8, %v567_v7 }
  0xd8   : > { %v560_v12 = vadd.f32 %v559_v9, %v1237_v63  ;;  %v572_v14 = vadd.f32 %v571_v11, %v569_v10 }
  0xda   : > { %561 = vadd.xlane.f32.xlu0 %v560_v12  ;;  %v573_v15 = vadd.f32 %v572_v14, %v570_v13 }
  0xe2   : > { %574 = vadd.xlane.f32.xlu0 %v573_v15 }
 0x14d   : > { %v562_v17 = vpop.xlane.xlu0 %561 }
 0x14e   : > { %v563_v18 = vadd.f32 %v562_v17, %v557_v16 }
 0x150   : > { %565 = vst.msk [vmem:[#allocation2] sm:$0xff] %vm564_vm2, %v563_v18 }
 0x155   : > { %v575_v20 = vpop.xlane.xlu0 %574 }
 0x156   : > { %v576_v21 = vadd.f32 %v575_v20, %v566_v19 }
 0x158   : > { %577 = vst.msk [vmem:[#allocation3] sm:$0xff] %vm564_vm2, %v576_v21 }
 0x159 PF: > { %579 = sbr.rel (!%p545_p4) target bundleno = 385 (0x181), region = 48  ;;  %v580_v22 = vld [vmem:[#allocation2] sm:$0xff] (%p545_p4)  ;;  %vm600_vm6 = vcmask (%p545_p4), 7168  }
 0x15a   : > { %v581_v24 = vmul.f32 (%p545_p4), 0.001953125, %v580_v22  ;;  %v598_v36 = vld [vmem:[%s1286_s2] sm:$0xff] (%p545_p4) }
 0x15b   : > { %v602_v39 = vld [vmem:[%s1287_s3] sm:$0xff] (%p545_p4) }
 0x15c   : > { %v584_v26 = vmul.f32 (%p545_p4), %v581_v24, %v581_v24 }
 0x15f   : > { %v582_v23 = vld [vmem:[#allocation3] sm:$0xff] }
 0x160   : > { %v583_v25 = vmul.f32 0.001953125, %v582_v23 }
 0x162   : > { %v585_v27 = vsub.f32 %v583_v25, %v584_v26 }
 0x164   : > { %v586_v28 = vmax.f32 %v585_v27, 0.0 }
 0x166   : > { %v587_v29 = vadd.f32 1e-05, %v586_v28 }
 0x168   : > { %925 = vrsqrt.f32 %v587_v29  ;;  %vm594_vm3 = vweird.f32 %v587_v29 }
 0x16e   : > { %v926_v30 = vpop.eup %925 }
 0x16f   : > { %v589_v31 = vmul.f32 %v926_v30, %v587_v29  ;;  %vm595_vm4 = vweird.f32 %v926_v30 }
 0x170   : > { %vm596_vm5 = vmor %vm594_vm3, %vm595_vm4 }
 0x171   : > { %v590_v32 = vmul.f32 %v926_v30, %v589_v31 }
 0x173   : > { %v591_v33 = vmul.f32 0.5, %v590_v32 }
 0x175   : > { %v592_v34 = vsub.f32 1.5, %v591_v33 }
 0x177   : > { %v593_v35 = vmul.f32 %v926_v30, %v592_v34 }
 0x179   : > { %v597_v37 = vsel %vm596_vm5, %v926_v30, %v593_v35 }
 0x17a   : > { %v599_v38 = vmul.f32 %v598_v36, %v597_v37 }
 0x17c   : > { %601 = vst.msk [vmem:[#allocation4] sm:$0xff] %vm600_vm6, %v599_v38  ;;  %v603_v40 = vmul.f32 %v599_v38, %v581_v24 }
 0x17e   : > { %v604_v41 = vsub.f32 %v602_v39, %v603_v40 }
 0x180   : > { %605 = vst.msk [vmem:[#allocation5] sm:$0xff] %vm600_vm6, %v604_v41 }
 0x181 PF: > { %p857_p6 = scmp.ne.s32.totalorder %s942_s15, 1 }
 0x183   : > { %609 = sbr.rel (%p857_p6) target bundleno = 525 (0x20d), region = 52 }
 0x188   : > { %v610_v42 = vld [vmem:[#allocation4] sm:$0xff]  ;;  %v953_v43 = vmov 0   ;;  %v620_v44 = vld [vmem:[#allocation5] sm:$0xff] }
 0x189   : > { %927 = vset.pattern.permute.xlu0 %v953_v43 }
 0x18a   : > { %613 = vperm.xlu0 %927, %v610_v42  }
 0x192   : > { %623 = vperm.xlu0 %927, %v620_v44  }
 0x1fc   : > { %v614_v45 = vpop.permute.xlu0 %613 }
 0x1fd   : > { %v616_v46 = vmul.f32 %v614_v45, %v1233_v53  ;;  %v617_v47 = vmul.f32 %v614_v45, %v1239_v2  ;;  %v618_v48 = vmul.f32 %v614_v45, %v1235_v56  ;;  %v619_v49 = vmul.f32 %v614_v45, %v1237_v63 }
 0x204   : > { %v624_v50 = vpop.permute.xlu0 %623 }
 0x205   : > { %v626_v51 = vadd.f32 %v624_v50, %v616_v46  ;;  %v627_v52 = vadd.f32 %v624_v50, %v617_v47  ;;  %v628_v54 = vadd.f32 %v624_v50, %v618_v48  ;;  %v629_v55 = vadd.f32 %v624_v50, %v619_v49 }
 0x207   : > { %v630_v57 = vmax.f32 %v626_v51, 0.0  ;;  %v631_v58 = vmax.f32 %v627_v52, 0.0  ;;  %v632_v59 = vmax.f32 %v628_v54, 0.0  ;;  %v633_v60 = vmax.f32 %v629_v55, 0.0 }
 0x209   : > { %v634_v61 = vpack.c.bf16 %v631_v58, %v630_v57  ;;  %v635_v62 = vpack.c.bf16 %v633_v60, %v632_v59 }
 0x20b   : > { %636 = vst [vmem:[%s1288_s4] sm:$0xff] %v634_v61 }
 0x20c   : > { %637 = vst [vmem:[%s1288_s4 + $0x8] sm:$0xff] %v635_v62 }
 0x20d PF: > { %s14_s17 = sadd.s32 1, %s950_s17   ;;  %s1289_s15 = smov %s946_s16 }
 0x20e   : > { %p11_p7 = scmp.ge.s32.totalorder %s14_s17, 4   ;;  %s1290_s16 = smov %s1292_s18 }
 0x210   :  { %13 = sbr.rel (!%p11_p7) target bundleno = 2 (0x2), region = 82 }

// kernel: unet_old_forward.27
= control target key start
LH: loop header
LB: loop body
LE: loop exit
PB: predicated region body
PF: predicated region fallthrough
CT: control target
= control target key end

     0   :  { %s873_s18 = smov 0   ;;  %s875_s19 = smov 0   ;;  %s1068_s0 = inlined_call_operand.vmem [shape: bf16[80,512], index: 0, kind: input, shape index: {}]   ;;  %s1069_s1 = inlined_call_operand.vmem [shape: bf16[8,80], index: 1, kind: input, shape index: {}]   ;;  %s1070_s2 = inlined_call_operand.vmem [shape: f32[8,1], index: 2, kind: input, shape index: {}]   ;;  %s1071_s3 = inlined_call_operand.vmem [shape: f32[8,1], index: 3, kind: input, shape index: {}]   ;;  %s1072_s4 = inlined_call_operand.vmem [shape: f32[1,8], index: 4, kind: input, shape index: {}]   ;;  %s1073_s5 = inlined_call_operand.vmem [shape: f32[1,512], index: 5, kind: output, shape index: {}]  }
   0x1   :  { %s877_s20 = smov 0  }
   0x2 LB: > { %s27_s21 = sadd.s32 1, %s835_s19  ;;  %p671_p0 = scmp.ge.s32.totalorder %s839_s20, 1  ;;  %s839_s20 = sphi %s877_s20, %s15_s20   ;;  %s835_s19 = sphi %s875_s19, %s1075_s19   ;;  %s831_s18 = sphi %s873_s18, %s1074_s18  }
   0x3   : > { %p29_p1 = scmp.ge.s32.totalorder %s27_s21, 2  ;;  %p200_p2 = scmp.lt.s32.totalorder %s839_s20, 3 }
   0x5   : > { %s1077_s21 = smov (%p29_p1, %s27_s21), 0  ;;  %p201_p3 = pnand %p671_p0, %p200_p2 }
   0x6   : > { %p416_p4 = scmp.eq.s32.totalorder (!%p201_p3), %s831_s18, 0 }
   0x7   : > { %204 = sbr.rel (%p201_p3) target bundleno = 631 (0x277), region = 40 }
   0xc   : > { %v738_v0 = vld [vmem:[%s1068_s0 + $0x80] sm:$0xf]  ;;  %v785_v1 = vld [vmem:[%s1068_s0 + $0x8c] sm:$0xf0]  ;;  %v783_v2 = vld [vmem:[%s1068_s0 + $0x84] sm:$0xf] }
   0xd   : > { %v739_v3 = vor.u32 %v785_v1, %v738_v0  ;;  %v740_v4 = vld [vmem:[%s1068_s0 + $0x90] sm:$0xf0]  ;;  %v746_v5 = vld [vmem:[%s1068_s0 + $0x88] sm:$0xf]  ;;  %v786_v6 = vld [vmem:[%s1068_s0 + $0x94] sm:$0xf0] }
   0xe   : > { %v743_v7 = vor.u32 %v783_v2, %v740_v4  ;;  %v747_v8 = vor.u32 %v786_v6, %v746_v5  ;;  %v784_v9 = vld [vmem:[%s1068_s0 + $0x8c] sm:$0xf]  ;;  %v748_v10 = vld [vmem:[%s1068_s0 + $0x98] sm:$0xf0]  ;;  %v722_v11 = vld [vmem:[%s1068_s0 + $0x60] sm:$0xf] }
   0xf   : > { %367 = vmatpush.bf16.msra.mxu0 %v739_v3  ;;  %v751_v12 = vor.u32 %v784_v9, %v748_v10  ;;  %v781_v13 = vld [vmem:[%s1068_s0 + $0x6c] sm:$0xf0]  ;;  %v779_v14 = vld [vmem:[%s1068_s0 + $0x64] sm:$0xf]  ;;  %v724_v15 = vld [vmem:[%s1068_s0 + $0x70] sm:$0xf0] }
  0x10   : > { %380 = vmatpush.bf16.msra.mxu1 %v743_v7  ;;  %393 = vmatpush.bf16.msra.mxu2 %v747_v8  ;;  %v723_v16 = vor.u32 %v781_v13, %v722_v11  ;;  %v727_v17 = vor.u32 %v779_v14, %v724_v15  ;;  %v730_v18 = vld [vmem:[%s1068_s0 + $0x68] sm:$0xf]  ;;  %v782_v19 = vld [vmem:[%s1068_s0 + $0x74] sm:$0xf0]  ;;  %v780_v20 = vld [vmem:[%s1068_s0 + $0x6c] sm:$0xf] }
  0x11   : > { %406 = vmatpush.bf16.msra.mxu3 %v751_v12  ;;  %v731_v21 = vor.u32 %v782_v19, %v730_v18  ;;  %v732_v22 = vld [vmem:[%s1068_s0 + $0x78] sm:$0xf0]  ;;  %v706_v23 = vld [vmem:[%s1068_s0 + $0x40] sm:$0xf]  ;;  %v777_v24 = vld [vmem:[%s1068_s0 + $0x4c] sm:$0xf0] }
  0x12   : > { %v735_v25 = vor.u32 %v780_v20, %v732_v22  ;;  %v775_v26 = vld [vmem:[%s1068_s0 + $0x44] sm:$0xf]  ;;  %v708_v27 = vld [vmem:[%s1068_s0 + $0x50] sm:$0xf0]  ;;  %v714_v28 = vld [vmem:[%s1068_s0 + $0x48] sm:$0xf]  ;;  %v707_v29 = vor.u32 %v777_v24, %v706_v23 }
  0x13   : > { %368 = vmatpush.bf16.msra.mxu0 %v723_v16  ;;  %v778_v30 = vld [vmem:[%s1068_s0 + $0x54] sm:$0xf0]  ;;  %v776_v31 = vld [vmem:[%s1068_s0 + $0x4c] sm:$0xf]  ;;  %v716_v32 = vld [vmem:[%s1068_s0 + $0x58] sm:$0xf0]  ;;  %v711_v33 = vor.u32 %v775_v26, %v708_v27 }
  0x14   : > { %381 = vmatpush.bf16.msra.mxu1 %v727_v17  ;;  %394 = vmatpush.bf16.msra.mxu2 %v731_v21  ;;  %v715_v34 = vor.u32 %v778_v30, %v714_v28  ;;  %v690_v35 = vld [vmem:[%s1068_s0 + $0x20] sm:$0xf]  ;;  %v773_v36 = vld [vmem:[%s1068_s0 + $0x2c] sm:$0xf0]  ;;  %v771_v37 = vld [vmem:[%s1068_s0 + $0x24] sm:$0xf]  ;;  %v719_v38 = vor.u32 %v776_v31, %v716_v32 }
  0x15   : > { %407 = vmatpush.bf16.msra.mxu3 %v735_v25  ;;  %v692_v39 = vld [vmem:[%s1068_s0 + $0x30] sm:$0xf0]  ;;  %v698_v40 = vld [vmem:[%s1068_s0 + $0x28] sm:$0xf]  ;;  %v774_v41 = vld [vmem:[%s1068_s0 + $0x34] sm:$0xf0]  ;;  %v691_v44 = vor.u32 %v773_v36, %v690_v35 }
  0x16   : > { %v772_v42 = vld [vmem:[%s1068_s0 + $0x2c] sm:$0xf]  ;;  %v700_v43 = vld [vmem:[%s1068_s0 + $0x38] sm:$0xf0]  ;;  %v695_v45 = vor.u32 %v771_v37, %v692_v39  ;;  %v699_v46 = vor.u32 %v774_v41, %v698_v40  ;;  %v674_v47 = vld [vmem:[%s1068_s0] sm:$0xf] }
  0x17   : > { %369 = vmatpush.bf16.msra.mxu0 %v707_v29  ;;  %v769_v48 = vld [vmem:[%s1068_s0 + $0xc] sm:$0xf0]  ;;  %v767_v49 = vld [vmem:[%s1068_s0 + $0x4] sm:$0xf]  ;;  %v703_v50 = vor.u32 %v772_v42, %v700_v43  ;;  %v676_v51 = vld [vmem:[%s1068_s0 + $0x10] sm:$0xf0] }
  0x18   : > { %382 = vmatpush.bf16.msra.mxu1 %v711_v33  ;;  %395 = vmatpush.bf16.msra.mxu2 %v715_v34  ;;  %v682_v52 = vld [vmem:[%s1068_s0 + $0x8] sm:$0xf]  ;;  %v770_v53 = vld [vmem:[%s1068_s0 + $0x14] sm:$0xf0]  ;;  %v768_v54 = vld [vmem:[%s1068_s0 + $0xc] sm:$0xf]  ;;  %v675_v56 = vor.u32 %v769_v48, %v674_v47  ;;  %v679_v57 = vor.u32 %v767_v49, %v676_v51 }
  0x19   : > { %408 = vmatpush.bf16.msra.mxu3 %v719_v38  ;;  %v684_v55 = vld [vmem:[%s1068_s0 + $0x18] sm:$0xf0]  ;;  %v683_v58 = vor.u32 %v770_v53, %v682_v52  ;;  %v239_v60 = vld [vmem:[%s1069_s1] sm:$0xf]  ;;  %vm360_vm0 = vcmask 654336   ;;  %vm422_vm1 = vcmask (%p416_p4), 7168  }
  0x1a   : > { %v687_v59 = vor.u32 %v768_v54, %v684_v55  ;;  %v841_v5 = vmov (%p416_p4), 0.0  }
  0x1b   : > { %370 = vmatpush.bf16.msra.mxu0 %v691_v44  ;;  %423 = vst.msk [vmem:[#allocation2] sm:$0xff] (%p416_p4), %vm422_vm1, %v841_v5 }
  0x1c   : > { %383 = vmatpush.bf16.msra.mxu1 %v695_v45  ;;  %396 = vmatpush.bf16.msra.mxu2 %v699_v46  ;;  %424 = vst.msk [vmem:[#allocation3] sm:$0xff] (%p416_p4), %vm422_vm1, %v841_v5 }
  0x1d   : > { %409 = vmatpush.bf16.msra.mxu3 %v703_v50 }
  0x1f   : > { %371 = vmatpush.bf16.msra.mxu0 %v675_v56 }
  0x20   : > { %384 = vmatpush.bf16.msra.mxu1 %v679_v57  ;;  %397 = vmatpush.bf16.msra.mxu2 %v683_v58 }
  0x21   : > { %410 = vmatpush.bf16.msra.mxu3 %v687_v59 }
  0x22   : > { %752 = vmatmul.msk.bf16.vlgmr.msra.gmra.mxu0 %vm360_vm0, %v239_v60 }
  0x23   : > { %753 = vmatmul.msk.bf16.vlgmr.msra.gmra.mxu1 %vm360_vm0, %v239_v60  ;;  %754 = vmatmul.msk.bf16.vlgmr.msra.gmra.mxu2 %vm360_vm0, %v239_v60 }
  0x24   : > { %755 = vmatmul.msk.bf16.vlgmr.msra.gmra.mxu3 %vm360_vm0, %v239_v60 }
  0x9f   : > { %v1017_v61 = vpop.f32.mrf.mxu0 }
  0xa0   : > { %v1019_v62 = vpop.f32.mrf.mxu1 }
  0xa6   : > { %v1021_v63 = vpop.f32.mrf.mxu2 }
  0xa7   : > { %v1023_v0 = vpop.f32.mrf.mxu3  ;;  %v375_v1 = vpop.f32.mrf.mxu0 }
  0xa8   : > { %v388_v2 = vpop.f32.mrf.mxu1 }
  0xab   : > { %421 = sbr.rel (!%p416_p4) target bundleno = 176 (0xb0), region = 44 }
  0xae   : > { %v401_v3 = vpop.f32.mrf.mxu2 }
  0xaf   : > { %v414_v4 = vpop.f32.mrf.mxu3 }
  0xb0 PF: > { %p757_p5 = scmp.ne.s32.totalorder %s831_s18, 0 }
  0xb2   : > { %427 = sbr.rel (%p757_p5) target bundleno = 316 (0x13c), region = 48 }
  0xb7   : > { %v429_v6 = vadd.f32 %v1019_v62, %v1017_v61  ;;  %v438_v7 = vmul.f32 %v1017_v61, %v1017_v61  ;;  %v439_v8 = vmul.f32 %v1019_v62, %v1019_v62  ;;  %v440_v10 = vmul.f32 %v1021_v63, %v1021_v63  ;;  %v428_v16 = vld [vmem:[#allocation2] sm:$0xff]  ;;  %v437_v19 = vld [vmem:[#allocation3] sm:$0xff] }
  0xb8   : > { %v441_v13 = vmul.f32 %v1023_v0, %v1023_v0  ;;  %vm435_vm2 = vcmask 7168  }
  0xb9   : > { %v430_v9 = vadd.f32 %v429_v6, %v1021_v63  ;;  %v442_v11 = vadd.f32 %v439_v8, %v438_v7 }
  0xbb   : > { %v431_v12 = vadd.f32 %v430_v9, %v1023_v0  ;;  %v443_v14 = vadd.f32 %v442_v11, %v440_v10 }
  0xbd   : > { %432 = vadd.xlane.f32.xlu0 %v431_v12  ;;  %v444_v15 = vadd.f32 %v443_v14, %v441_v13 }
  0xc5   : > { %445 = vadd.xlane.f32.xlu0 %v444_v15 }
 0x130   : > { %v433_v17 = vpop.xlane.xlu0 %432 }
 0x131   : > { %v434_v18 = vadd.f32 %v433_v17, %v428_v16 }
 0x133   : > { %436 = vst.msk [vmem:[#allocation2] sm:$0xff] %vm435_vm2, %v434_v18 }
 0x138   : > { %v446_v20 = vpop.xlane.xlu0 %445 }
 0x139   : > { %v447_v21 = vadd.f32 %v446_v20, %v437_v19 }
 0x13b   : > { %448 = vst.msk [vmem:[#allocation3] sm:$0xff] %vm435_vm2, %v447_v21 }
 0x13c PF: > { %450 = sbr.rel (!%p416_p4) target bundleno = 356 (0x164), region = 52  ;;  %v451_v22 = vld [vmem:[#allocation2] sm:$0xff] (%p416_p4)  ;;  %vm471_vm6 = vcmask (%p416_p4), 7168  }
 0x13d   : > { %v452_v24 = vmul.f32 (%p416_p4), 0.001953125, %v451_v22  ;;  %v469_v36 = vld [vmem:[%s1070_s2] sm:$0xff] (%p416_p4) }
 0x13e   : > { %v473_v39 = vld [vmem:[%s1071_s3] sm:$0xff] (%p416_p4) }
 0x13f   : > { %v455_v26 = vmul.f32 (%p416_p4), %v452_v24, %v452_v24 }
 0x142   : > { %v453_v23 = vld [vmem:[#allocation3] sm:$0xff] }
 0x143   : > { %v454_v25 = vmul.f32 0.001953125, %v453_v23 }
 0x145   : > { %v456_v27 = vsub.f32 %v454_v25, %v455_v26 }
 0x147   : > { %v457_v28 = vmax.f32 %v456_v27, 0.0 }
 0x149   : > { %v458_v29 = vadd.f32 1e-05, %v457_v28 }
 0x14b   : > { %814 = vrsqrt.f32 %v458_v29  ;;  %vm465_vm3 = vweird.f32 %v458_v29 }
 0x151   : > { %v815_v30 = vpop.eup %814 }
 0x152   : > { %v460_v31 = vmul.f32 %v815_v30, %v458_v29  ;;  %vm466_vm4 = vweird.f32 %v815_v30 }
 0x153   : > { %vm467_vm5 = vmor %vm465_vm3, %vm466_vm4 }
 0x154   : > { %v461_v32 = vmul.f32 %v815_v30, %v460_v31 }
 0x156   : > { %v462_v33 = vmul.f32 0.5, %v461_v32 }
 0x158   : > { %v463_v34 = vsub.f32 1.5, %v462_v33 }
 0x15a   : > { %v464_v35 = vmul.f32 %v815_v30, %v463_v34 }
 0x15c   : > { %v468_v37 = vsel %vm467_vm5, %v815_v30, %v464_v35 }
 0x15d   : > { %v470_v38 = vmul.f32 %v469_v36, %v468_v37 }
 0x15f   : > { %472 = vst.msk [vmem:[#allocation4] sm:$0xff] %vm471_vm6, %v470_v38  ;;  %v474_v40 = vmul.f32 %v470_v38, %v452_v24 }
 0x161   : > { %v475_v41 = vsub.f32 %v473_v39, %v474_v40 }
 0x163   : > { %476 = vst.msk [vmem:[#allocation5] sm:$0xff] %vm471_vm6, %v475_v41 }
 0x164 PF: > { %p758_p6 = scmp.ne.s32.totalorder %s831_s18, 1 }
 0x166   : > { %480 = sbr.rel (%p758_p6) target bundleno = 631 (0x277), region = 56 }
 0x16b   : > { %v481_v42 = vld [vmem:[#allocation4] sm:$0xff]  ;;  %v842_v43 = vmov 0   ;;  %v491_v44 = vld [vmem:[#allocation5] sm:$0xff]  ;;  %v505_v59 = vld [vmem:[%s1072_s4] sm:$0x1]  ;;  %vm506_vm7 = vcmask 64512  }
 0x16c   : > { %816 = vset.pattern.permute.xlu0 %v842_v43  ;;  %vm597_vm8 = vcmask 1040384   ;;  %vm599_vm9 = vcmask 1042434   ;;  %vm601_vm10 = vcmask 1041408  }
 0x16d   : > { %484 = vperm.xlu0 %816, %v481_v42  }
 0x175   : > { %494 = vperm.xlu0 %816, %v491_v44  }
 0x1df   : > { %v485_v45 = vpop.permute.xlu0 %484 }
 0x1e0   : > { %v487_v46 = vmul.f32 %v485_v45, %v1017_v61  ;;  %v488_v47 = vmul.f32 %v485_v45, %v1019_v62  ;;  %v489_v48 = vmul.f32 %v485_v45, %v1021_v63  ;;  %v490_v49 = vmul.f32 %v485_v45, %v1023_v0 }
 0x1e1   : > { %v604_v63 = vlaneseq }
 0x1e3   : > { %vm606_vm11 = vcmp.lt.s32.totalorder %v604_v63, 512 }
 0x1e7   : > { %v495_v50 = vpop.permute.xlu0 %494 }
 0x1e8   : > { %v497_v51 = vadd.f32 %v495_v50, %v487_v46  ;;  %v498_v52 = vadd.f32 %v495_v50, %v488_v47  ;;  %v499_v53 = vadd.f32 %v495_v50, %v489_v48  ;;  %v500_v54 = vadd.f32 %v495_v50, %v490_v49 }
 0x1ea   : > { %v501_v55 = vmax.f32 %v497_v51, 0.0  ;;  %v502_v56 = vmax.f32 %v498_v52, 0.0  ;;  %v503_v57 = vmax.f32 %v499_v53, 0.0  ;;  %v504_v58 = vmax.f32 %v500_v54, 0.0 }
 0x1ec   : > { %525 = vmatpush.msra.mxu0 %v501_v55  ;;  %545 = vmatpush.msra.mxu1 %v502_v56 }
 0x1ed   : > { %565 = vmatpush.msra.mxu2 %v503_v57  ;;  %585 = vmatpush.msra.mxu3 %v504_v58 }
 0x1ee   : > { %761 = vmatmul.msk.f32.vlgmr.msra.gmra.mxu2 %vm506_vm7, %v505_v59  ;;  %762 = vmatmul.msk.f32.vlgmr.msra.gmra.mxu3 %vm506_vm7, %v505_v59 }
 0x1ef   : > { %760 = vmatmul.msk.f32.vlgmr.msra.gmra.mxu1 %vm506_vm7, %v505_v59  ;;  %759 = vmatmul.msk.f32.vlgmr.msra.gmra.mxu0 %vm506_vm7, %v505_v59 }
 0x26c   : > { %v547_v60 = vpop.f32.mrf.mxu1  ;;  %v527_v62 = vpop.f32.mrf.mxu0 }
 0x26d   : > { %v594_v61 = vrot.slane %v547_v60, 7 }
 0x26f   : > { %v598_v4 = vsel %vm597_vm8, %v527_v62, %v594_v61 }
 0x271   : > { %v567_v0 = vpop.f32.mrf.mxu2  ;;  %v587_v1 = vpop.f32.mrf.mxu3 }
 0x272   : > { %v595_v2 = vrot.slane %v567_v0, 6  ;;  %v596_v3 = vrot.slane %v587_v1, 5 }
 0x274   : > { %v600_v5 = vsel %vm599_vm9, %v595_v2, %v596_v3 }
 0x275   : > { %v602_v6 = vsel %vm601_vm10, %v598_v4, %v600_v5 }
 0x276   : > { %608 = vst.msk [vmem:[%s1073_s5] sm:$0xf] %vm606_vm11, %v602_v6 }
 0x277 PF: > { %s15_s20 = sadd.s32 1, %s839_s20   ;;  %s1074_s18 = smov %s835_s19 }
 0x278   : > { %p12_p7 = scmp.ge.s32.totalorder %s15_s20, 4   ;;  %s1075_s19 = smov %s1077_s21 }
 0x27a   :  { %14 = sbr.rel (!%p12_p7) target bundleno = 2 (0x2), region = 86 }

</bundles_post_ra>
